<compile_context>
chip_gen: v7x
topology: tpu7x:2x2x1
jax: 0.10.0
libtpu: 0.0.40
codegen_flags: <defaults>
</compile_context>

<pallas_src>
from functools import partial

import jax
import jax.numpy as jnp
from jax import lax
from jax.experimental import pallas as pl
from jax.experimental.pallas import tpu as pltpu

_EPS = 1e-5  # PyTorch BatchNorm2d default eps


# ---------------------------------------------------------------------------
# in-kernel helpers (pure value math on lane-dense (C, HW) tiles)
# ---------------------------------------------------------------------------
def _silu(v):
    # sigmoid via EUP exp + EUP approx reciprocal (keeps the divide off VALU).
    return v * pl.reciprocal(1.0 + jnp.exp(-v), approx=True)


def _dw5x5(x2d, wt_ref, mask_ref, shifts):
    """5x5 depthwise conv (stride 1, pad 2) on one image flattened to (C, HW).

    wt_ref[t]   : (C, 1)  folded (BN-scaled) weight of tap t
    mask_ref[t] : (1, HW) zero-padding validity mask of tap t (shared over C)
    shifts[t]   : static lane-roll bringing tap t's source pixel in place
    """
    acc = None
    for t, sh in enumerate(shifts):
        shifted = x2d if sh == 0 else pltpu.roll(x2d, shift=sh, axis=1)
        term = shifted * mask_ref[t] * wt_ref[t]      # 2 VALU muls per tap
        acc = term if acc is None else acc + term
    return acc


# ---------------------------------------------------------------------------
# Pallas kernel: whole GhostBottleneck forward for one batch tile
# ---------------------------------------------------------------------------
def _ghost_bottleneck_kernel(x_ref,
                             w1_ref, b1_ref,          # GhostConv1.cv1 (1x1, SiLU)
                             wt2_ref, b2_ref,         # GhostConv1.cv2 (dw5x5, SiLU)
                             w3_ref, b3_ref,          # GhostConv2.cv1 (1x1, no act)
                             wt4_ref, b4_ref,         # GhostConv2.cv2 (dw5x5, no act)
                             mask_ref,                # shared (25, 1, HW) validity mask
                             o_ref,
                             *, shifts, cg1, fuse_ghost2):
    bt = x_ref.shape[0]
    w1 = w1_ref[...]                                   # (cg1, C1)    bf16
    w3 = w3_ref[...]                                   # (cg2, 2*cg1) bf16
    b1, b2, b3, b4 = b1_ref[...], b2_ref[...], b3_ref[...], b4_ref[...]
    mxu_dt = w1.dtype
    if not fuse_ghost2:
        w3a, w3b = w3[:, :cg1], w3[:, cg1:]

    for b in range(bt):                    # static unroll over the batch tile
        x = x_ref[b].astype(jnp.float32)                       # (C1, HW)

        # --- GhostConv #1 (act=SiLU) ---
        y1 = jnp.dot(w1, x.astype(mxu_dt),
                     preferred_element_type=jnp.float32) + b1
        y1 = _silu(y1)                                          # (cg1, HW)
        y2 = _silu(_dw5x5(y1, wt2_ref, mask_ref, shifts) + b2)  # (cg1, HW)

        # --- s == 1: middle DWConv is nn.Identity ---

        # --- GhostConv #2 (act=False); concat(y1, y2) never hits HBM:
        #     single fused MXU dot over a sublane concat when cg1 % 8 == 0,
        #     otherwise two partial dots. ---
        if fuse_ghost2:
            y12 = jnp.concatenate([y1, y2], axis=0).astype(mxu_dt)
            y3 = jnp.dot(w3, y12, preferred_element_type=jnp.float32) + b3
        else:
            y3 = (jnp.dot(w3a, y1.astype(mxu_dt),
                          preferred_element_type=jnp.float32)
                  + jnp.dot(w3b, y2.astype(mxu_dt),
                            preferred_element_type=jnp.float32)
                  + b3)                                         # (cg2, HW)
        y4 = _dw5x5(y3, wt4_ref, mask_ref, shifts) + b4         # (cg2, HW)

        # --- concat + identity shortcut; one full-tile (C2, HW) store ---
        o_ref[b] = (jnp.concatenate([y3, y4], axis=0) + x).astype(o_ref.dtype)


# ---------------------------------------------------------------------------
# wrapper (BN folding, mask/shift precompute, layout plumbing = plain JAX)
# ---------------------------------------------------------------------------
def ghost_bottleneck(x, params, *, mxu_dtype=jnp.bfloat16):
    """GhostBottleneck(c1, c2, k=3, s=1) forward.  x: (B, C1, H, W)."""
    B, C1, H, W = x.shape
    HW = H * W
    w1, w2, w3, w4 = params["w1"], params["w2"], params["w3"], params["w4"]
    cg1, cg2 = w1.shape[0], w3.shape[0]
    C2 = 2 * cg2
    assert C2 == C1, "s=1 identity shortcut requires c1 == c2"
    assert w3.shape[1] == 2 * cg1
    assert HW % 128 == 0, "flattened spatial axis must be lane-aligned"

    # Batch tile: >= 2 grid steps whenever B >= 2 (keeps both v7x TensorCores
    # busy), capped at 8 images per step to amortise per-step overhead.
    if B == 1:
        Bt = 1
    else:
        cap = min(8, B // 2)
        Bt = max(bt for bt in range(1, cap + 1) if B % bt == 0)

    # --- fold BatchNorm into conv weights (scale) + per-channel shift ---
    def fold(bn):
        gamma, beta, mean, var = bn
        scale = gamma / jnp.sqrt(var + _EPS)
        shift = beta - mean * scale
        return scale, shift

    s1, b1 = fold(params["bn1"])
    s2, b2 = fold(params["bn2"])
    s3, b3 = fold(params["bn3"])
    s4, b4 = fold(params["bn4"])

    w1f = (w1 * s1[:, None]).astype(mxu_dtype)                    # (cg1, C1)
    w3f = (w3 * s3[:, None]).astype(mxu_dtype)                    # (cg2, 2*cg1)
    wt2 = (w2 * s2[:, None, None]).reshape(cg1, 25).T[:, :, None]  # (25, cg1, 1)
    wt4 = (w4 * s4[:, None, None]).reshape(cg2, 25).T[:, :, None]  # (25, cg2, 1)
    b1c, b2c, b3c, b4c = (b[:, None] for b in (b1, b2, b3, b4))    # (c, 1) f32

    # --- per-tap zero-padding validity mask, shared across channels/images ---
    p = jnp.arange(HW)
    hh, ww = p // W, p % W
    masks, shifts = [], []
    for odh in range(-2, 3):            # tap order matches w.reshape(C, 25)
        for odw in range(-2, 3):
            valid = ((hh + odh >= 0) & (hh + odh < H)
                     & (ww + odw >= 0) & (ww + odw < W))
            masks.append(valid.astype(jnp.float32))
            shifts.append((-(odh * W + odw)) % HW)   # pltpu.roll amount
    mask = jnp.stack(masks)[:, None, :]                            # (25, 1, HW)

    # --- lane-dense, transpose-free layout: NCHW -> (B, C, H*W) is free ---
    x3 = x.reshape(B, C1, HW)

    operands = (w1f, b1c, wt2, b2c, w3f, b3c, wt4, b4c, mask)

    def const_spec(a):
        r = a.ndim
        # Block index never changes -> DMA'd once; footprint is tiny now that
        # the (25, C, N) weight*mask tensors are gone.
        return pl.BlockSpec(a.shape, lambda i, _r=r: (0,) * _r)

    grid_spec = pltpu.PrefetchScalarGridSpec(
        num_scalar_prefetch=0,
        grid=(B // Bt,),
        in_specs=[pl.BlockSpec((Bt, C1, HW), lambda i: (i, 0, 0))]
                + [const_spec(a) for a in operands],
        out_specs=pl.BlockSpec((Bt, C2, HW), lambda i: (i, 0, 0)),
    )

    # Explicit VMEM budget: double-buffered in/out blocks + constants + slack
    # (keeps the kernel inside v7x's 64 MiB physical VMEM with headroom).
    block_bytes = (Bt * C1 * HW + Bt * C2 * HW) * x.dtype.itemsize
    const_bytes = sum(a.size * a.dtype.itemsize for a in operands)
    vmem_limit = int(min(56 << 20, 4 * block_bytes + 2 * const_bytes + (32 << 20)))

    out3 = pl.pallas_call(
        partial(_ghost_bottleneck_kernel, shifts=tuple(shifts), cg1=cg1,
                fuse_ghost2=(cg1 % 8 == 0)),
        out_shape=jax.ShapeDtypeStruct((B, C2, HW), x.dtype),
        grid_spec=grid_spec,
        compiler_params=pltpu.CompilerParams(
            dimension_semantics=("parallel",),
            vmem_limit_bytes=vmem_limit),
    )(x3, *operands)

    return out3.reshape(B, C2, H, W)


# ---------------------------------------------------------------------------
# deterministic synthetic parameters + pure-JAX reference
# ---------------------------------------------------------------------------
def init_params(key, c1, c2):
    c_ = c2 // 2          # hidden width of the bottleneck
    cg1 = c_ // 2         # GhostConv1 internal width
    cg2 = c2 // 2         # GhostConv2 internal width
    keys = jax.random.split(key, 8)

    def conv_w(k, shape, fan_in):
        return jax.random.normal(k, shape, jnp.float32) / jnp.sqrt(float(fan_in))

    def bn_p(k, c):
        k1, k2, k3, k4 = jax.random.split(k, 4)
        gamma = jax.random.uniform(k1, (c,), jnp.float32, minval=0.5, maxval=1.5)
        beta = 0.1 * jax.random.normal(k2, (c,), jnp.float32)
        mean = 0.1 * jax.random.normal(k3, (c,), jnp.float32)
        var = jax.random.uniform(k4, (c,), jnp.float32, minval=0.5, maxval=1.5)
        return (gamma, beta, mean, var)

    return {
        "w1": conv_w(keys[0], (cg1, c1), c1),      "bn1": bn_p(keys[1], cg1),
        "w2": conv_w(keys[2], (cg1, 5, 5), 25),    "bn2": bn_p(keys[3], cg1),
        "w3": conv_w(keys[4], (cg2, c_), c_),      "bn3": bn_p(keys[5], cg2),
        "w4": conv_w(keys[6], (cg2, 5, 5), 25),    "bn4": bn_p(keys[7], cg2),
    }


def ref_forward(x, params):
    def bn(y, p):
        gamma, beta, mean, var = p
        scale = gamma / jnp.sqrt(var + _EPS)
        shift = beta - mean * scale
        return y * scale[None, :, None, None] + shift[None, :, None, None]

    def silu(v):
        return v * jax.nn.sigmoid(v)

    def conv1x1(y, w):
        return lax.conv_general_dilated(
            y, w[:, :, None, None], window_strides=(1, 1), padding="VALID",
            dimension_numbers=("NCHW", "OIHW", "NCHW"))

    def dwconv5(y, w):
        C = y.shape[1]
        return lax.conv_general_dilated(
            y, w[:, None, :, :], window_strides=(1, 1),
            padding=[(2, 2), (2, 2)], feature_group_count=C,
            dimension_numbers=("NCHW", "OIHW", "NCHW"))

    y1 = silu(bn(conv1x1(x, params["w1"]), params["bn1"]))
    y2 = silu(bn(dwconv5(y1, params["w2"]), params["bn2"]))
    g1 = jnp.concatenate([y1, y2], axis=1)
    y3 = bn(conv1x1(g1, params["w3"]), params["bn3"])
    y4 = bn(dwconv5(y3, params["w4"]), params["bn4"])
    return jnp.concatenate([y3, y4], axis=1) + x


if __name__ == "__main__":
    # GhostBottleneck(c1=32, c2=32, k=3, s=1).  Channel counts are multiples
    # of 8 so every sublane slice/store is (8,128)-aligned and the fused
    # GhostConv2 matmul path is exercised.
    B, C, H, W = 2, 32, 16, 16
    key = jax.random.PRNGKey(0)
    k_x, k_p = jax.random.split(key)
    x = jax.random.normal(k_x, (B, C, H, W), jnp.float32)
    params = init_params(k_p, c1=C, c2=C)

    out = jax.block_until_ready(ghost_bottleneck(x, params))
    ref = ref_forward(x, params)

    assert out.shape == (B, C, H, W)
    abs_err = float(jnp.max(jnp.abs(out - ref)))
    rel_err = float(jnp.linalg.norm(out - ref) / jnp.linalg.norm(ref))
    # bf16 MXU operands (f32 accumulation) + EUP approx reciprocal -> wider
    # tolerance than the previous all-f32 version.
    if abs_err > 1.5e-1 or rel_err > 2e-2:
        raise AssertionError(
            f"kernel/reference mismatch: max abs err {abs_err:.3e}, "
            f"rel err {rel_err:.3e}")
    print("KERNEL_OK")
</pallas_src>

<mosaic_0001>
module attributes {stable_mosaic.version = 11 : i64} {
  func.func @_ghost_bottleneck_kernel(%arg0: i32, %arg1: memref<1x32x256xf32, #tpu.memory_space<vmem>>, %arg2: memref<8x32xbf16, #tpu.memory_space<vmem>>, %arg3: memref<8x1xf32, #tpu.memory_space<vmem>>, %arg4: memref<25x8x1xf32, #tpu.memory_space<vmem>>, %arg5: memref<8x1xf32, #tpu.memory_space<vmem>>, %arg6: memref<16x16xbf16, #tpu.memory_space<vmem>>, %arg7: memref<16x1xf32, #tpu.memory_space<vmem>>, %arg8: memref<25x16x1xf32, #tpu.memory_space<vmem>>, %arg9: memref<16x1xf32, #tpu.memory_space<vmem>>, %arg10: memref<25x1x256xf32, #tpu.memory_space<vmem>>, %arg11: memref<1x32x256xf32, #tpu.memory_space<vmem>>) attributes {dimension_semantics = [#tpu.dimension_semantics<parallel>], iteration_bounds = array<i64: 2>, scalar_prefetch = 0 : i64, scratch_operands = 0 : i64, tpu.core_type = #tpu.core_type<tc>, window_params = [{transform_indices = @transform_0, window_bounds = array<i64: 1, 32, 256>}, {pipeline_mode = #tpu.pipeline_mode<synchronous>, transform_indices = @transform_1, window_bounds = array<i64: 8, 32>}, {pipeline_mode = #tpu.pipeline_mode<synchronous>, transform_indices = @transform_2, window_bounds = array<i64: 8, 1>}, {pipeline_mode = #tpu.pipeline_mode<synchronous>, transform_indices = @transform_3, window_bounds = array<i64: 25, 8, 1>}, {pipeline_mode = #tpu.pipeline_mode<synchronous>, transform_indices = @transform_4, window_bounds = array<i64: 8, 1>}, {pipeline_mode = #tpu.pipeline_mode<synchronous>, transform_indices = @transform_5, window_bounds = array<i64: 16, 16>}, {pipeline_mode = #tpu.pipeline_mode<synchronous>, transform_indices = @transform_6, window_bounds = array<i64: 16, 1>}, {pipeline_mode = #tpu.pipeline_mode<synchronous>, transform_indices = @transform_7, window_bounds = array<i64: 25, 16, 1>}, {pipeline_mode = #tpu.pipeline_mode<synchronous>, transform_indices = @transform_8, window_bounds = array<i64: 16, 1>}, {pipeline_mode = #tpu.pipeline_mode<synchronous>, transform_indices = @transform_9, window_bounds = array<i64: 25, 1, 256>}, {transform_indices = @transform_10, window_bounds = array<i64: 1, 32, 256>}]} {
    %c0 = arith.constant 0 : index
    %c0_0 = arith.constant 0 : index
    %0 = vector.load %arg2[%c0, %c0_0] : memref<8x32xbf16, #tpu.memory_space<vmem>>, vector<8x32xbf16>
    %c0_1 = arith.constant 0 : index
    %c0_2 = arith.constant 0 : index
    %1 = vector.load %arg6[%c0_1, %c0_2] : memref<16x16xbf16, #tpu.memory_space<vmem>>, vector<16x16xbf16>
    %c0_3 = arith.constant 0 : index
    %c0_4 = arith.constant 0 : index
    %2 = vector.load %arg3[%c0_3, %c0_4] : memref<8x1xf32, #tpu.memory_space<vmem>>, vector<8x1xf32>
    %c0_5 = arith.constant 0 : index
    %c0_6 = arith.constant 0 : index
    %3 = vector.load %arg5[%c0_5, %c0_6] : memref<8x1xf32, #tpu.memory_space<vmem>>, vector<8x1xf32>
    %c0_7 = arith.constant 0 : index
    %c0_8 = arith.constant 0 : index
    %4 = vector.load %arg7[%c0_7, %c0_8] : memref<16x1xf32, #tpu.memory_space<vmem>>, vector<16x1xf32>
    %c0_9 = arith.constant 0 : index
    %c0_10 = arith.constant 0 : index
    %5 = vector.load %arg9[%c0_9, %c0_10] : memref<16x1xf32, #tpu.memory_space<vmem>>, vector<16x1xf32>
    %c0_11 = arith.constant 0 : index
    %c0_12 = arith.constant 0 : index
    %c0_13 = arith.constant 0 : index
    %6 = vector.load %arg1[%c0_11, %c0_12, %c0_13] : memref<1x32x256xf32, #tpu.memory_space<vmem>>, vector<1x32x256xf32>
    %7 = vector.shape_cast %6 : vector<1x32x256xf32> to vector<32x256xf32>
    %8 = arith.truncf %7 : vector<32x256xf32> to vector<32x256xbf16>
    %cst = arith.constant dense<0.000000e+00> : vector<8x256xf32>
    %9 = tpu.matmul %0, %8, %cst {dimension_numbers = #tpu.dot_dimension_numbers<[1], [0], [0], [1], [0, 0, 1, 1], [], []>} : vector<8x32xbf16>, vector<32x256xbf16>, vector<8x256xf32> -> vector<8x256xf32>
    %10 = vector.broadcast %2 : vector<8x1xf32> to vector<8x256xf32>
    %11 = arith.addf %9, %10 : vector<8x256xf32>
    %cst_14 = arith.constant 0.000000e+00 : f32
    %12 = vector.broadcast %cst_14 : f32 to vector<8x256xf32>
    %13 = arith.subf %12, %11 : vector<8x256xf32>
    %14 = math.exp %13 : vector<8x256xf32>
    %cst_15 = arith.constant 1.000000e+00 : f32
    %15 = vector.broadcast %cst_15 : f32 to vector<8x256xf32>
    %16 = arith.addf %15, %14 : vector<8x256xf32>
    %17 = tpu.reciprocal %16 {approx = true} : vector<8x256xf32> -> vector<8x256xf32>
    %18 = arith.mulf %11, %17 : vector<8x256xf32>
    %c34_i32 = arith.constant 34 : i32
    %19 = tpu.dynamic_rotate %18 by %c34_i32 dim 1 : vector<8x256xf32>, i32 -> vector<8x256xf32>
    %c0_16 = arith.constant 0 : index
    %c0_17 = arith.constant 0 : index
    %c0_18 = arith.constant 0 : index
    %20 = vector.load %arg10[%c0_16, %c0_17, %c0_18] : memref<25x1x256xf32, #tpu.memory_space<vmem>>, vector<1x1x256xf32>
    %21 = vector.shape_cast %20 : vector<1x1x256xf32> to vector<1x256xf32>
    %22 = vector.broadcast %21 : vector<1x256xf32> to vector<8x256xf32>
    %23 = arith.mulf %19, %22 : vector<8x256xf32>
    %c0_19 = arith.constant 0 : index
    %c0_20 = arith.constant 0 : index
    %c0_21 = arith.constant 0 : index
    %24 = vector.load %arg4[%c0_19, %c0_20, %c0_21] : memref<25x8x1xf32, #tpu.memory_space<vmem>>, vector<1x8x1xf32>
    %25 = vector.shape_cast %24 : vector<1x8x1xf32> to vector<8x1xf32>
    %26 = vector.broadcast %25 : vector<8x1xf32> to vector<8x256xf32>
    %27 = arith.mulf %23, %26 : vector<8x256xf32>
    %c33_i32 = arith.constant 33 : i32
    %28 = tpu.dynamic_rotate %18 by %c33_i32 dim 1 : vector<8x256xf32>, i32 -> vector<8x256xf32>
    %c1 = arith.constant 1 : index
    %c0_22 = arith.constant 0 : index
    %c0_23 = arith.constant 0 : index
    %29 = vector.load %arg10[%c1, %c0_22, %c0_23] : memref<25x1x256xf32, #tpu.memory_space<vmem>>, vector<1x1x256xf32>
    %30 = vector.shape_cast %29 : vector<1x1x256xf32> to vector<1x256xf32>
    %31 = vector.broadcast %30 : vector<1x256xf32> to vector<8x256xf32>
    %32 = arith.mulf %28, %31 : vector<8x256xf32>
    %c1_24 = arith.constant 1 : index
    %c0_25 = arith.constant 0 : index
    %c0_26 = arith.constant 0 : index
    %33 = vector.load %arg4[%c1_24, %c0_25, %c0_26] : memref<25x8x1xf32, #tpu.memory_space<vmem>>, vector<1x8x1xf32>
    %34 = vector.shape_cast %33 : vector<1x8x1xf32> to vector<8x1xf32>
    %35 = vector.broadcast %34 : vector<8x1xf32> to vector<8x256xf32>
    %36 = arith.mulf %32, %35 : vector<8x256xf32>
    %37 = arith.addf %27, %36 : vector<8x256xf32>
    %c32_i32 = arith.constant 32 : i32
    %38 = tpu.dynamic_rotate %18 by %c32_i32 dim 1 : vector<8x256xf32>, i32 -> vector<8x256xf32>
    %c2 = arith.constant 2 : index
    %c0_27 = arith.constant 0 : index
    %c0_28 = arith.constant 0 : index
    %39 = vector.load %arg10[%c2, %c0_27, %c0_28] : memref<25x1x256xf32, #tpu.memory_space<vmem>>, vector<1x1x256xf32>
    %40 = vector.shape_cast %39 : vector<1x1x256xf32> to vector<1x256xf32>
    %41 = vector.broadcast %40 : vector<1x256xf32> to vector<8x256xf32>
    %42 = arith.mulf %38, %41 : vector<8x256xf32>
    %c2_29 = arith.constant 2 : index
    %c0_30 = arith.constant 0 : index
    %c0_31 = arith.constant 0 : index
    %43 = vector.load %arg4[%c2_29, %c0_30, %c0_31] : memref<25x8x1xf32, #tpu.memory_space<vmem>>, vector<1x8x1xf32>
    %44 = vector.shape_cast %43 : vector<1x8x1xf32> to vector<8x1xf32>
    %45 = vector.broadcast %44 : vector<8x1xf32> to vector<8x256xf32>
    %46 = arith.mulf %42, %45 : vector<8x256xf32>
    %47 = arith.addf %37, %46 : vector<8x256xf32>
    %c31_i32 = arith.constant 31 : i32
    %48 = tpu.dynamic_rotate %18 by %c31_i32 dim 1 : vector<8x256xf32>, i32 -> vector<8x256xf32>
    %c3 = arith.constant 3 : index
    %c0_32 = arith.constant 0 : index
    %c0_33 = arith.constant 0 : index
    %49 = vector.load %arg10[%c3, %c0_32, %c0_33] : memref<25x1x256xf32, #tpu.memory_space<vmem>>, vector<1x1x256xf32>
    %50 = vector.shape_cast %49 : vector<1x1x256xf32> to vector<1x256xf32>
    %51 = vector.broadcast %50 : vector<1x256xf32> to vector<8x256xf32>
    %52 = arith.mulf %48, %51 : vector<8x256xf32>
    %c3_34 = arith.constant 3 : index
    %c0_35 = arith.constant 0 : index
    %c0_36 = arith.constant 0 : index
    %53 = vector.load %arg4[%c3_34, %c0_35, %c0_36] : memref<25x8x1xf32, #tpu.memory_space<vmem>>, vector<1x8x1xf32>
    %54 = vector.shape_cast %53 : vector<1x8x1xf32> to vector<8x1xf32>
    %55 = vector.broadcast %54 : vector<8x1xf32> to vector<8x256xf32>
    %56 = arith.mulf %52, %55 : vector<8x256xf32>
    %57 = arith.addf %47, %56 : vector<8x256xf32>
    %c30_i32 = arith.constant 30 : i32
    %58 = tpu.dynamic_rotate %18 by %c30_i32 dim 1 : vector<8x256xf32>, i32 -> vector<8x256xf32>
    %c4 = arith.constant 4 : index
    %c0_37 = arith.constant 0 : index
    %c0_38 = arith.constant 0 : index
    %59 = vector.load %arg10[%c4, %c0_37, %c0_38] : memref<25x1x256xf32, #tpu.memory_space<vmem>>, vector<1x1x256xf32>
    %60 = vector.shape_cast %59 : vector<1x1x256xf32> to vector<1x256xf32>
    %61 = vector.broadcast %60 : vector<1x256xf32> to vector<8x256xf32>
    %62 = arith.mulf %58, %61 : vector<8x256xf32>
    %c4_39 = arith.constant 4 : index
    %c0_40 = arith.constant 0 : index
    %c0_41 = arith.constant 0 : index
    %63 = vector.load %arg4[%c4_39, %c0_40, %c0_41] : memref<25x8x1xf32, #tpu.memory_space<vmem>>, vector<1x8x1xf32>
    %64 = vector.shape_cast %63 : vector<1x8x1xf32> to vector<8x1xf32>
    %65 = vector.broadcast %64 : vector<8x1xf32> to vector<8x256xf32>
    %66 = arith.mulf %62, %65 : vector<8x256xf32>
    %67 = arith.addf %57, %66 : vector<8x256xf32>
    %c18_i32 = arith.constant 18 : i32
    %68 = tpu.dynamic_rotate %18 by %c18_i32 dim 1 : vector<8x256xf32>, i32 -> vector<8x256xf32>
    %c5 = arith.constant 5 : index
    %c0_42 = arith.constant 0 : index
    %c0_43 = arith.constant 0 : index
    %69 = vector.load %arg10[%c5, %c0_42, %c0_43] : memref<25x1x256xf32, #tpu.memory_space<vmem>>, vector<1x1x256xf32>
    %70 = vector.shape_cast %69 : vector<1x1x256xf32> to vector<1x256xf32>
    %71 = vector.broadcast %70 : vector<1x256xf32> to vector<8x256xf32>
    %72 = arith.mulf %68, %71 : vector<8x256xf32>
    %c5_44 = arith.constant 5 : index
    %c0_45 = arith.constant 0 : index
    %c0_46 = arith.constant 0 : index
    %73 = vector.load %arg4[%c5_44, %c0_45, %c0_46] : memref<25x8x1xf32, #tpu.memory_space<vmem>>, vector<1x8x1xf32>
    %74 = vector.shape_cast %73 : vector<1x8x1xf32> to vector<8x1xf32>
    %75 = vector.broadcast %74 : vector<8x1xf32> to vector<8x256xf32>
    %76 = arith.mulf %72, %75 : vector<8x256xf32>
    %77 = arith.addf %67, %76 : vector<8x256xf32>
    %c17_i32 = arith.constant 17 : i32
    %78 = tpu.dynamic_rotate %18 by %c17_i32 dim 1 : vector<8x256xf32>, i32 -> vector<8x256xf32>
    %c6 = arith.constant 6 : index
    %c0_47 = arith.constant 0 : index
    %c0_48 = arith.constant 0 : index
    %79 = vector.load %arg10[%c6, %c0_47, %c0_48] : memref<25x1x256xf32, #tpu.memory_space<vmem>>, vector<1x1x256xf32>
    %80 = vector.shape_cast %79 : vector<1x1x256xf32> to vector<1x256xf32>
    %81 = vector.broadcast %80 : vector<1x256xf32> to vector<8x256xf32>
    %82 = arith.mulf %78, %81 : vector<8x256xf32>
    %c6_49 = arith.constant 6 : index
    %c0_50 = arith.constant 0 : index
    %c0_51 = arith.constant 0 : index
    %83 = vector.load %arg4[%c6_49, %c0_50, %c0_51] : memref<25x8x1xf32, #tpu.memory_space<vmem>>, vector<1x8x1xf32>
    %84 = vector.shape_cast %83 : vector<1x8x1xf32> to vector<8x1xf32>
    %85 = vector.broadcast %84 : vector<8x1xf32> to vector<8x256xf32>
    %86 = arith.mulf %82, %85 : vector<8x256xf32>
    %87 = arith.addf %77, %86 : vector<8x256xf32>
    %c16_i32 = arith.constant 16 : i32
    %88 = tpu.dynamic_rotate %18 by %c16_i32 dim 1 : vector<8x256xf32>, i32 -> vector<8x256xf32>
    %c7 = arith.constant 7 : index
    %c0_52 = arith.constant 0 : index
    %c0_53 = arith.constant 0 : index
    %89 = vector.load %arg10[%c7, %c0_52, %c0_53] : memref<25x1x256xf32, #tpu.memory_space<vmem>>, vector<1x1x256xf32>
    %90 = vector.shape_cast %89 : vector<1x1x256xf32> to vector<1x256xf32>
    %91 = vector.broadcast %90 : vector<1x256xf32> to vector<8x256xf32>
    %92 = arith.mulf %88, %91 : vector<8x256xf32>
    %c7_54 = arith.constant 7 : index
    %c0_55 = arith.constant 0 : index
    %c0_56 = arith.constant 0 : index
    %93 = vector.load %arg4[%c7_54, %c0_55, %c0_56] : memref<25x8x1xf32, #tpu.memory_space<vmem>>, vector<1x8x1xf32>
    %94 = vector.shape_cast %93 : vector<1x8x1xf32> to vector<8x1xf32>
    %95 = vector.broadcast %94 : vector<8x1xf32> to vector<8x256xf32>
    %96 = arith.mulf %92, %95 : vector<8x256xf32>
    %97 = arith.addf %87, %96 : vector<8x256xf32>
    %c15_i32 = arith.constant 15 : i32
    %98 = tpu.dynamic_rotate %18 by %c15_i32 dim 1 : vector<8x256xf32>, i32 -> vector<8x256xf32>
    %c8 = arith.constant 8 : index
    %c0_57 = arith.constant 0 : index
    %c0_58 = arith.constant 0 : index
    %99 = vector.load %arg10[%c8, %c0_57, %c0_58] : memref<25x1x256xf32, #tpu.memory_space<vmem>>, vector<1x1x256xf32>
    %100 = vector.shape_cast %99 : vector<1x1x256xf32> to vector<1x256xf32>
    %101 = vector.broadcast %100 : vector<1x256xf32> to vector<8x256xf32>
    %102 = arith.mulf %98, %101 : vector<8x256xf32>
    %c8_59 = arith.constant 8 : index
    %c0_60 = arith.constant 0 : index
    %c0_61 = arith.constant 0 : index
    %103 = vector.load %arg4[%c8_59, %c0_60, %c0_61] : memref<25x8x1xf32, #tpu.memory_space<vmem>>, vector<1x8x1xf32>
    %104 = vector.shape_cast %103 : vector<1x8x1xf32> to vector<8x1xf32>
    %105 = vector.broadcast %104 : vector<8x1xf32> to vector<8x256xf32>
    %106 = arith.mulf %102, %105 : vector<8x256xf32>
    %107 = arith.addf %97, %106 : vector<8x256xf32>
    %c14_i32 = arith.constant 14 : i32
    %108 = tpu.dynamic_rotate %18 by %c14_i32 dim 1 : vector<8x256xf32>, i32 -> vector<8x256xf32>
    %c9 = arith.constant 9 : index
    %c0_62 = arith.constant 0 : index
    %c0_63 = arith.constant 0 : index
    %109 = vector.load %arg10[%c9, %c0_62, %c0_63] : memref<25x1x256xf32, #tpu.memory_space<vmem>>, vector<1x1x256xf32>
    %110 = vector.shape_cast %109 : vector<1x1x256xf32> to vector<1x256xf32>
    %111 = vector.broadcast %110 : vector<1x256xf32> to vector<8x256xf32>
    %112 = arith.mulf %108, %111 : vector<8x256xf32>
    %c9_64 = arith.constant 9 : index
    %c0_65 = arith.constant 0 : index
    %c0_66 = arith.constant 0 : index
    %113 = vector.load %arg4[%c9_64, %c0_65, %c0_66] : memref<25x8x1xf32, #tpu.memory_space<vmem>>, vector<1x8x1xf32>
    %114 = vector.shape_cast %113 : vector<1x8x1xf32> to vector<8x1xf32>
    %115 = vector.broadcast %114 : vector<8x1xf32> to vector<8x256xf32>
    %116 = arith.mulf %112, %115 : vector<8x256xf32>
    %117 = arith.addf %107, %116 : vector<8x256xf32>
    %c2_i32 = arith.constant 2 : i32
    %118 = tpu.dynamic_rotate %18 by %c2_i32 dim 1 : vector<8x256xf32>, i32 -> vector<8x256xf32>
    %c10 = arith.constant 10 : index
    %c0_67 = arith.constant 0 : index
    %c0_68 = arith.constant 0 : index
    %119 = vector.load %arg10[%c10, %c0_67, %c0_68] : memref<25x1x256xf32, #tpu.memory_space<vmem>>, vector<1x1x256xf32>
    %120 = vector.shape_cast %119 : vector<1x1x256xf32> to vector<1x256xf32>
    %121 = vector.broadcast %120 : vector<1x256xf32> to vector<8x256xf32>
    %122 = arith.mulf %118, %121 : vector<8x256xf32>
    %c10_69 = arith.constant 10 : index
    %c0_70 = arith.constant 0 : index
    %c0_71 = arith.constant 0 : index
    %123 = vector.load %arg4[%c10_69, %c0_70, %c0_71] : memref<25x8x1xf32, #tpu.memory_space<vmem>>, vector<1x8x1xf32>
    %124 = vector.shape_cast %123 : vector<1x8x1xf32> to vector<8x1xf32>
    %125 = vector.broadcast %124 : vector<8x1xf32> to vector<8x256xf32>
    %126 = arith.mulf %122, %125 : vector<8x256xf32>
    %127 = arith.addf %117, %126 : vector<8x256xf32>
    %c1_i32 = arith.constant 1 : i32
    %128 = tpu.dynamic_rotate %18 by %c1_i32 dim 1 : vector<8x256xf32>, i32 -> vector<8x256xf32>
    %c11 = arith.constant 11 : index
    %c0_72 = arith.constant 0 : index
    %c0_73 = arith.constant 0 : index
    %129 = vector.load %arg10[%c11, %c0_72, %c0_73] : memref<25x1x256xf32, #tpu.memory_space<vmem>>, vector<1x1x256xf32>
    %130 = vector.shape_cast %129 : vector<1x1x256xf32> to vector<1x256xf32>
    %131 = vector.broadcast %130 : vector<1x256xf32> to vector<8x256xf32>
    %132 = arith.mulf %128, %131 : vector<8x256xf32>
    %c11_74 = arith.constant 11 : index
    %c0_75 = arith.constant 0 : index
    %c0_76 = arith.constant 0 : index
    %133 = vector.load %arg4[%c11_74, %c0_75, %c0_76] : memref<25x8x1xf32, #tpu.memory_space<vmem>>, vector<1x8x1xf32>
    %134 = vector.shape_cast %133 : vector<1x8x1xf32> to vector<8x1xf32>
    %135 = vector.broadcast %134 : vector<8x1xf32> to vector<8x256xf32>
    %136 = arith.mulf %132, %135 : vector<8x256xf32>
    %137 = arith.addf %127, %136 : vector<8x256xf32>
    %c12 = arith.constant 12 : index
    %c0_77 = arith.constant 0 : index
    %c0_78 = arith.constant 0 : index
    %138 = vector.load %arg10[%c12, %c0_77, %c0_78] : memref<25x1x256xf32, #tpu.memory_space<vmem>>, vector<1x1x256xf32>
    %139 = vector.shape_cast %138 : vector<1x1x256xf32> to vector<1x256xf32>
    %140 = vector.broadcast %139 : vector<1x256xf32> to vector<8x256xf32>
    %141 = arith.mulf %18, %140 : vector<8x256xf32>
    %c12_79 = arith.constant 12 : index
    %c0_80 = arith.constant 0 : index
    %c0_81 = arith.constant 0 : index
    %142 = vector.load %arg4[%c12_79, %c0_80, %c0_81] : memref<25x8x1xf32, #tpu.memory_space<vmem>>, vector<1x8x1xf32>
    %143 = vector.shape_cast %142 : vector<1x8x1xf32> to vector<8x1xf32>
    %144 = vector.broadcast %143 : vector<8x1xf32> to vector<8x256xf32>
    %145 = arith.mulf %141, %144 : vector<8x256xf32>
    %146 = arith.addf %137, %145 : vector<8x256xf32>
    %c255_i32 = arith.constant 255 : i32
    %147 = tpu.dynamic_rotate %18 by %c255_i32 dim 1 : vector<8x256xf32>, i32 -> vector<8x256xf32>
    %c13 = arith.constant 13 : index
    %c0_82 = arith.constant 0 : index
    %c0_83 = arith.constant 0 : index
    %148 = vector.load %arg10[%c13, %c0_82, %c0_83] : memref<25x1x256xf32, #tpu.memory_space<vmem>>, vector<1x1x256xf32>
    %149 = vector.shape_cast %148 : vector<1x1x256xf32> to vector<1x256xf32>
    %150 = vector.broadcast %149 : vector<1x256xf32> to vector<8x256xf32>
    %151 = arith.mulf %147, %150 : vector<8x256xf32>
    %c13_84 = arith.constant 13 : index
    %c0_85 = arith.constant 0 : index
    %c0_86 = arith.constant 0 : index
    %152 = vector.load %arg4[%c13_84, %c0_85, %c0_86] : memref<25x8x1xf32, #tpu.memory_space<vmem>>, vector<1x8x1xf32>
    %153 = vector.shape_cast %152 : vector<1x8x1xf32> to vector<8x1xf32>
    %154 = vector.broadcast %153 : vector<8x1xf32> to vector<8x256xf32>
    %155 = arith.mulf %151, %154 : vector<8x256xf32>
    %156 = arith.addf %146, %155 : vector<8x256xf32>
    %c254_i32 = arith.constant 254 : i32
    %157 = tpu.dynamic_rotate %18 by %c254_i32 dim 1 : vector<8x256xf32>, i32 -> vector<8x256xf32>
    %c14 = arith.constant 14 : index
    %c0_87 = arith.constant 0 : index
    %c0_88 = arith.constant 0 : index
    %158 = vector.load %arg10[%c14, %c0_87, %c0_88] : memref<25x1x256xf32, #tpu.memory_space<vmem>>, vector<1x1x256xf32>
    %159 = vector.shape_cast %158 : vector<1x1x256xf32> to vector<1x256xf32>
    %160 = vector.broadcast %159 : vector<1x256xf32> to vector<8x256xf32>
    %161 = arith.mulf %157, %160 : vector<8x256xf32>
    %c14_89 = arith.constant 14 : index
    %c0_90 = arith.constant 0 : index
    %c0_91 = arith.constant 0 : index
    %162 = vector.load %arg4[%c14_89, %c0_90, %c0_91] : memref<25x8x1xf32, #tpu.memory_space<vmem>>, vector<1x8x1xf32>
    %163 = vector.shape_cast %162 : vector<1x8x1xf32> to vector<8x1xf32>
    %164 = vector.broadcast %163 : vector<8x1xf32> to vector<8x256xf32>
    %165 = arith.mulf %161, %164 : vector<8x256xf32>
    %166 = arith.addf %156, %165 : vector<8x256xf32>
    %c242_i32 = arith.constant 242 : i32
    %167 = tpu.dynamic_rotate %18 by %c242_i32 dim 1 : vector<8x256xf32>, i32 -> vector<8x256xf32>
    %c15 = arith.constant 15 : index
    %c0_92 = arith.constant 0 : index
    %c0_93 = arith.constant 0 : index
    %168 = vector.load %arg10[%c15, %c0_92, %c0_93] : memref<25x1x256xf32, #tpu.memory_space<vmem>>, vector<1x1x256xf32>
    %169 = vector.shape_cast %168 : vector<1x1x256xf32> to vector<1x256xf32>
    %170 = vector.broadcast %169 : vector<1x256xf32> to vector<8x256xf32>
    %171 = arith.mulf %167, %170 : vector<8x256xf32>
    %c15_94 = arith.constant 15 : index
    %c0_95 = arith.constant 0 : index
    %c0_96 = arith.constant 0 : index
    %172 = vector.load %arg4[%c15_94, %c0_95, %c0_96] : memref<25x8x1xf32, #tpu.memory_space<vmem>>, vector<1x8x1xf32>
    %173 = vector.shape_cast %172 : vector<1x8x1xf32> to vector<8x1xf32>
    %174 = vector.broadcast %173 : vector<8x1xf32> to vector<8x256xf32>
    %175 = arith.mulf %171, %174 : vector<8x256xf32>
    %176 = arith.addf %166, %175 : vector<8x256xf32>
    %c241_i32 = arith.constant 241 : i32
    %177 = tpu.dynamic_rotate %18 by %c241_i32 dim 1 : vector<8x256xf32>, i32 -> vector<8x256xf32>
    %c16 = arith.constant 16 : index
    %c0_97 = arith.constant 0 : index
    %c0_98 = arith.constant 0 : index
    %178 = vector.load %arg10[%c16, %c0_97, %c0_98] : memref<25x1x256xf32, #tpu.memory_space<vmem>>, vector<1x1x256xf32>
    %179 = vector.shape_cast %178 : vector<1x1x256xf32> to vector<1x256xf32>
    %180 = vector.broadcast %179 : vector<1x256xf32> to vector<8x256xf32>
    %181 = arith.mulf %177, %180 : vector<8x256xf32>
    %c16_99 = arith.constant 16 : index
    %c0_100 = arith.constant 0 : index
    %c0_101 = arith.constant 0 : index
    %182 = vector.load %arg4[%c16_99, %c0_100, %c0_101] : memref<25x8x1xf32, #tpu.memory_space<vmem>>, vector<1x8x1xf32>
    %183 = vector.shape_cast %182 : vector<1x8x1xf32> to vector<8x1xf32>
    %184 = vector.broadcast %183 : vector<8x1xf32> to vector<8x256xf32>
    %185 = arith.mulf %181, %184 : vector<8x256xf32>
    %186 = arith.addf %176, %185 : vector<8x256xf32>
    %c240_i32 = arith.constant 240 : i32
    %187 = tpu.dynamic_rotate %18 by %c240_i32 dim 1 : vector<8x256xf32>, i32 -> vector<8x256xf32>
    %c17 = arith.constant 17 : index
    %c0_102 = arith.constant 0 : index
    %c0_103 = arith.constant 0 : index
    %188 = vector.load %arg10[%c17, %c0_102, %c0_103] : memref<25x1x256xf32, #tpu.memory_space<vmem>>, vector<1x1x256xf32>
    %189 = vector.shape_cast %188 : vector<1x1x256xf32> to vector<1x256xf32>
    %190 = vector.broadcast %189 : vector<1x256xf32> to vector<8x256xf32>
    %191 = arith.mulf %187, %190 : vector<8x256xf32>
    %c17_104 = arith.constant 17 : index
    %c0_105 = arith.constant 0 : index
    %c0_106 = arith.constant 0 : index
    %192 = vector.load %arg4[%c17_104, %c0_105, %c0_106] : memref<25x8x1xf32, #tpu.memory_space<vmem>>, vector<1x8x1xf32>
    %193 = vector.shape_cast %192 : vector<1x8x1xf32> to vector<8x1xf32>
    %194 = vector.broadcast %193 : vector<8x1xf32> to vector<8x256xf32>
    %195 = arith.mulf %191, %194 : vector<8x256xf32>
    %196 = arith.addf %186, %195 : vector<8x256xf32>
    %c239_i32 = arith.constant 239 : i32
    %197 = tpu.dynamic_rotate %18 by %c239_i32 dim 1 : vector<8x256xf32>, i32 -> vector<8x256xf32>
    %c18 = arith.constant 18 : index
    %c0_107 = arith.constant 0 : index
    %c0_108 = arith.constant 0 : index
    %198 = vector.load %arg10[%c18, %c0_107, %c0_108] : memref<25x1x256xf32, #tpu.memory_space<vmem>>, vector<1x1x256xf32>
    %199 = vector.shape_cast %198 : vector<1x1x256xf32> to vector<1x256xf32>
    %200 = vector.broadcast %199 : vector<1x256xf32> to vector<8x256xf32>
    %201 = arith.mulf %197, %200 : vector<8x256xf32>
    %c18_109 = arith.constant 18 : index
    %c0_110 = arith.constant 0 : index
    %c0_111 = arith.constant 0 : index
    %202 = vector.load %arg4[%c18_109, %c0_110, %c0_111] : memref<25x8x1xf32, #tpu.memory_space<vmem>>, vector<1x8x1xf32>
    %203 = vector.shape_cast %202 : vector<1x8x1xf32> to vector<8x1xf32>
    %204 = vector.broadcast %203 : vector<8x1xf32> to vector<8x256xf32>
    %205 = arith.mulf %201, %204 : vector<8x256xf32>
    %206 = arith.addf %196, %205 : vector<8x256xf32>
    %c238_i32 = arith.constant 238 : i32
    %207 = tpu.dynamic_rotate %18 by %c238_i32 dim 1 : vector<8x256xf32>, i32 -> vector<8x256xf32>
    %c19 = arith.constant 19 : index
    %c0_112 = arith.constant 0 : index
    %c0_113 = arith.constant 0 : index
    %208 = vector.load %arg10[%c19, %c0_112, %c0_113] : memref<25x1x256xf32, #tpu.memory_space<vmem>>, vector<1x1x256xf32>
    %209 = vector.shape_cast %208 : vector<1x1x256xf32> to vector<1x256xf32>
    %210 = vector.broadcast %209 : vector<1x256xf32> to vector<8x256xf32>
    %211 = arith.mulf %207, %210 : vector<8x256xf32>
    %c19_114 = arith.constant 19 : index
    %c0_115 = arith.constant 0 : index
    %c0_116 = arith.constant 0 : index
    %212 = vector.load %arg4[%c19_114, %c0_115, %c0_116] : memref<25x8x1xf32, #tpu.memory_space<vmem>>, vector<1x8x1xf32>
    %213 = vector.shape_cast %212 : vector<1x8x1xf32> to vector<8x1xf32>
    %214 = vector.broadcast %213 : vector<8x1xf32> to vector<8x256xf32>
    %215 = arith.mulf %211, %214 : vector<8x256xf32>
    %216 = arith.addf %206, %215 : vector<8x256xf32>
    %c226_i32 = arith.constant 226 : i32
    %217 = tpu.dynamic_rotate %18 by %c226_i32 dim 1 : vector<8x256xf32>, i32 -> vector<8x256xf32>
    %c20 = arith.constant 20 : index
    %c0_117 = arith.constant 0 : index
    %c0_118 = arith.constant 0 : index
    %218 = vector.load %arg10[%c20, %c0_117, %c0_118] : memref<25x1x256xf32, #tpu.memory_space<vmem>>, vector<1x1x256xf32>
    %219 = vector.shape_cast %218 : vector<1x1x256xf32> to vector<1x256xf32>
    %220 = vector.broadcast %219 : vector<1x256xf32> to vector<8x256xf32>
    %221 = arith.mulf %217, %220 : vector<8x256xf32>
    %c20_119 = arith.constant 20 : index
    %c0_120 = arith.constant 0 : index
    %c0_121 = arith.constant 0 : index
    %222 = vector.load %arg4[%c20_119, %c0_120, %c0_121] : memref<25x8x1xf32, #tpu.memory_space<vmem>>, vector<1x8x1xf32>
    %223 = vector.shape_cast %222 : vector<1x8x1xf32> to vector<8x1xf32>
    %224 = vector.broadcast %223 : vector<8x1xf32> to vector<8x256xf32>
    %225 = arith.mulf %221, %224 : vector<8x256xf32>
    %226 = arith.addf %216, %225 : vector<8x256xf32>
    %c225_i32 = arith.constant 225 : i32
    %227 = tpu.dynamic_rotate %18 by %c225_i32 dim 1 : vector<8x256xf32>, i32 -> vector<8x256xf32>
    %c21 = arith.constant 21 : index
    %c0_122 = arith.constant 0 : index
    %c0_123 = arith.constant 0 : index
    %228 = vector.load %arg10[%c21, %c0_122, %c0_123] : memref<25x1x256xf32, #tpu.memory_space<vmem>>, vector<1x1x256xf32>
    %229 = vector.shape_cast %228 : vector<1x1x256xf32> to vector<1x256xf32>
    %230 = vector.broadcast %229 : vector<1x256xf32> to vector<8x256xf32>
    %231 = arith.mulf %227, %230 : vector<8x256xf32>
    %c21_124 = arith.constant 21 : index
    %c0_125 = arith.constant 0 : index
    %c0_126 = arith.constant 0 : index
    %232 = vector.load %arg4[%c21_124, %c0_125, %c0_126] : memref<25x8x1xf32, #tpu.memory_space<vmem>>, vector<1x8x1xf32>
    %233 = vector.shape_cast %232 : vector<1x8x1xf32> to vector<8x1xf32>
    %234 = vector.broadcast %233 : vector<8x1xf32> to vector<8x256xf32>
    %235 = arith.mulf %231, %234 : vector<8x256xf32>
    %236 = arith.addf %226, %235 : vector<8x256xf32>
    %c224_i32 = arith.constant 224 : i32
    %237 = tpu.dynamic_rotate %18 by %c224_i32 dim 1 : vector<8x256xf32>, i32 -> vector<8x256xf32>
    %c22 = arith.constant 22 : index
    %c0_127 = arith.constant 0 : index
    %c0_128 = arith.constant 0 : index
    %238 = vector.load %arg10[%c22, %c0_127, %c0_128] : memref<25x1x256xf32, #tpu.memory_space<vmem>>, vector<1x1x256xf32>
    %239 = vector.shape_cast %238 : vector<1x1x256xf32> to vector<1x256xf32>
    %240 = vector.broadcast %239 : vector<1x256xf32> to vector<8x256xf32>
    %241 = arith.mulf %237, %240 : vector<8x256xf32>
    %c22_129 = arith.constant 22 : index
    %c0_130 = arith.constant 0 : index
    %c0_131 = arith.constant 0 : index
    %242 = vector.load %arg4[%c22_129, %c0_130, %c0_131] : memref<25x8x1xf32, #tpu.memory_space<vmem>>, vector<1x8x1xf32>
    %243 = vector.shape_cast %242 : vector<1x8x1xf32> to vector<8x1xf32>
    %244 = vector.broadcast %243 : vector<8x1xf32> to vector<8x256xf32>
    %245 = arith.mulf %241, %244 : vector<8x256xf32>
    %246 = arith.addf %236, %245 : vector<8x256xf32>
    %c223_i32 = arith.constant 223 : i32
    %247 = tpu.dynamic_rotate %18 by %c223_i32 dim 1 : vector<8x256xf32>, i32 -> vector<8x256xf32>
    %c23 = arith.constant 23 : index
    %c0_132 = arith.constant 0 : index
    %c0_133 = arith.constant 0 : index
    %248 = vector.load %arg10[%c23, %c0_132, %c0_133] : memref<25x1x256xf32, #tpu.memory_space<vmem>>, vector<1x1x256xf32>
    %249 = vector.shape_cast %248 : vector<1x1x256xf32> to vector<1x256xf32>
    %250 = vector.broadcast %249 : vector<1x256xf32> to vector<8x256xf32>
    %251 = arith.mulf %247, %250 : vector<8x256xf32>
    %c23_134 = arith.constant 23 : index
    %c0_135 = arith.constant 0 : index
    %c0_136 = arith.constant 0 : index
    %252 = vector.load %arg4[%c23_134, %c0_135, %c0_136] : memref<25x8x1xf32, #tpu.memory_space<vmem>>, vector<1x8x1xf32>
    %253 = vector.shape_cast %252 : vector<1x8x1xf32> to vector<8x1xf32>
    %254 = vector.broadcast %253 : vector<8x1xf32> to vector<8x256xf32>
    %255 = arith.mulf %251, %254 : vector<8x256xf32>
    %256 = arith.addf %246, %255 : vector<8x256xf32>
    %c222_i32 = arith.constant 222 : i32
    %257 = tpu.dynamic_rotate %18 by %c222_i32 dim 1 : vector<8x256xf32>, i32 -> vector<8x256xf32>
    %c24 = arith.constant 24 : index
    %c0_137 = arith.constant 0 : index
    %c0_138 = arith.constant 0 : index
    %258 = vector.load %arg10[%c24, %c0_137, %c0_138] : memref<25x1x256xf32, #tpu.memory_space<vmem>>, vector<1x1x256xf32>
    %259 = vector.shape_cast %258 : vector<1x1x256xf32> to vector<1x256xf32>
    %260 = vector.broadcast %259 : vector<1x256xf32> to vector<8x256xf32>
    %261 = arith.mulf %257, %260 : vector<8x256xf32>
    %c24_139 = arith.constant 24 : index
    %c0_140 = arith.constant 0 : index
    %c0_141 = arith.constant 0 : index
    %262 = vector.load %arg4[%c24_139, %c0_140, %c0_141] : memref<25x8x1xf32, #tpu.memory_space<vmem>>, vector<1x8x1xf32>
    %263 = vector.shape_cast %262 : vector<1x8x1xf32> to vector<8x1xf32>
    %264 = vector.broadcast %263 : vector<8x1xf32> to vector<8x256xf32>
    %265 = arith.mulf %261, %264 : vector<8x256xf32>
    %266 = arith.addf %256, %265 : vector<8x256xf32>
    %267 = vector.broadcast %3 : vector<8x1xf32> to vector<8x256xf32>
    %268 = arith.addf %266, %267 : vector<8x256xf32>
    %cst_142 = arith.constant 0.000000e+00 : f32
    %269 = vector.broadcast %cst_142 : f32 to vector<8x256xf32>
    %270 = arith.subf %269, %268 : vector<8x256xf32>
    %271 = math.exp %270 : vector<8x256xf32>
    %cst_143 = arith.constant 1.000000e+00 : f32
    %272 = vector.broadcast %cst_143 : f32 to vector<8x256xf32>
    %273 = arith.addf %272, %271 : vector<8x256xf32>
    %274 = tpu.reciprocal %273 {approx = true} : vector<8x256xf32> -> vector<8x256xf32>
    %275 = arith.mulf %268, %274 : vector<8x256xf32>
    %276 = tpu.concatenate %18, %275 in 0 : vector<8x256xf32>, vector<8x256xf32> -> vector<16x256xf32>
    %277 = arith.truncf %276 : vector<16x256xf32> to vector<16x256xbf16>
    %cst_144 = arith.constant dense<0.000000e+00> : vector<16x256xf32>
    %278 = tpu.matmul %1, %277, %cst_144 {dimension_numbers = #tpu.dot_dimension_numbers<[1], [0], [0], [1], [0, 0, 1, 1], [], []>} : vector<16x16xbf16>, vector<16x256xbf16>, vector<16x256xf32> -> vector<16x256xf32>
    %279 = vector.broadcast %4 : vector<16x1xf32> to vector<16x256xf32>
    %280 = arith.addf %278, %279 : vector<16x256xf32>
    %c34_i32_145 = arith.constant 34 : i32
    %281 = tpu.dynamic_rotate %280 by %c34_i32_145 dim 1 : vector<16x256xf32>, i32 -> vector<16x256xf32>
    %c0_146 = arith.constant 0 : index
    %c0_147 = arith.constant 0 : index
    %c0_148 = arith.constant 0 : index
    %282 = vector.load %arg10[%c0_146, %c0_147, %c0_148] : memref<25x1x256xf32, #tpu.memory_space<vmem>>, vector<1x1x256xf32>
    %283 = vector.shape_cast %282 : vector<1x1x256xf32> to vector<1x256xf32>
    %284 = vector.broadcast %283 : vector<1x256xf32> to vector<16x256xf32>
    %285 = arith.mulf %281, %284 : vector<16x256xf32>
    %c0_149 = arith.constant 0 : index
    %c0_150 = arith.constant 0 : index
    %c0_151 = arith.constant 0 : index
    %286 = vector.load %arg8[%c0_149, %c0_150, %c0_151] : memref<25x16x1xf32, #tpu.memory_space<vmem>>, vector<1x16x1xf32>
    %287 = vector.shape_cast %286 : vector<1x16x1xf32> to vector<16x1xf32>
    %288 = vector.broadcast %287 : vector<16x1xf32> to vector<16x256xf32>
    %289 = arith.mulf %285, %288 : vector<16x256xf32>
    %c33_i32_152 = arith.constant 33 : i32
    %290 = tpu.dynamic_rotate %280 by %c33_i32_152 dim 1 : vector<16x256xf32>, i32 -> vector<16x256xf32>
    %c1_153 = arith.constant 1 : index
    %c0_154 = arith.constant 0 : index
    %c0_155 = arith.constant 0 : index
    %291 = vector.load %arg10[%c1_153, %c0_154, %c0_155] : memref<25x1x256xf32, #tpu.memory_space<vmem>>, vector<1x1x256xf32>
    %292 = vector.shape_cast %291 : vector<1x1x256xf32> to vector<1x256xf32>
    %293 = vector.broadcast %292 : vector<1x256xf32> to vector<16x256xf32>
    %294 = arith.mulf %290, %293 : vector<16x256xf32>
    %c1_156 = arith.constant 1 : index
    %c0_157 = arith.constant 0 : index
    %c0_158 = arith.constant 0 : index
    %295 = vector.load %arg8[%c1_156, %c0_157, %c0_158] : memref<25x16x1xf32, #tpu.memory_space<vmem>>, vector<1x16x1xf32>
    %296 = vector.shape_cast %295 : vector<1x16x1xf32> to vector<16x1xf32>
    %297 = vector.broadcast %296 : vector<16x1xf32> to vector<16x256xf32>
    %298 = arith.mulf %294, %297 : vector<16x256xf32>
    %299 = arith.addf %289, %298 : vector<16x256xf32>
    %c32_i32_159 = arith.constant 32 : i32
    %300 = tpu.dynamic_rotate %280 by %c32_i32_159 dim 1 : vector<16x256xf32>, i32 -> vector<16x256xf32>
    %c2_160 = arith.constant 2 : index
    %c0_161 = arith.constant 0 : index
    %c0_162 = arith.constant 0 : index
    %301 = vector.load %arg10[%c2_160, %c0_161, %c0_162] : memref<25x1x256xf32, #tpu.memory_space<vmem>>, vector<1x1x256xf32>
    %302 = vector.shape_cast %301 : vector<1x1x256xf32> to vector<1x256xf32>
    %303 = vector.broadcast %302 : vector<1x256xf32> to vector<16x256xf32>
    %304 = arith.mulf %300, %303 : vector<16x256xf32>
    %c2_163 = arith.constant 2 : index
    %c0_164 = arith.constant 0 : index
    %c0_165 = arith.constant 0 : index
    %305 = vector.load %arg8[%c2_163, %c0_164, %c0_165] : memref<25x16x1xf32, #tpu.memory_space<vmem>>, vector<1x16x1xf32>
    %306 = vector.shape_cast %305 : vector<1x16x1xf32> to vector<16x1xf32>
    %307 = vector.broadcast %306 : vector<16x1xf32> to vector<16x256xf32>
    %308 = arith.mulf %304, %307 : vector<16x256xf32>
    %309 = arith.addf %299, %308 : vector<16x256xf32>
    %c31_i32_166 = arith.constant 31 : i32
    %310 = tpu.dynamic_rotate %280 by %c31_i32_166 dim 1 : vector<16x256xf32>, i32 -> vector<16x256xf32>
    %c3_167 = arith.constant 3 : index
    %c0_168 = arith.constant 0 : index
    %c0_169 = arith.constant 0 : index
    %311 = vector.load %arg10[%c3_167, %c0_168, %c0_169] : memref<25x1x256xf32, #tpu.memory_space<vmem>>, vector<1x1x256xf32>
    %312 = vector.shape_cast %311 : vector<1x1x256xf32> to vector<1x256xf32>
    %313 = vector.broadcast %312 : vector<1x256xf32> to vector<16x256xf32>
    %314 = arith.mulf %310, %313 : vector<16x256xf32>
    %c3_170 = arith.constant 3 : index
    %c0_171 = arith.constant 0 : index
    %c0_172 = arith.constant 0 : index
    %315 = vector.load %arg8[%c3_170, %c0_171, %c0_172] : memref<25x16x1xf32, #tpu.memory_space<vmem>>, vector<1x16x1xf32>
    %316 = vector.shape_cast %315 : vector<1x16x1xf32> to vector<16x1xf32>
    %317 = vector.broadcast %316 : vector<16x1xf32> to vector<16x256xf32>
    %318 = arith.mulf %314, %317 : vector<16x256xf32>
    %319 = arith.addf %309, %318 : vector<16x256xf32>
    %c30_i32_173 = arith.constant 30 : i32
    %320 = tpu.dynamic_rotate %280 by %c30_i32_173 dim 1 : vector<16x256xf32>, i32 -> vector<16x256xf32>
    %c4_174 = arith.constant 4 : index
    %c0_175 = arith.constant 0 : index
    %c0_176 = arith.constant 0 : index
    %321 = vector.load %arg10[%c4_174, %c0_175, %c0_176] : memref<25x1x256xf32, #tpu.memory_space<vmem>>, vector<1x1x256xf32>
    %322 = vector.shape_cast %321 : vector<1x1x256xf32> to vector<1x256xf32>
    %323 = vector.broadcast %322 : vector<1x256xf32> to vector<16x256xf32>
    %324 = arith.mulf %320, %323 : vector<16x256xf32>
    %c4_177 = arith.constant 4 : index
    %c0_178 = arith.constant 0 : index
    %c0_179 = arith.constant 0 : index
    %325 = vector.load %arg8[%c4_177, %c0_178, %c0_179] : memref<25x16x1xf32, #tpu.memory_space<vmem>>, vector<1x16x1xf32>
    %326 = vector.shape_cast %325 : vector<1x16x1xf32> to vector<16x1xf32>
    %327 = vector.broadcast %326 : vector<16x1xf32> to vector<16x256xf32>
    %328 = arith.mulf %324, %327 : vector<16x256xf32>
    %329 = arith.addf %319, %328 : vector<16x256xf32>
    %c18_i32_180 = arith.constant 18 : i32
    %330 = tpu.dynamic_rotate %280 by %c18_i32_180 dim 1 : vector<16x256xf32>, i32 -> vector<16x256xf32>
    %c5_181 = arith.constant 5 : index
    %c0_182 = arith.constant 0 : index
    %c0_183 = arith.constant 0 : index
    %331 = vector.load %arg10[%c5_181, %c0_182, %c0_183] : memref<25x1x256xf32, #tpu.memory_space<vmem>>, vector<1x1x256xf32>
    %332 = vector.shape_cast %331 : vector<1x1x256xf32> to vector<1x256xf32>
    %333 = vector.broadcast %332 : vector<1x256xf32> to vector<16x256xf32>
    %334 = arith.mulf %330, %333 : vector<16x256xf32>
    %c5_184 = arith.constant 5 : index
    %c0_185 = arith.constant 0 : index
    %c0_186 = arith.constant 0 : index
    %335 = vector.load %arg8[%c5_184, %c0_185, %c0_186] : memref<25x16x1xf32, #tpu.memory_space<vmem>>, vector<1x16x1xf32>
    %336 = vector.shape_cast %335 : vector<1x16x1xf32> to vector<16x1xf32>
    %337 = vector.broadcast %336 : vector<16x1xf32> to vector<16x256xf32>
    %338 = arith.mulf %334, %337 : vector<16x256xf32>
    %339 = arith.addf %329, %338 : vector<16x256xf32>
    %c17_i32_187 = arith.constant 17 : i32
    %340 = tpu.dynamic_rotate %280 by %c17_i32_187 dim 1 : vector<16x256xf32>, i32 -> vector<16x256xf32>
    %c6_188 = arith.constant 6 : index
    %c0_189 = arith.constant 0 : index
    %c0_190 = arith.constant 0 : index
    %341 = vector.load %arg10[%c6_188, %c0_189, %c0_190] : memref<25x1x256xf32, #tpu.memory_space<vmem>>, vector<1x1x256xf32>
    %342 = vector.shape_cast %341 : vector<1x1x256xf32> to vector<1x256xf32>
    %343 = vector.broadcast %342 : vector<1x256xf32> to vector<16x256xf32>
    %344 = arith.mulf %340, %343 : vector<16x256xf32>
    %c6_191 = arith.constant 6 : index
    %c0_192 = arith.constant 0 : index
    %c0_193 = arith.constant 0 : index
    %345 = vector.load %arg8[%c6_191, %c0_192, %c0_193] : memref<25x16x1xf32, #tpu.memory_space<vmem>>, vector<1x16x1xf32>
    %346 = vector.shape_cast %345 : vector<1x16x1xf32> to vector<16x1xf32>
    %347 = vector.broadcast %346 : vector<16x1xf32> to vector<16x256xf32>
    %348 = arith.mulf %344, %347 : vector<16x256xf32>
    %349 = arith.addf %339, %348 : vector<16x256xf32>
    %c16_i32_194 = arith.constant 16 : i32
    %350 = tpu.dynamic_rotate %280 by %c16_i32_194 dim 1 : vector<16x256xf32>, i32 -> vector<16x256xf32>
    %c7_195 = arith.constant 7 : index
    %c0_196 = arith.constant 0 : index
    %c0_197 = arith.constant 0 : index
    %351 = vector.load %arg10[%c7_195, %c0_196, %c0_197] : memref<25x1x256xf32, #tpu.memory_space<vmem>>, vector<1x1x256xf32>
    %352 = vector.shape_cast %351 : vector<1x1x256xf32> to vector<1x256xf32>
    %353 = vector.broadcast %352 : vector<1x256xf32> to vector<16x256xf32>
    %354 = arith.mulf %350, %353 : vector<16x256xf32>
    %c7_198 = arith.constant 7 : index
    %c0_199 = arith.constant 0 : index
    %c0_200 = arith.constant 0 : index
    %355 = vector.load %arg8[%c7_198, %c0_199, %c0_200] : memref<25x16x1xf32, #tpu.memory_space<vmem>>, vector<1x16x1xf32>
    %356 = vector.shape_cast %355 : vector<1x16x1xf32> to vector<16x1xf32>
    %357 = vector.broadcast %356 : vector<16x1xf32> to vector<16x256xf32>
    %358 = arith.mulf %354, %357 : vector<16x256xf32>
    %359 = arith.addf %349, %358 : vector<16x256xf32>
    %c15_i32_201 = arith.constant 15 : i32
    %360 = tpu.dynamic_rotate %280 by %c15_i32_201 dim 1 : vector<16x256xf32>, i32 -> vector<16x256xf32>
    %c8_202 = arith.constant 8 : index
    %c0_203 = arith.constant 0 : index
    %c0_204 = arith.constant 0 : index
    %361 = vector.load %arg10[%c8_202, %c0_203, %c0_204] : memref<25x1x256xf32, #tpu.memory_space<vmem>>, vector<1x1x256xf32>
    %362 = vector.shape_cast %361 : vector<1x1x256xf32> to vector<1x256xf32>
    %363 = vector.broadcast %362 : vector<1x256xf32> to vector<16x256xf32>
    %364 = arith.mulf %360, %363 : vector<16x256xf32>
    %c8_205 = arith.constant 8 : index
    %c0_206 = arith.constant 0 : index
    %c0_207 = arith.constant 0 : index
    %365 = vector.load %arg8[%c8_205, %c0_206, %c0_207] : memref<25x16x1xf32, #tpu.memory_space<vmem>>, vector<1x16x1xf32>
    %366 = vector.shape_cast %365 : vector<1x16x1xf32> to vector<16x1xf32>
    %367 = vector.broadcast %366 : vector<16x1xf32> to vector<16x256xf32>
    %368 = arith.mulf %364, %367 : vector<16x256xf32>
    %369 = arith.addf %359, %368 : vector<16x256xf32>
    %c14_i32_208 = arith.constant 14 : i32
    %370 = tpu.dynamic_rotate %280 by %c14_i32_208 dim 1 : vector<16x256xf32>, i32 -> vector<16x256xf32>
    %c9_209 = arith.constant 9 : index
    %c0_210 = arith.constant 0 : index
    %c0_211 = arith.constant 0 : index
    %371 = vector.load %arg10[%c9_209, %c0_210, %c0_211] : memref<25x1x256xf32, #tpu.memory_space<vmem>>, vector<1x1x256xf32>
    %372 = vector.shape_cast %371 : vector<1x1x256xf32> to vector<1x256xf32>
    %373 = vector.broadcast %372 : vector<1x256xf32> to vector<16x256xf32>
    %374 = arith.mulf %370, %373 : vector<16x256xf32>
    %c9_212 = arith.constant 9 : index
    %c0_213 = arith.constant 0 : index
    %c0_214 = arith.constant 0 : index
    %375 = vector.load %arg8[%c9_212, %c0_213, %c0_214] : memref<25x16x1xf32, #tpu.memory_space<vmem>>, vector<1x16x1xf32>
    %376 = vector.shape_cast %375 : vector<1x16x1xf32> to vector<16x1xf32>
    %377 = vector.broadcast %376 : vector<16x1xf32> to vector<16x256xf32>
    %378 = arith.mulf %374, %377 : vector<16x256xf32>
    %379 = arith.addf %369, %378 : vector<16x256xf32>
    %c2_i32_215 = arith.constant 2 : i32
    %380 = tpu.dynamic_rotate %280 by %c2_i32_215 dim 1 : vector<16x256xf32>, i32 -> vector<16x256xf32>
    %c10_216 = arith.constant 10 : index
    %c0_217 = arith.constant 0 : index
    %c0_218 = arith.constant 0 : index
    %381 = vector.load %arg10[%c10_216, %c0_217, %c0_218] : memref<25x1x256xf32, #tpu.memory_space<vmem>>, vector<1x1x256xf32>
    %382 = vector.shape_cast %381 : vector<1x1x256xf32> to vector<1x256xf32>
    %383 = vector.broadcast %382 : vector<1x256xf32> to vector<16x256xf32>
    %384 = arith.mulf %380, %383 : vector<16x256xf32>
    %c10_219 = arith.constant 10 : index
    %c0_220 = arith.constant 0 : index
    %c0_221 = arith.constant 0 : index
    %385 = vector.load %arg8[%c10_219, %c0_220, %c0_221] : memref<25x16x1xf32, #tpu.memory_space<vmem>>, vector<1x16x1xf32>
    %386 = vector.shape_cast %385 : vector<1x16x1xf32> to vector<16x1xf32>
    %387 = vector.broadcast %386 : vector<16x1xf32> to vector<16x256xf32>
    %388 = arith.mulf %384, %387 : vector<16x256xf32>
    %389 = arith.addf %379, %388 : vector<16x256xf32>
    %c1_i32_222 = arith.constant 1 : i32
    %390 = tpu.dynamic_rotate %280 by %c1_i32_222 dim 1 : vector<16x256xf32>, i32 -> vector<16x256xf32>
    %c11_223 = arith.constant 11 : index
    %c0_224 = arith.constant 0 : index
    %c0_225 = arith.constant 0 : index
    %391 = vector.load %arg10[%c11_223, %c0_224, %c0_225] : memref<25x1x256xf32, #tpu.memory_space<vmem>>, vector<1x1x256xf32>
    %392 = vector.shape_cast %391 : vector<1x1x256xf32> to vector<1x256xf32>
    %393 = vector.broadcast %392 : vector<1x256xf32> to vector<16x256xf32>
    %394 = arith.mulf %390, %393 : vector<16x256xf32>
    %c11_226 = arith.constant 11 : index
    %c0_227 = arith.constant 0 : index
    %c0_228 = arith.constant 0 : index
    %395 = vector.load %arg8[%c11_226, %c0_227, %c0_228] : memref<25x16x1xf32, #tpu.memory_space<vmem>>, vector<1x16x1xf32>
    %396 = vector.shape_cast %395 : vector<1x16x1xf32> to vector<16x1xf32>
    %397 = vector.broadcast %396 : vector<16x1xf32> to vector<16x256xf32>
    %398 = arith.mulf %394, %397 : vector<16x256xf32>
    %399 = arith.addf %389, %398 : vector<16x256xf32>
    %c12_229 = arith.constant 12 : index
    %c0_230 = arith.constant 0 : index
    %c0_231 = arith.constant 0 : index
    %400 = vector.load %arg10[%c12_229, %c0_230, %c0_231] : memref<25x1x256xf32, #tpu.memory_space<vmem>>, vector<1x1x256xf32>
    %401 = vector.shape_cast %400 : vector<1x1x256xf32> to vector<1x256xf32>
    %402 = vector.broadcast %401 : vector<1x256xf32> to vector<16x256xf32>
    %403 = arith.mulf %280, %402 : vector<16x256xf32>
    %c12_232 = arith.constant 12 : index
    %c0_233 = arith.constant 0 : index
    %c0_234 = arith.constant 0 : index
    %404 = vector.load %arg8[%c12_232, %c0_233, %c0_234] : memref<25x16x1xf32, #tpu.memory_space<vmem>>, vector<1x16x1xf32>
    %405 = vector.shape_cast %404 : vector<1x16x1xf32> to vector<16x1xf32>
    %406 = vector.broadcast %405 : vector<16x1xf32> to vector<16x256xf32>
    %407 = arith.mulf %403, %406 : vector<16x256xf32>
    %408 = arith.addf %399, %407 : vector<16x256xf32>
    %c255_i32_235 = arith.constant 255 : i32
    %409 = tpu.dynamic_rotate %280 by %c255_i32_235 dim 1 : vector<16x256xf32>, i32 -> vector<16x256xf32>
    %c13_236 = arith.constant 13 : index
    %c0_237 = arith.constant 0 : index
    %c0_238 = arith.constant 0 : index
    %410 = vector.load %arg10[%c13_236, %c0_237, %c0_238] : memref<25x1x256xf32, #tpu.memory_space<vmem>>, vector<1x1x256xf32>
    %411 = vector.shape_cast %410 : vector<1x1x256xf32> to vector<1x256xf32>
    %412 = vector.broadcast %411 : vector<1x256xf32> to vector<16x256xf32>
    %413 = arith.mulf %409, %412 : vector<16x256xf32>
    %c13_239 = arith.constant 13 : index
    %c0_240 = arith.constant 0 : index
    %c0_241 = arith.constant 0 : index
    %414 = vector.load %arg8[%c13_239, %c0_240, %c0_241] : memref<25x16x1xf32, #tpu.memory_space<vmem>>, vector<1x16x1xf32>
    %415 = vector.shape_cast %414 : vector<1x16x1xf32> to vector<16x1xf32>
    %416 = vector.broadcast %415 : vector<16x1xf32> to vector<16x256xf32>
    %417 = arith.mulf %413, %416 : vector<16x256xf32>
    %418 = arith.addf %408, %417 : vector<16x256xf32>
    %c254_i32_242 = arith.constant 254 : i32
    %419 = tpu.dynamic_rotate %280 by %c254_i32_242 dim 1 : vector<16x256xf32>, i32 -> vector<16x256xf32>
    %c14_243 = arith.constant 14 : index
    %c0_244 = arith.constant 0 : index
    %c0_245 = arith.constant 0 : index
    %420 = vector.load %arg10[%c14_243, %c0_244, %c0_245] : memref<25x1x256xf32, #tpu.memory_space<vmem>>, vector<1x1x256xf32>
    %421 = vector.shape_cast %420 : vector<1x1x256xf32> to vector<1x256xf32>
    %422 = vector.broadcast %421 : vector<1x256xf32> to vector<16x256xf32>
    %423 = arith.mulf %419, %422 : vector<16x256xf32>
    %c14_246 = arith.constant 14 : index
    %c0_247 = arith.constant 0 : index
    %c0_248 = arith.constant 0 : index
    %424 = vector.load %arg8[%c14_246, %c0_247, %c0_248] : memref<25x16x1xf32, #tpu.memory_space<vmem>>, vector<1x16x1xf32>
    %425 = vector.shape_cast %424 : vector<1x16x1xf32> to vector<16x1xf32>
    %426 = vector.broadcast %425 : vector<16x1xf32> to vector<16x256xf32>
    %427 = arith.mulf %423, %426 : vector<16x256xf32>
    %428 = arith.addf %418, %427 : vector<16x256xf32>
    %c242_i32_249 = arith.constant 242 : i32
    %429 = tpu.dynamic_rotate %280 by %c242_i32_249 dim 1 : vector<16x256xf32>, i32 -> vector<16x256xf32>
    %c15_250 = arith.constant 15 : index
    %c0_251 = arith.constant 0 : index
    %c0_252 = arith.constant 0 : index
    %430 = vector.load %arg10[%c15_250, %c0_251, %c0_252] : memref<25x1x256xf32, #tpu.memory_space<vmem>>, vector<1x1x256xf32>
    %431 = vector.shape_cast %430 : vector<1x1x256xf32> to vector<1x256xf32>
    %432 = vector.broadcast %431 : vector<1x256xf32> to vector<16x256xf32>
    %433 = arith.mulf %429, %432 : vector<16x256xf32>
    %c15_253 = arith.constant 15 : index
    %c0_254 = arith.constant 0 : index
    %c0_255 = arith.constant 0 : index
    %434 = vector.load %arg8[%c15_253, %c0_254, %c0_255] : memref<25x16x1xf32, #tpu.memory_space<vmem>>, vector<1x16x1xf32>
    %435 = vector.shape_cast %434 : vector<1x16x1xf32> to vector<16x1xf32>
    %436 = vector.broadcast %435 : vector<16x1xf32> to vector<16x256xf32>
    %437 = arith.mulf %433, %436 : vector<16x256xf32>
    %438 = arith.addf %428, %437 : vector<16x256xf32>
    %c241_i32_256 = arith.constant 241 : i32
    %439 = tpu.dynamic_rotate %280 by %c241_i32_256 dim 1 : vector<16x256xf32>, i32 -> vector<16x256xf32>
    %c16_257 = arith.constant 16 : index
    %c0_258 = arith.constant 0 : index
    %c0_259 = arith.constant 0 : index
    %440 = vector.load %arg10[%c16_257, %c0_258, %c0_259] : memref<25x1x256xf32, #tpu.memory_space<vmem>>, vector<1x1x256xf32>
    %441 = vector.shape_cast %440 : vector<1x1x256xf32> to vector<1x256xf32>
    %442 = vector.broadcast %441 : vector<1x256xf32> to vector<16x256xf32>
    %443 = arith.mulf %439, %442 : vector<16x256xf32>
    %c16_260 = arith.constant 16 : index
    %c0_261 = arith.constant 0 : index
    %c0_262 = arith.constant 0 : index
    %444 = vector.load %arg8[%c16_260, %c0_261, %c0_262] : memref<25x16x1xf32, #tpu.memory_space<vmem>>, vector<1x16x1xf32>
    %445 = vector.shape_cast %444 : vector<1x16x1xf32> to vector<16x1xf32>
    %446 = vector.broadcast %445 : vector<16x1xf32> to vector<16x256xf32>
    %447 = arith.mulf %443, %446 : vector<16x256xf32>
    %448 = arith.addf %438, %447 : vector<16x256xf32>
    %c240_i32_263 = arith.constant 240 : i32
    %449 = tpu.dynamic_rotate %280 by %c240_i32_263 dim 1 : vector<16x256xf32>, i32 -> vector<16x256xf32>
    %c17_264 = arith.constant 17 : index
    %c0_265 = arith.constant 0 : index
    %c0_266 = arith.constant 0 : index
    %450 = vector.load %arg10[%c17_264, %c0_265, %c0_266] : memref<25x1x256xf32, #tpu.memory_space<vmem>>, vector<1x1x256xf32>
    %451 = vector.shape_cast %450 : vector<1x1x256xf32> to vector<1x256xf32>
    %452 = vector.broadcast %451 : vector<1x256xf32> to vector<16x256xf32>
    %453 = arith.mulf %449, %452 : vector<16x256xf32>
    %c17_267 = arith.constant 17 : index
    %c0_268 = arith.constant 0 : index
    %c0_269 = arith.constant 0 : index
    %454 = vector.load %arg8[%c17_267, %c0_268, %c0_269] : memref<25x16x1xf32, #tpu.memory_space<vmem>>, vector<1x16x1xf32>
    %455 = vector.shape_cast %454 : vector<1x16x1xf32> to vector<16x1xf32>
    %456 = vector.broadcast %455 : vector<16x1xf32> to vector<16x256xf32>
    %457 = arith.mulf %453, %456 : vector<16x256xf32>
    %458 = arith.addf %448, %457 : vector<16x256xf32>
    %c239_i32_270 = arith.constant 239 : i32
    %459 = tpu.dynamic_rotate %280 by %c239_i32_270 dim 1 : vector<16x256xf32>, i32 -> vector<16x256xf32>
    %c18_271 = arith.constant 18 : index
    %c0_272 = arith.constant 0 : index
    %c0_273 = arith.constant 0 : index
    %460 = vector.load %arg10[%c18_271, %c0_272, %c0_273] : memref<25x1x256xf32, #tpu.memory_space<vmem>>, vector<1x1x256xf32>
    %461 = vector.shape_cast %460 : vector<1x1x256xf32> to vector<1x256xf32>
    %462 = vector.broadcast %461 : vector<1x256xf32> to vector<16x256xf32>
    %463 = arith.mulf %459, %462 : vector<16x256xf32>
    %c18_274 = arith.constant 18 : index
    %c0_275 = arith.constant 0 : index
    %c0_276 = arith.constant 0 : index
    %464 = vector.load %arg8[%c18_274, %c0_275, %c0_276] : memref<25x16x1xf32, #tpu.memory_space<vmem>>, vector<1x16x1xf32>
    %465 = vector.shape_cast %464 : vector<1x16x1xf32> to vector<16x1xf32>
    %466 = vector.broadcast %465 : vector<16x1xf32> to vector<16x256xf32>
    %467 = arith.mulf %463, %466 : vector<16x256xf32>
    %468 = arith.addf %458, %467 : vector<16x256xf32>
    %c238_i32_277 = arith.constant 238 : i32
    %469 = tpu.dynamic_rotate %280 by %c238_i32_277 dim 1 : vector<16x256xf32>, i32 -> vector<16x256xf32>
    %c19_278 = arith.constant 19 : index
    %c0_279 = arith.constant 0 : index
    %c0_280 = arith.constant 0 : index
    %470 = vector.load %arg10[%c19_278, %c0_279, %c0_280] : memref<25x1x256xf32, #tpu.memory_space<vmem>>, vector<1x1x256xf32>
    %471 = vector.shape_cast %470 : vector<1x1x256xf32> to vector<1x256xf32>
    %472 = vector.broadcast %471 : vector<1x256xf32> to vector<16x256xf32>
    %473 = arith.mulf %469, %472 : vector<16x256xf32>
    %c19_281 = arith.constant 19 : index
    %c0_282 = arith.constant 0 : index
    %c0_283 = arith.constant 0 : index
    %474 = vector.load %arg8[%c19_281, %c0_282, %c0_283] : memref<25x16x1xf32, #tpu.memory_space<vmem>>, vector<1x16x1xf32>
    %475 = vector.shape_cast %474 : vector<1x16x1xf32> to vector<16x1xf32>
    %476 = vector.broadcast %475 : vector<16x1xf32> to vector<16x256xf32>
    %477 = arith.mulf %473, %476 : vector<16x256xf32>
    %478 = arith.addf %468, %477 : vector<16x256xf32>
    %c226_i32_284 = arith.constant 226 : i32
    %479 = tpu.dynamic_rotate %280 by %c226_i32_284 dim 1 : vector<16x256xf32>, i32 -> vector<16x256xf32>
    %c20_285 = arith.constant 20 : index
    %c0_286 = arith.constant 0 : index
    %c0_287 = arith.constant 0 : index
    %480 = vector.load %arg10[%c20_285, %c0_286, %c0_287] : memref<25x1x256xf32, #tpu.memory_space<vmem>>, vector<1x1x256xf32>
    %481 = vector.shape_cast %480 : vector<1x1x256xf32> to vector<1x256xf32>
    %482 = vector.broadcast %481 : vector<1x256xf32> to vector<16x256xf32>
    %483 = arith.mulf %479, %482 : vector<16x256xf32>
    %c20_288 = arith.constant 20 : index
    %c0_289 = arith.constant 0 : index
    %c0_290 = arith.constant 0 : index
    %484 = vector.load %arg8[%c20_288, %c0_289, %c0_290] : memref<25x16x1xf32, #tpu.memory_space<vmem>>, vector<1x16x1xf32>
    %485 = vector.shape_cast %484 : vector<1x16x1xf32> to vector<16x1xf32>
    %486 = vector.broadcast %485 : vector<16x1xf32> to vector<16x256xf32>
    %487 = arith.mulf %483, %486 : vector<16x256xf32>
    %488 = arith.addf %478, %487 : vector<16x256xf32>
    %c225_i32_291 = arith.constant 225 : i32
    %489 = tpu.dynamic_rotate %280 by %c225_i32_291 dim 1 : vector<16x256xf32>, i32 -> vector<16x256xf32>
    %c21_292 = arith.constant 21 : index
    %c0_293 = arith.constant 0 : index
    %c0_294 = arith.constant 0 : index
    %490 = vector.load %arg10[%c21_292, %c0_293, %c0_294] : memref<25x1x256xf32, #tpu.memory_space<vmem>>, vector<1x1x256xf32>
    %491 = vector.shape_cast %490 : vector<1x1x256xf32> to vector<1x256xf32>
    %492 = vector.broadcast %491 : vector<1x256xf32> to vector<16x256xf32>
    %493 = arith.mulf %489, %492 : vector<16x256xf32>
    %c21_295 = arith.constant 21 : index
    %c0_296 = arith.constant 0 : index
    %c0_297 = arith.constant 0 : index
    %494 = vector.load %arg8[%c21_295, %c0_296, %c0_297] : memref<25x16x1xf32, #tpu.memory_space<vmem>>, vector<1x16x1xf32>
    %495 = vector.shape_cast %494 : vector<1x16x1xf32> to vector<16x1xf32>
    %496 = vector.broadcast %495 : vector<16x1xf32> to vector<16x256xf32>
    %497 = arith.mulf %493, %496 : vector<16x256xf32>
    %498 = arith.addf %488, %497 : vector<16x256xf32>
    %c224_i32_298 = arith.constant 224 : i32
    %499 = tpu.dynamic_rotate %280 by %c224_i32_298 dim 1 : vector<16x256xf32>, i32 -> vector<16x256xf32>
    %c22_299 = arith.constant 22 : index
    %c0_300 = arith.constant 0 : index
    %c0_301 = arith.constant 0 : index
    %500 = vector.load %arg10[%c22_299, %c0_300, %c0_301] : memref<25x1x256xf32, #tpu.memory_space<vmem>>, vector<1x1x256xf32>
    %501 = vector.shape_cast %500 : vector<1x1x256xf32> to vector<1x256xf32>
    %502 = vector.broadcast %501 : vector<1x256xf32> to vector<16x256xf32>
    %503 = arith.mulf %499, %502 : vector<16x256xf32>
    %c22_302 = arith.constant 22 : index
    %c0_303 = arith.constant 0 : index
    %c0_304 = arith.constant 0 : index
    %504 = vector.load %arg8[%c22_302, %c0_303, %c0_304] : memref<25x16x1xf32, #tpu.memory_space<vmem>>, vector<1x16x1xf32>
    %505 = vector.shape_cast %504 : vector<1x16x1xf32> to vector<16x1xf32>
    %506 = vector.broadcast %505 : vector<16x1xf32> to vector<16x256xf32>
    %507 = arith.mulf %503, %506 : vector<16x256xf32>
    %508 = arith.addf %498, %507 : vector<16x256xf32>
    %c223_i32_305 = arith.constant 223 : i32
    %509 = tpu.dynamic_rotate %280 by %c223_i32_305 dim 1 : vector<16x256xf32>, i32 -> vector<16x256xf32>
    %c23_306 = arith.constant 23 : index
    %c0_307 = arith.constant 0 : index
    %c0_308 = arith.constant 0 : index
    %510 = vector.load %arg10[%c23_306, %c0_307, %c0_308] : memref<25x1x256xf32, #tpu.memory_space<vmem>>, vector<1x1x256xf32>
    %511 = vector.shape_cast %510 : vector<1x1x256xf32> to vector<1x256xf32>
    %512 = vector.broadcast %511 : vector<1x256xf32> to vector<16x256xf32>
    %513 = arith.mulf %509, %512 : vector<16x256xf32>
    %c23_309 = arith.constant 23 : index
    %c0_310 = arith.constant 0 : index
    %c0_311 = arith.constant 0 : index
    %514 = vector.load %arg8[%c23_309, %c0_310, %c0_311] : memref<25x16x1xf32, #tpu.memory_space<vmem>>, vector<1x16x1xf32>
    %515 = vector.shape_cast %514 : vector<1x16x1xf32> to vector<16x1xf32>
    %516 = vector.broadcast %515 : vector<16x1xf32> to vector<16x256xf32>
    %517 = arith.mulf %513, %516 : vector<16x256xf32>
    %518 = arith.addf %508, %517 : vector<16x256xf32>
    %c222_i32_312 = arith.constant 222 : i32
    %519 = tpu.dynamic_rotate %280 by %c222_i32_312 dim 1 : vector<16x256xf32>, i32 -> vector<16x256xf32>
    %c24_313 = arith.constant 24 : index
    %c0_314 = arith.constant 0 : index
    %c0_315 = arith.constant 0 : index
    %520 = vector.load %arg10[%c24_313, %c0_314, %c0_315] : memref<25x1x256xf32, #tpu.memory_space<vmem>>, vector<1x1x256xf32>
    %521 = vector.shape_cast %520 : vector<1x1x256xf32> to vector<1x256xf32>
    %522 = vector.broadcast %521 : vector<1x256xf32> to vector<16x256xf32>
    %523 = arith.mulf %519, %522 : vector<16x256xf32>
    %c24_316 = arith.constant 24 : index
    %c0_317 = arith.constant 0 : index
    %c0_318 = arith.constant 0 : index
    %524 = vector.load %arg8[%c24_316, %c0_317, %c0_318] : memref<25x16x1xf32, #tpu.memory_space<vmem>>, vector<1x16x1xf32>
    %525 = vector.shape_cast %524 : vector<1x16x1xf32> to vector<16x1xf32>
    %526 = vector.broadcast %525 : vector<16x1xf32> to vector<16x256xf32>
    %527 = arith.mulf %523, %526 : vector<16x256xf32>
    %528 = arith.addf %518, %527 : vector<16x256xf32>
    %529 = vector.broadcast %5 : vector<16x1xf32> to vector<16x256xf32>
    %530 = arith.addf %528, %529 : vector<16x256xf32>
    %531 = tpu.concatenate %280, %530 in 0 : vector<16x256xf32>, vector<16x256xf32> -> vector<32x256xf32>
    %532 = arith.addf %531, %7 : vector<32x256xf32>
    %c0_319 = arith.constant 0 : index
    %c0_320 = arith.constant 0 : index
    %c0_321 = arith.constant 0 : index
    %533 = vector.load %arg11[%c0_319, %c0_320, %c0_321] : memref<1x32x256xf32, #tpu.memory_space<vmem>>, vector<1x32x256xf32>
    %534 = vector.shape_cast %533 : vector<1x32x256xf32> to vector<32x256xf32>
    %535 = vector.shape_cast %532 : vector<32x256xf32> to vector<1x32x256xf32>
    tpu.vector_store %arg11[%c0_319, %c0_320, %c0_321], %535 {strides = array<i32>} : memref<1x32x256xf32, #tpu.memory_space<vmem>>, vector<1x32x256xf32>,
    return
  }
  func.func @transform_0(%arg0: i32) -> (i32, i32, i32) {
    %c0_i32 = arith.constant 0 : i32
    %c0_i32_0 = arith.constant 0 : i32
    %c0_i32_1 = arith.constant 0 : i32
    return %arg0, %c0_i32, %c0_i32_0 : i32, i32, i32
  }
  func.func @transform_1(%arg0: i32) -> (i32, i32) {
    %c0_i32 = arith.constant 0 : i32
    %c0_i32_0 = arith.constant 0 : i32
    %c0_i32_1 = arith.constant 0 : i32
    return %c0_i32, %c0_i32_0 : i32, i32
  }
  func.func @transform_2(%arg0: i32) -> (i32, i32) {
    %c0_i32 = arith.constant 0 : i32
    %c0_i32_0 = arith.constant 0 : i32
    %c0_i32_1 = arith.constant 0 : i32
    return %c0_i32, %c0_i32_0 : i32, i32
  }
  func.func @transform_3(%arg0: i32) -> (i32, i32, i32) {
    %c0_i32 = arith.constant 0 : i32
    %c0_i32_0 = arith.constant 0 : i32
    %c0_i32_1 = arith.constant 0 : i32
    %c0_i32_2 = arith.constant 0 : i32
    return %c0_i32, %c0_i32_0, %c0_i32_1 : i32, i32, i32
  }
  func.func @transform_4(%arg0: i32) -> (i32, i32) {
    %c0_i32 = arith.constant 0 : i32
    %c0_i32_0 = arith.constant 0 : i32
    %c0_i32_1 = arith.constant 0 : i32
    return %c0_i32, %c0_i32_0 : i32, i32
  }
  func.func @transform_5(%arg0: i32) -> (i32, i32) {
    %c0_i32 = arith.constant 0 : i32
    %c0_i32_0 = arith.constant 0 : i32
    %c0_i32_1 = arith.constant 0 : i32
    return %c0_i32, %c0_i32_0 : i32, i32
  }
  func.func @transform_6(%arg0: i32) -> (i32, i32) {
    %c0_i32 = arith.constant 0 : i32
    %c0_i32_0 = arith.constant 0 : i32
    %c0_i32_1 = arith.constant 0 : i32
    return %c0_i32, %c0_i32_0 : i32, i32
  }
  func.func @transform_7(%arg0: i32) -> (i32, i32, i32) {
    %c0_i32 = arith.constant 0 : i32
    %c0_i32_0 = arith.constant 0 : i32
    %c0_i32_1 = arith.constant 0 : i32
    %c0_i32_2 = arith.constant 0 : i32
    return %c0_i32, %c0_i32_0, %c0_i32_1 : i32, i32, i32
  }
  func.func @transform_8(%arg0: i32) -> (i32, i32) {
    %c0_i32 = arith.constant 0 : i32
    %c0_i32_0 = arith.constant 0 : i32
    %c0_i32_1 = arith.constant 0 : i32
    return %c0_i32, %c0_i32_0 : i32, i32
  }
  func.func @transform_9(%arg0: i32) -> (i32, i32, i32) {
    %c0_i32 = arith.constant 0 : i32
    %c0_i32_0 = arith.constant 0 : i32
    %c0_i32_1 = arith.constant 0 : i32
    %c0_i32_2 = arith.constant 0 : i32
    return %c0_i32, %c0_i32_0, %c0_i32_1 : i32, i32, i32
  }
  func.func @transform_10(%arg0: i32) -> (i32, i32, i32) {
    %c0_i32 = arith.constant 0 : i32
    %c0_i32_0 = arith.constant 0 : i32
    %c0_i32_1 = arith.constant 0 : i32
    return %arg0, %c0_i32, %c0_i32_0 : i32, i32, i32
  }
}

</mosaic_0001>

<bundles_post_ra>
// kernel: tpu_custom_call.1
= control target key start
LH: loop header
LB: loop body
LE: loop exit
PB: predicated region body
PF: predicated region fallthrough
CT: control target
= control target key end

     0   :  { %s4691_s0 = inlined_call_operand.vmem [shape: f32[2,32,256], index: 0, kind: input, shape index: {}]   ;;  %s4692_s1 = inlined_call_operand.vmem [shape: bf16[8,32], index: 1, kind: input, shape index: {}]   ;;  %s4693_s2 = inlined_call_operand.vmem [shape: f32[8,1], index: 2, kind: input, shape index: {}]   ;;  %s4694_s3 = inlined_call_operand.vmem [shape: f32[25,8,1], index: 3, kind: input, shape index: {}]   ;;  %s4695_s4 = inlined_call_operand.vmem [shape: f32[8,1], index: 4, kind: input, shape index: {}]   ;;  %s4696_s5 = inlined_call_operand.vmem [shape: bf16[16,16], index: 5, kind: input, shape index: {}]   ;;  %s4697_s6 = inlined_call_operand.vmem [shape: f32[16,1], index: 6, kind: input, shape index: {}]   ;;  %s4698_s7 = inlined_call_operand.vmem [shape: f32[25,16,1], index: 7, kind: input, shape index: {}]   ;;  %s4699_s8 = inlined_call_operand.vmem [shape: f32[16,1], index: 8, kind: input, shape index: {}]   ;;  %s4700_s9 = inlined_call_operand.vmem [shape: f32[25,1,256], index: 9, kind: input, shape index: {}]   ;;  %s4701_s10 = inlined_call_operand.hbm [shape: f32[2,32,256], index: 10, kind: output, shape index: {}]  }
   0x1   :  { %4942 = sst [smem:[#allocation122_spill]] %s4691_s0 }
   0x2   :  { %4943 = sst [smem:[#allocation123_spill]] %s4692_s1 }
   0x3   :  { %4944 = sst [smem:[#allocation124_spill]] %s4693_s2 }
   0x4   :  { %4945 = sst [smem:[#allocation125_spill]] %s4694_s3 }
   0x5   :  { %4946 = sst [smem:[#allocation126_spill]] %s4695_s4 }
   0x6   :  { %4947 = sst [smem:[#allocation127_spill]] %s4697_s6 }
   0x7   :  { %4948 = sst [smem:[#allocation128_spill]] %s4699_s8 }
   0x8   :  { %4949 = sst [smem:[#allocation129_spill]] %s4701_s10 }
   0x9   :  { %15 = vsyncpa [#allocation3], 0 }
   0xa   :  { %17 = vsyncpa [#allocation3 + $0x1], 0  ;;  %s2706_s13 = smov 0   ;;  %s2708_s14 = smov 0  }
   0xb   :  { %s2710_s15 = smov 0   ;;  %s2712_s16 = smov 0  }
   0xc LB: > { %4950 = sst [smem:[#allocation5_spill]] %s2610_s13  ;;  %s2727_s17 = sadd.s32 4294967295, %s2622_s16   ;;  %s2622_s16 = sphi %s2712_s16, %s5301_s16   ;;  %s2618_s15 = sphi %s2710_s15, %s5303_s15   ;;  %s2614_s14 = sphi %s2708_s14, %s5305_s14   ;;  %s2610_s13 = sphi %s2706_s13, %s5304_s13  }
   0xd   : > { %4951 = sst [smem:[#allocation6_spill]] %s2618_s15  ;;  %s2355_s18 = sadd.s32 4294967294, %s2622_s16  }
   0xe   : > { %4952 = sst [smem:[#allocation7_spill]] %s2622_s16  ;;  %s2731_s19 = sadd.s32 1, %s2622_s16  }
   0xf   : > { %4953 = sst [smem:[#allocation8_spill]] %s2727_s17  ;;  %s245_s20 = sadd.s32 1, %s2618_s15 }
  0x10   : > { %4954 = sst [smem:[#allocation9_spill]] %s2731_s19  ;;  %s242_s21 = ssub.s32 %s2622_s16, %s2731_s19 }
  0x11   : > { %p255_p0 = scmp.ne.s32.totalorder %s2618_s15, %s2614_s14  ;;  %p243_p1 = scmp.eq.s32.totalorder %s242_s21, 0 }
  0x12   : > { %p256_p2 = scmp.eq.s32.totalorder %s2727_s17, 1  ;;  %p261_p3 = scmp.ne.s32.totalorder %s2614_s14, %s2610_s13 }
  0x13   : > { %p262_p4 = scmp.eq.s32.totalorder %s2355_s18, 1  ;;  %p2358_p7 = scmp.ge.s32.totalorder %s2622_s16, 1 }
  0x14   : > { %s2742_s22 = scalar_select %p243_p1, %s2618_s15, %s245_s20  }
  0x15   : > { %p2744_p5 = por %p256_p2, %p255_p0  ;;  %p2748_p6 = por %p262_p4, %p261_p3 }
  0x16   : > { %4955 = sst [smem:[#allocation10_spill]] %s2742_s22  ;;  %p315_p8 = scmp.lt.s32.totalorder %s2622_s16, 3 }
  0x17   : > { %s4956_s23 = scalar_select %p2744_p5, 1, 0 }
  0x18   : > { %s4958_s24 = scalar_select %p2748_p6, 1, 0 }
  0x19   : > { %4957 = sst [smem:[#allocation11_spill]] %s4956_s23  ;;  %p316_p9 = pnand %p2358_p7, %p315_p8 }
  0x1a   : > { %4959 = sst [smem:[#allocation12_spill]] %s4958_s24 }
  0x1b   : > { %319 = sbr.rel (%p316_p9) target bundleno = 1116 (0x45c), region = 60 }
  0x22   : > { %p353_p10 = scmp.lt.s32.totalorder %s2727_s17, 1  ;;  %s4960_s2 = sld [smem:[#allocation124_spill]]  ;;  %v2624_v1 = vmov 0   ;;  %vm385_vm0 = vcmask 261120  }
  0x23   : > { %421 = vmatprep.mubr.bf16.mxu0 %v2624_v1  ;;  %2533 = vset.pattern.permute.xlu0 %v2624_v1  ;;  %s4961_s3 = sld [smem:[#allocation125_spill]]  ;;  %s4962_s0 = sld [smem:[#allocation122_spill]] }
  0x24   : > { %s354_s27 = scalar_select %p353_p10, %s2727_s17, 1  ;;  %2534 = vset.pattern.permute.xlu1 %v2624_v1  ;;  %1330 = vmatprep.mubr.bf16.mxu1 %v2624_v1 }
  0x25   : > { %s4963_s1 = sld [smem:[#allocation123_spill]]  ;;  %s4708_s20 = smov 32  }
  0x26   : > { %s2466_s30 = sshll.u32 %s354_s27, 6  ;;  %s4730_s21 = smov 34  }
  0x27   : > { %s4704_s25 = smov 30   ;;  %s4728_s26 = smov 33  }
  0x28   : > { %v362_v0 = vld [vmem:[%s4960_s2] sm:$0xff]  ;;  %s4702_s27 = smov 17   ;;  %s4732_s28 = smov 31  }
  0x29   : > { %382 = vperm.xlu0 %2533, %v362_v0   ;;  %v2364_v2 = vld [vmem:[%s4961_s3 + $0x8] sm:$0xff]  ;;  %s2765_s18 = scalar_lea.vmem %s4962_s0, %s2466_s30  ;;  %v2368_v3 = vld [vmem:[%s4961_s3 + $0x18] sm:$0xff]  ;;  %v465_v4 = vld [vmem:[%s4961_s3] sm:$0xff]  ;;  %s4706_s29 = smov 15  }
  0x2a   : > { %v369_v5 = vld [vmem:[%s2765_s18 + $0x8] sm:$0xff]  ;;  %v371_v6 = vld [vmem:[%s2765_s18 + $0x18] sm:$0xff]  ;;  %v368_v7 = vld [vmem:[%s2765_s18] sm:$0xff]  ;;  %468 = vperm.xlu1 %2534, %v465_v4   ;;  %s4738_s30 = smov 18   ;;  %s4710_s11 = smov 2  }
  0x2b   : > { %v377_v8 = vpack.c.bf16 %v371_v6, %v369_v5  ;;  %v370_v9 = vld [vmem:[%s2765_s18 + $0x10] sm:$0xff]  ;;  %v373_v10 = vld [vmem:[%s2765_s18 + $0x28] sm:$0xff]  ;;  %v375_v11 = vld [vmem:[%s2765_s18 + $0x38] sm:$0xff]  ;;  %s4712_s12 = smov 16   ;;  %s4748_s0 = smov 94  }
  0x2c   : > { %v376_v12 = vpack.c.bf16 %v370_v9, %v368_v7  ;;  %v379_v13 = vpack.c.bf16 %v375_v11, %v373_v10  ;;  %v372_v14 = vld [vmem:[%s2765_s18 + $0x20] sm:$0xff]  ;;  %v374_v15 = vld [vmem:[%s2765_s18 + $0x30] sm:$0xff]  ;;  %v2372_v18 = vld [vmem:[%s4961_s3 + $0x28] sm:$0xff]  ;;  %s4978_s2 = smov 110   ;;  %s4984_s22 = smov 95  }
  0x2d   : > { %499 = vperm.xlu0 %2533, %v2364_v2   ;;  %v2366_v16 = vld [vmem:[%s4961_s3 + $0x10] sm:$0xff]  ;;  %389 = vmatprep.subr.bf16.mxu0 %v377_v8  ;;  %v378_v17 = vpack.c.bf16 %v374_v15, %v372_v14  ;;  %v2370_v19 = vld [vmem:[%s4961_s3 + $0x20] sm:$0xff]  ;;  %v2376_v21 = vld [vmem:[%s4961_s3 + $0x38] sm:$0xff]  ;;  %s4985_s15 = smov 98   ;;  %s4988_s19 = smov 94  }
  0x2e   : > { %390 = vmatpush1.bf16.msra.mxu0 %v376_v12  ;;  %532 = vperm.xlu1 %2534, %v2366_v16   ;;  %v359_v20 = vld [vmem:[%s4963_s1] sm:$0xf]  ;;  %v2374_v22 = vld [vmem:[%s4961_s3 + $0x30] sm:$0xff]  ;;  %v2380_v23 = vld [vmem:[%s4961_s3 + $0x48] sm:$0xff]  ;;  %s4974_s1 = smov 112   ;;  %s4989_s24 = smov 96  }
  0x2f   : > { %391 = vmatprep.subr.bf16.mxu0 %v379_v13  ;;  %v2378_v24 = vld [vmem:[%s4961_s3 + $0x40] sm:$0xff]  ;;  %v2384_v25 = vld [vmem:[%s4961_s3 + $0x58] sm:$0xff]  ;;  %v2382_v26 = vld [vmem:[%s4961_s3 + $0x50] sm:$0xff]  ;;  %s4990_s6 = sld [smem:[#allocation127_spill]]  ;;  %s4991_s4 = sld [smem:[#allocation126_spill]] }
  0x30   : > { %v2388_v27 = vld [vmem:[%s4961_s3 + $0x68] sm:$0xff]  ;;  %v2386_v28 = vld [vmem:[%s4961_s3 + $0x60] sm:$0xff]  ;;  %v2392_v29 = vld [vmem:[%s4961_s3 + $0x78] sm:$0xff]  ;;  %s350_s10 = sand.u32 1, %s2614_s14   ;;  %s5078_s17 = smov 33  }
  0x31   : > { %565 = vperm.xlu0 %2533, %v2368_v3   ;;  %v2390_v30 = vld [vmem:[%s4961_s3 + $0x70] sm:$0xff]  ;;  %v2396_v31 = vld [vmem:[%s4961_s3 + $0x88] sm:$0xff]  ;;  %v2394_v32 = vld [vmem:[%s4961_s3 + $0x80] sm:$0xff]  ;;  %s2359_s23 = sshll.u32 %s350_s10, 6  ;;  %s5083_s13 = smov 18  }
  0x32   : > { %392 = vmatpush1.bf16.msra.mxu0 %v378_v17  ;;  %598 = vperm.xlu1 %2534, %v2370_v19   ;;  %v2400_v33 = vld [vmem:[%s4961_s3 + $0x98] sm:$0xff]  ;;  %v2398_v34 = vld [vmem:[%s4961_s3 + $0x90] sm:$0xff]  ;;  %v2404_v35 = vld [vmem:[%s4961_s3 + $0xa8] sm:$0xff]  ;;  %s3766_s8 = scalar_lea.vmem [#allocation2], %s2359_s23  ;;  %s5093_s16 = smov 127  }
  0x33   : > { %v2402_v36 = vld [vmem:[%s4961_s3 + $0xa0] sm:$0xff]  ;;  %v2408_v37 = vld [vmem:[%s4961_s3 + $0xb8] sm:$0xff]  ;;  %v2406_v38 = vld [vmem:[%s4961_s3 + $0xb0] sm:$0xff]  ;;  %s5110_s23 = smov 95  }
  0x34   : > { %v2410_v39 = vld [vmem:[%s4961_s3 + $0xc0] sm:$0xff]  ;;  %s4981_s3 = smov 111  }
  0x35   : > { %631 = vperm.xlu0 %2533, %v2372_v18   ;;  %2362 = vmatmul.mubr.msk.bf16.vlgmr.msra.gmra.mrb[0].mxu0 %vm385_vm0, %v359_v20  ;;  %v364_v14 = vld [vmem:[%s4990_s6] sm:$0xff]  ;;  %v365_v17 = vld [vmem:[%s4990_s6 + $0x8] sm:$0xff]  ;;  %v2413_v20 = vld [vmem:[%s4698_s7 + $0x10] sm:$0xff]  ;;  %s5106_s6 = smov 97  }
  0x36   : > { %664 = vperm.xlu1 %2534, %v2374_v22   ;;  %v363_v15 = vld [vmem:[%s4991_s4] sm:$0xff]  ;;  %s5097_s4 = smov 114  }
  0x37   : > { %v1357_v16 = vld [vmem:[%s4698_s7] sm:$0xff] }
  0x39   : > { %697 = vperm.xlu0 %2533, %v2376_v21   ;;  %v1358_v21 = vld [vmem:[%s4698_s7 + $0x8] sm:$0xff] }
  0x3a   : > { %730 = vperm.xlu1 %2534, %v2378_v24   ;;  %v2415_v24 = vld [vmem:[%s4698_s7 + $0x20] sm:$0xff] }
  0x3d   : > { %763 = vperm.xlu0 %2533, %v2380_v23  }
  0x3e   : > { %796 = vperm.xlu1 %2534, %v2382_v26   ;;  %v2417_v26 = vld [vmem:[%s4698_s7 + $0x30] sm:$0xff] }
  0x41   : > { %829 = vperm.xlu0 %2533, %v2384_v25   ;;  %v2414_v25 = vld [vmem:[%s4698_s7 + $0x18] sm:$0xff] }
  0x42   : > { %855 = vperm.xlu1 %2534, %v2386_v28  }
  0x45   : > { %888 = vperm.xlu0 %2533, %v2388_v27   ;;  %v2416_v27 = vld [vmem:[%s4698_s7 + $0x28] sm:$0xff] }
  0x46   : > { %921 = vperm.xlu1 %2534, %v2390_v30   ;;  %v2419_v30 = vld [vmem:[%s4698_s7 + $0x40] sm:$0xff] }
  0x49   : > { %954 = vperm.xlu0 %2533, %v2392_v29  }
  0x4a   : > { %987 = vperm.xlu1 %2534, %v2394_v32  }
  0x4d   : > { %1020 = vperm.xlu0 %2533, %v2396_v31   ;;  %v2418_v31 = vld [vmem:[%s4698_s7 + $0x38] sm:$0xff] }
  0x4e   : > { %1053 = vperm.xlu1 %2534, %v2398_v34   ;;  %v2421_v34 = vld [vmem:[%s4698_s7 + $0x50] sm:$0xff] }
  0x51   : > { %1086 = vperm.xlu0 %2533, %v2400_v33  }
  0x52   : > { %1119 = vperm.xlu1 %2534, %v2402_v36  }
  0x55   : > { %1152 = vperm.xlu0 %2533, %v2404_v35   ;;  %v2420_v35 = vld [vmem:[%s4698_s7 + $0x48] sm:$0xff] }
  0x56   : > { %1185 = vperm.xlu1 %2534, %v2406_v38   ;;  %v2423_v38 = vld [vmem:[%s4698_s7 + $0x60] sm:$0xff] }
  0x59   : > { %1218 = vperm.xlu0 %2533, %v2408_v37  }
  0x5a   : > { %1251 = vperm.xlu1 %2534, %v2410_v39   ;;  %v2422_v39 = vld [vmem:[%s4698_s7 + $0x58] sm:$0xff] }
  0xa8   : > { %v383_v40 = vpop.permute.xlu0 %382 }
  0xa9   : > { %v2894_v59 = vpop.permute.xlu1 %468 }
  0xac   : > { %v2900_v60 = vpop.permute.xlu0 %499 }
  0xad   : > { %v2906_v61 = vpop.permute.xlu1 %532 }
  0xb0   : > { %v2912_v62 = vpop.permute.xlu0 %565 }
  0xb1   : > { %v2914_v63 = vpop.permute.xlu1 %598 }
  0xb4   : > { %v2920_v0 = vpop.permute.xlu0 %631 }
  0xb5   : > { %v2926_v1 = vpop.permute.xlu1 %664 }
  0xb8   : > { %v2932_v2 = vpop.permute.xlu0 %697 }
  0xb9   : > { %v2934_v3 = vpop.permute.xlu1 %730 }
  0xbc   : > { %v2940_v4 = vpop.permute.xlu0 %763 }
  0xbd   : > { %v2946_v5 = vpop.permute.xlu1 %796 }
  0xc0   : > { %v2952_v6 = vpop.permute.xlu0 %829 }
  0xc1   : > { %v2954_v7 = vpop.permute.xlu1 %855 }
  0xc4   : > { %v2960_v8 = vpop.permute.xlu0 %888 }
  0xc5   : > { %4976 = vst [vmem:[#allocation15_spill] sm:$0xff] %v2960_v8  ;;  %v2962_v9 = vpop.permute.xlu1 %921  ;;  %v2447_v8 = vld [vmem:[%s4698_s7 + $0x120] sm:$0xff] }
  0xc6   : > { %4977 = vst [vmem:[#allocation16_spill] sm:$0xff] %v2962_v9 }
  0xc8   : > { %v2972_v10 = vpop.permute.xlu0 %954 }
  0xc9   : > { %4982 = vst [vmem:[#allocation17_spill] sm:$0xff] %v2972_v10  ;;  %v2974_v11 = vpop.permute.xlu1 %987 }
  0xca   : > { %4983 = vst [vmem:[#allocation18_spill] sm:$0xff] %v2974_v11 }
  0xcc   : > { %v2980_v12 = vpop.permute.xlu0 %1020 }
  0xcd   : > { %4986 = vst [vmem:[#allocation19_spill] sm:$0xff] %v2980_v12  ;;  %v2982_v13 = vpop.permute.xlu1 %1053 }
  0xce   : > { %4987 = vst [vmem:[#allocation20_spill] sm:$0xff] %v2982_v13 }
  0xd0   : > { %v3000_v18 = vpop.permute.xlu0 %1086 }
  0xd1   : > { %4992 = vst [vmem:[#allocation21_spill] sm:$0xff] %v3000_v18  ;;  %v3002_v19 = vpop.permute.xlu1 %1119 }
  0xd2   : > { %4993 = vst [vmem:[#allocation22_spill] sm:$0xff] %v3002_v19 }
  0xd4   : > { %v3010_v22 = vpop.permute.xlu0 %1152 }
  0xd5   : > { %4994 = vst [vmem:[#allocation23_spill] sm:$0xff] %v3010_v22  ;;  %v3012_v23 = vpop.permute.xlu1 %1185  ;;  %v2369_v22 = vld [vmem:[%s4700_s9 + $0x8] sm:$0x3] }
  0xd6   : > { %4995 = vst [vmem:[#allocation24_spill] sm:$0xff] %v3012_v23 }
  0xd8   : > { %v3026_v28 = vpop.permute.xlu0 %1218 }
  0xd9   : > { %4996 = vst [vmem:[#allocation25_spill] sm:$0xff] %v3026_v28  ;;  %v3028_v29 = vpop.permute.xlu1 %1251 }
  0xda   : > { %4997 = vst [vmem:[#allocation26_spill] sm:$0xff] %v3028_v29 }
 0x108   : > { %v423_v41 = vpop.f32.mrb[0].mxu0 }
 0x109   : > { %v424_v42 = vadd.f32 %v423_v41, %v383_v40  ;;  %v425_v43 = vpop.f32.mrb[1].mxu0 }
 0x10a   : > { %v427_v44 = vpop.f32.mrb[2].mxu0  ;;  %v426_v50 = vadd.f32 %v425_v43, %v383_v40  ;;  %v2424_v43 = vld [vmem:[%s4698_s7 + $0x68] sm:$0xff] }
 0x10b   : > { %v430_v45 = vsub.f32 0.0, %v424_v42  ;;  %v428_v46 = vpop.f32.mrb[3].mxu0 }
 0x10c   : > { %v431_v53 = vsub.f32 0.0, %v426_v50  ;;  %v2427_v46 = vld [vmem:[%s4698_s7 + $0x80] sm:$0xff] }
 0x10d   : > { %v432_v47 = vmul.f32 1.442695, %v430_v45 }
 0x10e   : > { %v434_v54 = vmul.f32 1.442695, %v431_v53 }
 0x10f   : > { %2536 = vpow2.f32 %v432_v47  ;;  %v2426_v47 = vld [vmem:[%s4698_s7 + $0x78] sm:$0xff] }
 0x119   : > { %v2537_v48 = vpop.eup %2536 }
 0x11a   : > { %v436_v49 = vadd.f32 1.0, %v2537_v48 }
 0x11c   : > { %2538 = vrcp.f32 %v436_v49 }
 0x11d   : > { %2540 = vpow2.f32 %v434_v54 }
 0x126   : > { %v2539_v51 = vpop.eup %2538 }
 0x127   : > { %v2850_v52 = vmul.f32 %v2539_v51, %v424_v42  ;;  %v2541_v55 = vpop.eup %2540  ;;  %v2425_v42 = vld [vmem:[%s4698_s7 + $0x70] sm:$0xff]  ;;  %v2428_v51 = vld [vmem:[%s4698_s7 + $0x88] sm:$0xff] }
 0x128   : > { %v437_v56 = vadd.f32 1.0, %v2541_v55  ;;  %v446_v55 = vlaneseq }
 0x129   : > { %4964 = vst [vmem:[#allocation13_spill] sm:$0xff] %v2850_v52  ;;  %506 = vrot.lane.b32.xlu1 %v2850_v52, %s4708_s20  ;;  %442 = vrot.lane.b32.xlu0 %v2850_v52, %s4730_s21  ;;  %s4720_s20 = smov 1  }
 0x12a   : > { %2542 = vrcp.f32 %v437_v56  ;;  %v2431_v56 = vld [vmem:[%s4698_s7 + $0xa0] sm:$0xff] }
 0x12d   : > { %572 = vrot.lane.b32.xlu1 %v2850_v52, %s4704_s25  ;;  %473 = vrot.lane.b32.xlu0 %v2850_v52, %s4728_s26  ;;  %s4716_s25 = smov 14  }
 0x131   : > { %638 = vrot.lane.b32.xlu1 %v2850_v52, %s4702_s27  ;;  %539 = vrot.lane.b32.xlu0 %v2850_v52, %s4732_s28  ;;  %s4714_s27 = smov 126  }
 0x134   : > { %v2543_v57 = vpop.eup %2542 }
 0x135   : > { %704 = vrot.lane.b32.xlu1 %v2850_v52, %s4706_s29  ;;  %605 = vrot.lane.b32.xlu0 %v2850_v52, %s4738_s30  ;;  %s4718_s29 = smov 113   ;;  %v2892_v58 = vmul.f32 %v2543_v57, %v426_v50  ;;  %v2429_v50 = vld [vmem:[%s4698_s7 + $0x90] sm:$0xff]  ;;  %v2430_v57 = vld [vmem:[%s4698_s7 + $0x98] sm:$0xff] }
 0x137   : > { %4965 = vst [vmem:[#allocation14_spill] sm:$0xff] %v2892_v58 }
 0x139   : > { %770 = vrot.lane.b32.xlu1 %v2850_v52, %s4710_s11  ;;  %671 = vrot.lane.b32.xlu0 %v2850_v52, %s4712_s12  ;;  %s4726_s11 = smov 111   ;;  %s4744_s12 = smov 127  }
 0x13d   : > { %895 = vrot.lane.b32.xlu1 %v2850_v52, %s4714_s27  ;;  %737 = vrot.lane.b32.xlu0 %v2850_v52, %s4716_s25  ;;  %s4722_s27 = smov 98   ;;  %s4746_s25 = smov 114  }
 0x141   : > { %961 = vrot.lane.b32.xlu1 %v2850_v52, %s4718_s29  ;;  %803 = vrot.lane.b32.xlu0 %v2850_v52, %s4720_s20  ;;  %s4724_s29 = smov 96   ;;  %s4742_s20 = smov 112  }
 0x145   : > { %1027 = vrot.lane.b32.xlu1 %v2850_v52, %s4726_s11  ;;  %862 = vrot.lane.b32.xlu0 %v2850_v52, %s4744_s12  ;;  %s4734_s11 = smov 95  }
 0x149   : > { %1093 = vrot.lane.b32.xlu1 %v2850_v52, %s4722_s27  ;;  %928 = vrot.lane.b32.xlu0 %v2850_v52, %s4746_s25  ;;  %s4740_s27 = smov 110  }
 0x14d   : > { %1159 = vrot.lane.b32.xlu1 %v2850_v52, %s4724_s29  ;;  %994 = vrot.lane.b32.xlu0 %v2850_v52, %s4742_s20  ;;  %s4736_s29 = smov 97   ;;  %s4973_s20 = smov 2  }
 0x151   : > { %444 = vrot.lane.b32.xlu1 %v2892_v58, %s4730_s21  ;;  %1060 = vrot.lane.b32.xlu0 %v2850_v52, %s4740_s27  ;;  %s4967_s21 = smov 16   ;;  %s4972_s27 = smov 15  }
 0x155   : > { %475 = vrot.lane.b32.xlu1 %v2892_v58, %s4728_s26  ;;  %1126 = vrot.lane.b32.xlu0 %v2850_v52, %s4736_s29  ;;  %s4966_s26 = smov 32   ;;  %s4970_s29 = smov 17  }
 0x159   : > { %541 = vrot.lane.b32.xlu1 %v2892_v58, %s4732_s28  ;;  %1192 = vrot.lane.b32.xlu0 %v2850_v52, %s4734_s11  ;;  %s4968_s28 = smov 30   ;;  %s4969_s11 = smov 14  }
 0x15d   : > { %607 = vrot.lane.b32.xlu1 %v2892_v58, %s4738_s30  ;;  %508 = vrot.lane.b32.xlu0 %v2892_v58, %s4966_s26  ;;  %s4971_s30 = smov 1  }
 0x161   : > { %673 = vrot.lane.b32.xlu1 %v2892_v58, %s4967_s21  ;;  %574 = vrot.lane.b32.xlu0 %v2892_v58, %s4968_s28 }
 0x165   : > { %739 = vrot.lane.b32.xlu1 %v2892_v58, %s4969_s11  ;;  %640 = vrot.lane.b32.xlu0 %v2892_v58, %s4970_s29 }
 0x169   : > { %805 = vrot.lane.b32.xlu1 %v2892_v58, %s4971_s30  ;;  %706 = vrot.lane.b32.xlu0 %v2892_v58, %s4972_s27 }
 0x16d   : > { %864 = vrot.lane.b32.xlu1 %v2892_v58, %s4744_s12  ;;  %772 = vrot.lane.b32.xlu0 %v2892_v58, %s4973_s20  ;;  %s4975_s12 = smov 126  }
 0x171   : > { %930 = vrot.lane.b32.xlu1 %v2892_v58, %s4746_s25  ;;  %1225 = vrot.lane.b32.xlu0 %v2850_v52, %s4748_s0  ;;  %s4979_s25 = smov 113   ;;  %s4980_s0 = smov 97  }
 0x175   : > { %996 = vrot.lane.b32.xlu1 %v2892_v58, %s4974_s1  ;;  %897 = vrot.lane.b32.xlu0 %v2892_v58, %s4975_s12 }
 0x179   : > { %1062 = vrot.lane.b32.xlu1 %v2892_v58, %s4978_s2  ;;  %963 = vrot.lane.b32.xlu0 %v2892_v58, %s4979_s25 }
 0x17d   : > { %1128 = vrot.lane.b32.xlu1 %v2892_v58, %s4980_s0  ;;  %1029 = vrot.lane.b32.xlu0 %v2892_v58, %s4981_s3  ;;  %s5076_s0 = smov 34  }
 0x181   : > { %1194 = vrot.lane.b32.xlu1 %v2892_v58, %s4984_s22  ;;  %1095 = vrot.lane.b32.xlu0 %v2892_v58, %s4985_s15  ;;  %s5079_s22 = smov 31  }
 0x185   : > { %1227 = vrot.lane.b32.xlu1 %v2892_v58, %s4988_s19  ;;  %1161 = vrot.lane.b32.xlu0 %v2892_v58, %s4989_s24 }
 0x189   : > { %1281 = vperm.xlu1 %2534, %v364_v14   ;;  %1260 = vperm.xlu0 %2533, %v363_v15  }
 0x18d   : > { %1361 = vperm.xlu1 %2534, %v1357_v16   ;;  %1286 = vperm.xlu0 %2533, %v365_v17   ;;  %v454_v16 = vshrl.u32 %v446_v55, 7  ;;  %v2433_v17 = vld [vmem:[%s4698_s7 + $0xb0] sm:$0xff] }
 0x191   : > { %1394 = vperm.xlu1 %2534, %v2413_v20   ;;  %1366 = vperm.xlu0 %2533, %v1358_v21   ;;  %v2432_v20 = vld [vmem:[%s4698_s7 + $0xa8] sm:$0xff] }
 0x195   : > { %1431 = vperm.xlu1 %2534, %v2415_v24   ;;  %1399 = vperm.xlu0 %2533, %v2414_v25   ;;  %v3110_v25 = vsub.s32 0, %v454_v16 }
 0x199   : > { %1468 = vperm.xlu1 %2534, %v2417_v26   ;;  %1436 = vperm.xlu0 %2533, %v2416_v27   ;;  %v3112_v26 = vsub.s32 1, %v454_v16  ;;  %v2385_v27 = vld [vmem:[%s4700_s9 + $0x18] sm:$0x3]  ;;  %v2439_v16 = vld [vmem:[%s4698_s7 + $0xe0] sm:$0xff] }
 0x19b   : > { %v3036_v32 = vpop.permute.xlu1 %506  ;;  %v3038_v33 = vpop.permute.xlu0 %442 }
 0x19d   : > { %1505 = vperm.xlu1 %2534, %v2419_v30   ;;  %1473 = vperm.xlu0 %2533, %v2418_v31   ;;  %v2435_v30 = vld [vmem:[%s4698_s7 + $0xc0] sm:$0xff]  ;;  %v2434_v31 = vld [vmem:[%s4698_s7 + $0xb8] sm:$0xff] }
 0x19f   : > { %v3046_v36 = vpop.permute.xlu1 %572  ;;  %v3048_v37 = vpop.permute.xlu0 %473 }
 0x1a1   : > { %1542 = vperm.xlu1 %2534, %v2421_v34   ;;  %1510 = vperm.xlu0 %2533, %v2420_v35  }
 0x1a3   : > { %v3056_v40 = vpop.permute.xlu1 %638  ;;  %v3058_v41 = vpop.permute.xlu0 %539 }
 0x1a5   : > { %1579 = vperm.xlu1 %2534, %v2423_v38   ;;  %1547 = vperm.xlu0 %2533, %v2422_v39   ;;  %v3128_v38 = vrot.slane %v2385_v27, %v3110_v25  ;;  %v3131_v39 = vrot.slane %v2385_v27, %v3112_v26 }
 0x1a7   : > { %v3066_v44 = vpop.permute.xlu1 %704  ;;  %v3068_v45 = vpop.permute.xlu0 %605  ;;  %5001 = vst [vmem:[#allocation30_spill] sm:$0xff] %v3128_v38  ;;  %5002 = vst [vmem:[#allocation31_spill] sm:$0xff] %v3131_v39 }
 0x1a9   : > { %1616 = vperm.xlu1 %2534, %v2425_v42   ;;  %1584 = vperm.xlu0 %2533, %v2424_v43   ;;  %v2437_v42 = vld [vmem:[%s4698_s7 + $0xd0] sm:$0xff]  ;;  %v2436_v43 = vld [vmem:[%s4698_s7 + $0xc8] sm:$0xff] }
 0x1ab   : > { %v3076_v48 = vpop.permute.xlu1 %770  ;;  %v3078_v49 = vpop.permute.xlu0 %671 }
 0x1ad   : > { %1653 = vperm.xlu1 %2534, %v2427_v46   ;;  %1621 = vperm.xlu0 %2533, %v2426_v47  }
 0x1af   : > { %v3086_v53 = vpop.permute.xlu1 %895  ;;  %v3088_v54 = vpop.permute.xlu0 %737 }
 0x1b1   : > { %1690 = vperm.xlu1 %2534, %v2429_v50   ;;  %1658 = vperm.xlu0 %2533, %v2428_v51   ;;  %v849_v50 = vmul.f32 %v3128_v38, %v2850_v52  ;;  %v850_v51 = vmul.f32 %v3131_v39, %v2892_v58  ;;  %v2371_v39 = vld [vmem:[%s4700_s9 + $0xa] sm:$0x3]  ;;  %v2365_v58 = vld [vmem:[%s4700_s9 + $0x4] sm:$0x3] }
 0x1b2   : > { %v3212_v28 = vrot.slane %v2371_v39, %v3110_v25  ;;  %v3215_v23 = vrot.slane %v2371_v39, %v3112_v26  ;;  %v3240_v13 = vrot.slane %v2365_v58, %v3112_v26 }
 0x1b3   : > { %v3096_v14 = vpop.permute.xlu1 %961  ;;  %v3098_v15 = vpop.permute.xlu0 %803 }
 0x1b4   : > { %4998 = vst [vmem:[#allocation27_spill] sm:$0xff] %v3096_v14 }
 0x1b5   : > { %1727 = vperm.xlu1 %2534, %v2431_v56   ;;  %1695 = vperm.xlu0 %2533, %v2430_v57   ;;  %v3147_v56 = vand.u32 127, %v446_v55  ;;  %v451_v57 = vld [vmem:[%s4700_s9] sm:$0x3]  ;;  %v2367_v55 = vld [vmem:[%s4700_s9 + $0x6] sm:$0x3] }
 0x1b6   : > { %v3176_v38 = vrot.slane %v451_v57, %v3112_v26 }
 0x1b7   : > { %v3106_v21 = vpop.permute.xlu1 %1027  ;;  %v3108_v24 = vpop.permute.xlu0 %862  ;;  %vm448_vm1 = vcmp.lt.s32.totalorder %v3147_v56, 34  ;;  %vm477_vm2 = vcmp.lt.s32.totalorder %v3147_v56, 33  ;;  %vm543_vm3 = vcmp.lt.s32.totalorder %v3147_v56, 31  ;;  %vm609_vm4 = vcmp.lt.s32.totalorder %v3147_v56, 18 }
 0x1b8   : > { %4999 = vst [vmem:[#allocation28_spill] sm:$0xff] %v3106_v21  ;;  %5009 = vst [vmem:[#allocation38_spill] sm:$0xff] %v3176_v38  ;;  %vm510_vm5 = vcmp.lt.s32.totalorder %v3147_v56, 32  ;;  %vm576_vm6 = vcmp.lt.s32.totalorder %v3147_v56, 30  ;;  %vm675_vm7 = vcmp.lt.s32.totalorder %v3147_v56, 16  ;;  %vm741_vm8 = vcmp.lt.s32.totalorder %v3147_v56, 14 }
 0x1b9   : > { %1764 = vperm.xlu1 %2534, %v2433_v17   ;;  %1732 = vperm.xlu0 %2533, %v2432_v20   ;;  %v2438_v17 = vld [vmem:[%s4698_s7 + $0xd8] sm:$0xff]  ;;  %v2363_v20 = vld [vmem:[%s4700_s9 + $0x2] sm:$0x3]  ;;  %vm642_vm9 = vcmp.lt.s32.totalorder %v3147_v56, 17  ;;  %vm708_vm10 = vcmp.lt.s32.totalorder %v3147_v56, 15  ;;  %vm4803_vm11 = vcmp.lt.s32.totalorder %v3147_v56, 1 }
 0x1ba   : > { %vm4804_vm12 = vcmp.lt.s32.totalorder %v3147_v56, 2  ;;  %vm4805_vm13 = vcmp.lt.s32.totalorder %v3147_v56, 127  ;;  %vm4806_vm14 = vcmp.lt.s32.totalorder %v3147_v56, 114  ;;  %vm4807_vm15 = vcmp.lt.s32.totalorder %v3147_v56, 126 }
 0x1bb   : > { %v3123_v34 = vpop.permute.xlu1 %1093  ;;  %v3125_v35 = vpop.permute.xlu0 %928  ;;  %vm4816_vm0 = vcmp.lt.s32.totalorder %v3147_v56, 112 }
 0x1bc   : > { %5000 = vst [vmem:[#allocation29_spill] sm:$0xff] %v3123_v34  ;;  %v2379_v34 = vld [vmem:[%s4700_s9 + $0x12] sm:$0x3] }
 0x1bd   : > { %1789 = vperm.xlu1 %2534, %v2435_v30   ;;  %1769 = vperm.xlu0 %2533, %v2434_v31   ;;  %v3167_v31 = vmul.f32 %v2954_v7, %v849_v50  ;;  %v3190_v50 = vrot.slane %v2363_v20, %v3112_v26  ;;  %v3278_v21 = vrot.slane %v2379_v34, %v3110_v25 }
 0x1be   : > { %v3281_v11 = vrot.slane %v2379_v34, %v3112_v26 }
 0x1bf   : > { %v3139_v46 = vpop.permute.xlu1 %1159  ;;  %v3141_v47 = vpop.permute.xlu0 %994  ;;  %5006 = vst [vmem:[#allocation35_spill] sm:$0xff] %v3167_v31  ;;  %5011 = vst [vmem:[#allocation40_spill] sm:$0xff] %v3190_v50  ;;  %v2444_v31 = vld [vmem:[%s4698_s7 + $0x108] sm:$0xff] }
 0x1c0   : > { %5003 = vst [vmem:[#allocation32_spill] sm:$0xff] %v3139_v46  ;;  %5004 = vst [vmem:[#allocation33_spill] sm:$0xff] %v3141_v47 }
 0x1c1   : > { %1826 = vperm.xlu1 %2534, %v2437_v42   ;;  %1794 = vperm.xlu0 %2533, %v2436_v43   ;;  %v3170_v42 = vmul.f32 %v2954_v7, %v850_v51  ;;  %v3173_v43 = vrot.slane %v451_v57, %v3110_v25  ;;  %v3187_v7 = vrot.slane %v2363_v20, %v3110_v25  ;;  %v2441_v51 = vld [vmem:[%s4698_s7 + $0xf0] sm:$0xff]  ;;  %v2440_v57 = vld [vmem:[%s4698_s7 + $0xe8] sm:$0xff] }
 0x1c2   : > { %v2375_v20 = vld [vmem:[%s4700_s9 + $0xe] sm:$0x3]  ;;  %5018 = vst [vmem:[#allocation47_spill] sm:$0xff] %v3278_v21  ;;  %5019 = vst [vmem:[#allocation48_spill] sm:$0xff] %v3281_v11 }
 0x1c3   : > { %v445_v27 = vpop.permute.xlu1 %444  ;;  %v3161_v30 = vpop.permute.xlu0 %1060  ;;  %5007 = vst [vmem:[#allocation36_spill] sm:$0xff] %v3170_v42  ;;  %5008 = vst [vmem:[#allocation37_spill] sm:$0xff] %v3173_v43 }
 0x1c4   : > { %5005 = vst [vmem:[#allocation34_spill] sm:$0xff] %v3161_v30  ;;  %5010 = vst [vmem:[#allocation39_spill] sm:$0xff] %v3187_v7  ;;  %v449_v46 = vsel %vm448_vm1, %v3038_v33, %v445_v27  ;;  %v450_v19 = vsel %vm448_vm1, %v445_v27, %v3038_v33  ;;  %v3246_v33 = vrot.slane %v2375_v20, %v3112_v26  ;;  %v2387_v30 = vld [vmem:[%s4700_s9 + $0x1a] sm:$0x3] }
 0x1c5   : > { %1863 = vperm.xlu1 %2534, %v2439_v16   ;;  %1831 = vperm.xlu0 %2533, %v2438_v17   ;;  %v3200_v16 = vrot.slane %v2367_v55, %v3110_v25  ;;  %v3203_v17 = vrot.slane %v2367_v55, %v3112_v26  ;;  %v3219_v55 = vrot.slane %v2365_v58, %v3110_v25  ;;  %v2443_v58 = vld [vmem:[%s4698_s7 + $0x100] sm:$0xff] }
 0x1c6   : > { %5016 = vst [vmem:[#allocation45_spill] sm:$0xff] %v3246_v33 }
 0x1c7   : > { %5012 = vst [vmem:[#allocation41_spill] sm:$0xff] %v3200_v16  ;;  %5013 = vst [vmem:[#allocation42_spill] sm:$0xff] %v3203_v17  ;;  %v476_v52 = vpop.permute.xlu1 %475  ;;  %v3209_v29 = vpop.permute.xlu0 %1126 }
 0x1c8   : > { %5014 = vst [vmem:[#allocation43_spill] sm:$0xff] %v3209_v29  ;;  %v478_v39 = vsel %vm477_vm2, %v3048_v37, %v476_v52  ;;  %v479_v18 = vsel %vm477_vm2, %v476_v52, %v3048_v37  ;;  %v3243_v29 = vrot.slane %v2375_v20, %v3110_v25  ;;  %v2373_v52 = vld [vmem:[%s4700_s9 + $0xc] sm:$0x3]  ;;  %v2383_v20 = vld [vmem:[%s4700_s9 + $0x16] sm:$0x3] }
 0x1c9   : > { %1900 = vperm.xlu1 %2534, %v2441_v51   ;;  %1868 = vperm.xlu0 %2533, %v2440_v57   ;;  %v493_v37 = vmul.f32 %v3187_v7, %v479_v18  ;;  %v494_v27 = vmul.f32 %v3190_v50, %v478_v39  ;;  %v3259_v51 = vrot.slane %v2369_v22, %v3110_v25  ;;  %v2377_v18 = vld [vmem:[%s4700_s9 + $0x10] sm:$0x3] }
 0x1ca   : > { %5015 = vst [vmem:[#allocation44_spill] sm:$0xff] %v3243_v29  ;;  %v3262_v57 = vrot.slane %v2369_v22, %v3112_v26  ;;  %v463_v39 = vmul.f32 %v3173_v43, %v450_v19  ;;  %v464_v50 = vmul.f32 %v3176_v38, %v449_v46  ;;  %v2442_v22 = vld [vmem:[%s4698_s7 + $0xf8] sm:$0xff]  ;;  %v3293_v38 = vrot.slane %v2373_v52, %v3110_v25 }
 0x1cb   : > { %v542_v7 = vpop.permute.xlu1 %541  ;;  %v3272_v12 = vpop.permute.xlu0 %1192  ;;  %v3296_v43 = vrot.slane %v2373_v52, %v3112_v26  ;;  %v3299_v34 = vrot.slane %v2383_v20, %v3110_v25  ;;  %v3305_v14 = vrot.slane %v2377_v18, %v3110_v25  ;;  %v3308_v9 = vrot.slane %v2377_v18, %v3112_v26  ;;  %v2445_v52 = vld [vmem:[%s4698_s7 + $0x110] sm:$0xff] }
 0x1cc   : > { %5017 = vst [vmem:[#allocation46_spill] sm:$0xff] %v3272_v12  ;;  %v544_v19 = vsel %vm543_vm3, %v3058_v41, %v542_v7  ;;  %v545_v46 = vsel %vm543_vm3, %v542_v7, %v3058_v41  ;;  %v3302_v12 = vrot.slane %v2383_v20, %v3112_v26  ;;  %v502_v41 = vmul.f32 %v2900_v60, %v493_v37  ;;  %v2381_v37 = vld [vmem:[%s4700_s9 + $0x14] sm:$0x3] }
 0x1cd   : > { %1937 = vperm.xlu1 %2534, %v2443_v58   ;;  %5020 = vst [vmem:[#allocation49_spill] sm:$0xff] %v3299_v34  ;;  %5022 = vst [vmem:[#allocation51_spill] sm:$0xff] %v3308_v9  ;;  %v503_v7 = vmul.f32 %v2900_v60, %v494_v27  ;;  %1905 = vperm.xlu0 %2533, %v2442_v22   ;;  %v3318_v58 = vrot.slane %v2387_v30, %v3110_v25 }
 0x1ce   : > { %5021 = vst [vmem:[#allocation50_spill] sm:$0xff] %v3302_v12  ;;  %v3321_v20 = vrot.slane %v2387_v30, %v3112_v26  ;;  %v471_v60 = vmul.f32 %v2894_v59, %v463_v39  ;;  %v472_v27 = vmul.f32 %v2894_v59, %v464_v50  ;;  %v559_v18 = vmul.f32 %v3200_v16, %v545_v46  ;;  %v2391_v30 = vld [vmem:[%s4700_s9 + $0x1e] sm:$0x3] }
 0x1cf   : > { %5023 = vst [vmem:[#allocation52_spill] sm:$0xff] %v3318_v58  ;;  %v560_v22 = vmul.f32 %v3203_v17, %v544_v19  ;;  %v608_v10 = vpop.permute.xlu1 %607  ;;  %v509_v47 = vpop.permute.xlu0 %508  ;;  %v3351_v16 = vrot.slane %v2381_v37, %v3110_v25  ;;  %v3354_v42 = vrot.slane %v2381_v37, %v3112_v26 }
 0x1d0   : > { %5024 = vst [vmem:[#allocation53_spill] sm:$0xff] %v3321_v20  ;;  %v610_v39 = vsel %vm609_vm4, %v3068_v45, %v608_v10  ;;  %v611_v59 = vsel %vm609_vm4, %v608_v10, %v3068_v45  ;;  %v511_v50 = vsel %vm510_vm5, %v3036_v32, %v509_v47  ;;  %v512_v19 = vsel %vm510_vm5, %v509_v47, %v3036_v32 }
 0x1d1   : > { %v526_v46 = vmul.f32 %v3219_v55, %v512_v19  ;;  %v527_v17 = vmul.f32 %v3240_v13, %v511_v50  ;;  %1974 = vperm.xlu1 %2534, %v2445_v52   ;;  %5025 = vst [vmem:[#allocation54_spill] sm:$0xff] %v3351_v16  ;;  %5026 = vst [vmem:[#allocation55_spill] sm:$0xff] %v3354_v42  ;;  %v504_v10 = vadd.f32 %v502_v41, %v471_v60  ;;  %v2395_v50 = vld [vmem:[%s4700_s9 + $0x22] sm:$0x3] }
 0x1d2   : > { %v505_v45 = vadd.f32 %v503_v7, %v472_v27  ;;  %1942 = vperm.xlu0 %2533, %v2444_v31   ;;  %v3361_v32 = vrot.slane %v2391_v30, %v3110_v25  ;;  %v3364_v47 = vrot.slane %v2391_v30, %v3112_v26  ;;  %v625_v52 = vmul.f32 %v3212_v28, %v611_v59  ;;  %v2446_v27 = vld [vmem:[%s4698_s7 + $0x118] sm:$0xff] }
 0x1d3   : > { %v626_v37 = vmul.f32 %v3215_v23, %v610_v39  ;;  %v535_v41 = vmul.f32 %v2906_v61, %v526_v46  ;;  %v536_v31 = vmul.f32 %v2906_v61, %v527_v17  ;;  %v674_v7 = vpop.permute.xlu1 %673  ;;  %v575_v60 = vpop.permute.xlu0 %574  ;;  %v568_v30 = vmul.f32 %v2912_v62, %v559_v18 }
 0x1d4   : > { %5027 = vst [vmem:[#allocation56_spill] sm:$0xff] %v3361_v32  ;;  %5028 = vst [vmem:[#allocation57_spill] sm:$0xff] %v3364_v47  ;;  %v569_v59 = vmul.f32 %v2912_v62, %v560_v22  ;;  %v577_v39 = vsel %vm576_vm6, %v3046_v36, %v575_v60  ;;  %v578_v61 = vsel %vm576_vm6, %v575_v60, %v3046_v36  ;;  %v2449_v36 = vld [vmem:[%s4698_s7 + $0x130] sm:$0xff] }
 0x1d5   : > { %v537_v17 = vadd.f32 %v535_v41, %v504_v10  ;;  %v538_v19 = vadd.f32 %v536_v31, %v505_v45  ;;  %v676_v46 = vsel %vm675_vm7, %v3078_v49, %v674_v7  ;;  %v677_v62 = vsel %vm675_vm7, %v674_v7, %v3078_v49  ;;  %2011 = vperm.xlu1 %2534, %v2447_v8  }
 0x1d6   : > { %v592_v18 = vmul.f32 %v3259_v51, %v578_v61  ;;  %v593_v22 = vmul.f32 %v3262_v57, %v577_v39  ;;  %1979 = vperm.xlu0 %2533, %v2446_v27   ;;  %v3397_v10 = vrot.slane %v2395_v50, %v3110_v25  ;;  %v3400_v45 = vrot.slane %v2395_v50, %v3112_v26  ;;  %v2448_v27 = vld [vmem:[%s4698_s7 + $0x128] sm:$0xff] }
 0x1d7   : > { %v634_v41 = vmul.f32 %v2920_v0, %v625_v52  ;;  %v635_v49 = vmul.f32 %v2920_v0, %v626_v37  ;;  %v570_v8 = vadd.f32 %v568_v30, %v537_v17  ;;  %v571_v31 = vadd.f32 %v569_v59, %v538_v19  ;;  %v740_v7 = vpop.permute.xlu1 %739  ;;  %v641_v60 = vpop.permute.xlu0 %640  ;;  %v2389_v0 = vld [vmem:[%s4700_s9 + $0x1c] sm:$0x3]  ;;  %v2399_v37 = vld [vmem:[%s4700_s9 + $0x26] sm:$0x3] }
 0x1d8   : > { %5029 = vst [vmem:[#allocation58_spill] sm:$0xff] %v3397_v10  ;;  %5030 = vst [vmem:[#allocation59_spill] sm:$0xff] %v3400_v45  ;;  %v691_v39 = vmul.f32 %v3243_v29, %v677_v62  ;;  %v692_v61 = vmul.f32 %v3246_v33, %v676_v46  ;;  %v601_v50 = vmul.f32 %v2914_v63, %v592_v18 }
 0x1d9   : > { %v602_v52 = vmul.f32 %v2914_v63, %v593_v22  ;;  %v742_v30 = vsel %vm741_vm8, %v3088_v54, %v740_v7  ;;  %v743_v59 = vsel %vm741_vm8, %v740_v7, %v3088_v54  ;;  %v643_v63 = vsel %vm642_vm9, %v3056_v40, %v641_v60  ;;  %2048 = vperm.xlu1 %2534, %v2449_v36   ;;  %v2452_v54 = vld [vmem:[%s4698_s7 + $0x148] sm:$0xff] }
 0x1da   : > { %v644_v17 = vsel %vm642_vm9, %v641_v60, %v3056_v40  ;;  %v603_v19 = vadd.f32 %v601_v50, %v570_v8  ;;  %v659_v18 = vmul.f32 %v3296_v43, %v643_v63  ;;  %2016 = vperm.xlu0 %2533, %v2448_v27   ;;  %v2450_v40 = vld [vmem:[%s4698_s7 + $0x138] sm:$0xff]  ;;  %v3441_v36 = vrot.slane %v2389_v0, %v3110_v25 }
 0x1db   : > { %v604_v46 = vadd.f32 %v602_v52, %v571_v31  ;;  %v658_v62 = vmul.f32 %v3293_v38, %v644_v17  ;;  %v806_v22 = vpop.permute.xlu1 %805  ;;  %v707_v7 = vpop.permute.xlu0 %706  ;;  %v3444_v8 = vrot.slane %v2389_v0, %v3112_v26  ;;  %v3447_v31 = vrot.slane %v2399_v37, %v3110_v25 }
 0x1dc   : > { %5031 = vst [vmem:[#allocation60_spill] sm:$0xff] %v3441_v36  ;;  %v3450_v60 = vrot.slane %v2399_v37, %v3112_v26  ;;  %v636_v27 = vadd.f32 %v634_v41, %v603_v19  ;;  %v668_v63 = vmul.f32 %v2926_v1, %v659_v18  ;;  %v757_v17 = vmul.f32 %v3278_v21, %v743_v59  ;;  %v2393_v41 = vld [vmem:[%s4700_s9 + $0x20] sm:$0x3] }
 0x1dd   : > { %5032 = vst [vmem:[#allocation61_spill] sm:$0xff] %v3444_v8  ;;  %5033 = vst [vmem:[#allocation62_spill] sm:$0xff] %v3447_v31  ;;  %v637_v50 = vadd.f32 %v635_v49, %v604_v46  ;;  %v667_v52 = vmul.f32 %v2926_v1, %v658_v62  ;;  %v758_v33 = vmul.f32 %v3281_v11, %v742_v30  ;;  %2090 = vperm.xlu1 %2534, %v2452_v54   ;;  %v2454_v30 = vld [vmem:[%s4698_s7 + $0x158] sm:$0xff]  ;;  %v2451_v62 = vld [vmem:[%s4698_s7 + $0x140] sm:$0xff] }
 0x1de   : > { %5034 = vst [vmem:[#allocation63_spill] sm:$0xff] %v3450_v60  ;;  %v709_v0 = vsel %vm708_vm10, %v3066_v44, %v707_v7  ;;  %v710_v29 = vsel %vm708_vm10, %v707_v7, %v3066_v44  ;;  %v700_v49 = vmul.f32 %v2932_v2, %v691_v39  ;;  %v701_v1 = vmul.f32 %v2932_v2, %v692_v61  ;;  %v5152_v11 = vld [vmem:[#allocation37_spill] sm:$0xff] }
 0x1df   : > { %v669_v37 = vadd.f32 %v667_v52, %v636_v27  ;;  %v670_v59 = vadd.f32 %v668_v63, %v637_v50  ;;  %2053 = vperm.xlu0 %2533, %v2450_v40   ;;  %v808_v44 = vsel %vm4803_vm11, %v3098_v15, %v806_v22  ;;  %v809_v19 = vsel %vm4803_vm11, %v806_v22, %v3098_v15  ;;  %v865_v2 = vpop.permute.xlu1 %864  ;;  %v773_v61 = vpop.permute.xlu0 %772  ;;  %v2403_v50 = vld [vmem:[%s4700_s9 + $0x2a] sm:$0x3] }
 0x1e0   : > { %v724_v46 = vmul.f32 %v3305_v14, %v710_v29  ;;  %v725_v39 = vmul.f32 %v3308_v9, %v709_v0  ;;  %v3483_v7 = vrot.slane %v2393_v41, %v3110_v25  ;;  %v3486_v40 = vrot.slane %v2393_v41, %v3112_v26 }
 0x1e1   : > { %v702_v18 = vadd.f32 %v700_v49, %v669_v37  ;;  %v703_v54 = vadd.f32 %v701_v1, %v670_v59  ;;  %v766_v29 = vmul.f32 %v2940_v4, %v757_v17  ;;  %v767_v15 = vmul.f32 %v2940_v4, %v758_v33  ;;  %2127 = vperm.xlu1 %2534, %v2454_v30   ;;  %v2453_v59 = vld [vmem:[%s4698_s7 + $0x150] sm:$0xff] }
 0x1e2   : > { %5035 = vst [vmem:[#allocation64_spill] sm:$0xff] %v3483_v7  ;;  %5036 = vst [vmem:[#allocation65_spill] sm:$0xff] %v3486_v40  ;;  %v733_v22 = vmul.f32 %v2934_v3, %v724_v46  ;;  %v734_v27 = vmul.f32 %v2934_v3, %v725_v39  ;;  %v823_v52 = vmul.f32 %v3299_v34, %v809_v19  ;;  %v2455_v3 = vld [vmem:[%s4698_s7 + $0x160] sm:$0xff]  ;;  %vm4817_vm11 = vcmp.lt.s32.totalorder %v3147_v56, 113 }
 0x1e3   : > { %v824_v63 = vmul.f32 %v3302_v12, %v808_v44  ;;  %v775_v17 = vsel %vm4804_vm12, %v3076_v48, %v773_v61  ;;  %v776_v4 = vsel %vm4804_vm12, %v773_v61, %v3076_v48  ;;  %2085 = vperm.xlu0 %2533, %v2451_v62   ;;  %v931_v1 = vpop.permute.xlu1 %930  ;;  %v3509_v37 = vpop.permute.xlu0 %1225  ;;  %v867_v48 = vsel %vm4805_vm13, %v3108_v24, %v865_v2 }
 0x1e4   : > { %v735_v33 = vadd.f32 %v733_v22, %v702_v18  ;;  %v736_v0 = vadd.f32 %v734_v27, %v703_v54  ;;  %v790_v41 = vmul.f32 %v3351_v16, %v776_v4  ;;  %v791_v49 = vmul.f32 %v3354_v42, %v775_v17  ;;  %v2397_v18 = vld [vmem:[%s4700_s9 + $0x24] sm:$0x3]  ;;  %v2456_v17 = vld [vmem:[%s4698_s7 + $0x168] sm:$0xff] }
 0x1e5   : > { %v868_v30 = vsel %vm4805_vm13, %v865_v2, %v3108_v24  ;;  %v3522_v44 = vrot.slane %v2403_v50, %v3110_v25  ;;  %v3525_v19 = vrot.slane %v2403_v50, %v3112_v26  ;;  %2159 = vperm.xlu1 %2534, %v2455_v3   ;;  %vm4818_vm12 = vcmp.lt.s32.totalorder %v3147_v56, 110  ;;  %v2407_v24 = vld [vmem:[%s4700_s9 + $0x2e] sm:$0x3] }
 0x1e6   : > { %v768_v46 = vadd.f32 %v766_v29, %v735_v33  ;;  %v769_v39 = vadd.f32 %v767_v15, %v736_v0  ;;  %v799_v61 = vmul.f32 %v2946_v5, %v790_v41  ;;  %v800_v62 = vmul.f32 %v2946_v5, %v791_v49  ;;  %v2457_v15 = vld [vmem:[%s4698_s7 + $0x170] sm:$0xff] }
 0x1e7   : > { %5037 = vst [vmem:[#allocation66_spill] sm:$0xff] %v3522_v44  ;;  %5038 = vst [vmem:[#allocation67_spill] sm:$0xff] %v3525_v19  ;;  %v832_v2 = vmul.f32 %v2952_v6, %v823_v52  ;;  %v833_v54 = vmul.f32 %v2952_v6, %v824_v63  ;;  %v933_v29 = vsel %vm4806_vm14, %v3125_v35, %v931_v1  ;;  %2122 = vperm.xlu0 %2533, %v2453_v59   ;;  %v997_v6 = vpop.permute.xlu1 %996  ;;  %v898_v63 = vpop.permute.xlu0 %897 }
 0x1e8   : > { %v934_v5 = vsel %vm4806_vm14, %v931_v1, %v3125_v35  ;;  %v882_v22 = vmul.f32 %v3318_v58, %v867_v48  ;;  %v883_v27 = vmul.f32 %v3321_v20, %v868_v30  ;;  %v801_v50 = vadd.f32 %v799_v61, %v768_v46  ;;  %v2401_v35 = vld [vmem:[%s4700_s9 + $0x28] sm:$0x3]  ;;  %v2459_v46 = vld [vmem:[%s4698_s7 + $0x180] sm:$0xff]  ;;  %v5051_v20 = vld [vmem:[#allocation27_spill] sm:$0xff] }
 0x1e9   : > { %v802_v52 = vadd.f32 %v800_v62, %v769_v39  ;;  %vm1031_vm13 = vcmp.lt.s32.totalorder %v3147_v56, 111  ;;  %v3557_v4 = vrot.slane %v2397_v18, %v3110_v25  ;;  %v3560_v3 = vrot.slane %v2397_v18, %v3112_v26  ;;  %2196 = vperm.xlu1 %2534, %v2457_v15   ;;  %v5045_v62 = vld [vmem:[#allocation15_spill] sm:$0xff] }
 0x1ea   : > { %v3563_v33 = vrot.slane %v2407_v24, %v3110_v25  ;;  %v3566_v0 = vrot.slane %v2407_v24, %v3112_v26  ;;  %v834_v41 = vadd.f32 %v832_v2, %v801_v50  ;;  %v948_v1 = vmul.f32 %v3361_v32, %v933_v29  ;;  %v5046_v2 = vld [vmem:[#allocation36_spill] sm:$0xff] }
 0x1eb   : > { %5039 = vst [vmem:[#allocation68_spill] sm:$0xff] %v3557_v4  ;;  %5040 = vst [vmem:[#allocation69_spill] sm:$0xff] %v3560_v3  ;;  %v835_v49 = vadd.f32 %v833_v54, %v802_v52  ;;  %v949_v59 = vmul.f32 %v3364_v47, %v934_v5  ;;  %v900_v48 = vsel %vm4807_vm15, %v3086_v53, %v898_v63  ;;  %2164 = vperm.xlu0 %2533, %v2456_v17   ;;  %v1063_v5 = vpop.permute.xlu1 %1062  ;;  %v964_v15 = vpop.permute.xlu0 %963  ;;  %v2458_v50 = vld [vmem:[%s4698_s7 + $0x178] sm:$0xff]  ;;  %v5048_v52 = vld [vmem:[#allocation33_spill] sm:$0xff] }
 0x1ec   : > { %5041 = vst [vmem:[#allocation70_spill] sm:$0xff] %v3563_v33  ;;  %5042 = vst [vmem:[#allocation71_spill] sm:$0xff] %v3566_v0  ;;  %v901_v30 = vsel %vm4807_vm15, %v898_v63, %v3086_v53  ;;  %vm1130_vm14 = vcmp.lt.s32.totalorder %v3147_v56, 97  ;;  %v3581_v39 = vrot.slane %v2401_v35, %v3110_v25  ;;  %v3584_v61 = vrot.slane %v2401_v35, %v3112_v26  ;;  %v5047_v53 = vld [vmem:[#allocation35_spill] sm:$0xff]  ;;  %v5049_v35 = vld [vmem:[#allocation17_spill] sm:$0xff] }
 0x1ed   : > { %v891_v18 = vmul.f32 %v5045_v62, %v882_v22  ;;  %v892_v24 = vmul.f32 %v5045_v62, %v883_v27  ;;  %v861_v54 = vadd.f32 %v5046_v2, %v835_v49  ;;  %v860_v29 = vadd.f32 %v5047_v53, %v834_v41  ;;  %2233 = vperm.xlu1 %2534, %v2459_v46   ;;  %v5050_v53 = vld [vmem:[#allocation16_spill] sm:$0xff] }
 0x1ee   : > { %5043 = vst [vmem:[#allocation72_spill] sm:$0xff] %v3581_v39  ;;  %5044 = vst [vmem:[#allocation73_spill] sm:$0xff] %v3584_v61  ;;  %vm1097_vm15 = vcmp.lt.s32.totalorder %v3147_v56, 98  ;;  %v999_v63 = vsel %vm4816_vm0, %v5048_v52, %v997_v6  ;;  %v1000_v22 = vsel %vm4816_vm0, %v997_v6, %v5048_v52  ;;  %v915_v27 = vmul.f32 %v3441_v36, %v900_v48  ;;  %v5053_v52 = vld [vmem:[#allocation18_spill] sm:$0xff] }
 0x1ef   : > { %v916_v17 = vmul.f32 %v3444_v8, %v901_v30  ;;  %v957_v41 = vmul.f32 %v5049_v35, %v948_v1  ;;  %v958_v49 = vmul.f32 %v5049_v35, %v949_v59  ;;  %v894_v62 = vadd.f32 %v892_v24, %v861_v54  ;;  %2201 = vperm.xlu0 %2533, %v2458_v50   ;;  %v2405_v1 = vld [vmem:[%s4700_s9 + $0x2c] sm:$0x3]  ;;  %v1030_v24 = vpop.permute.xlu0 %1029  ;;  %v5056_v35 = vld [vmem:[#allocation28_spill] sm:$0xff] }
 0x1f0   : > { %v893_v2 = vadd.f32 %v891_v18, %v860_v29  ;;  %v924_v47 = vmul.f32 %v5050_v53, %v915_v27  ;;  %v966_v58 = vsel %vm4817_vm11, %v5051_v20, %v964_v15  ;;  %v967_v6 = vsel %vm4817_vm11, %v964_v15, %v5051_v20  ;;  %v1129_v18 = vpop.permute.xlu1 %1128  ;;  %v2460_v20 = vld [vmem:[%s4698_s7 + $0x188] sm:$0xff] }
 0x1f1   : > { %v925_v32 = vmul.f32 %v5050_v53, %v916_v17  ;;  %vm1196_vm0 = vcmp.lt.s32.totalorder %v3147_v56, 95  ;;  %v1014_v59 = vmul.f32 %v3397_v10, %v999_v63  ;;  %v1015_v48 = vmul.f32 %v3400_v45, %v1000_v22  ;;  %v5052_v15 = vld [vmem:[#allocation34_spill] sm:$0xff] }
 0x1f2   : > { %v981_v30 = vmul.f32 %v3483_v7, %v966_v58  ;;  %v982_v46 = vmul.f32 %v3486_v40, %v967_v6  ;;  %vm1163_vm11 = vcmp.lt.s32.totalorder %v3147_v56, 96  ;;  %v926_v54 = vadd.f32 %v924_v47, %v893_v2 }
 0x1f3   : > { %v927_v29 = vadd.f32 %v925_v32, %v894_v62  ;;  %v1065_v50 = vsel %vm4818_vm12, %v5052_v15, %v1063_v5  ;;  %v1066_v58 = vsel %vm4818_vm12, %v1063_v5, %v5052_v15  ;;  %v3633_v27 = vrot.slane %v2405_v1, %v3110_v25  ;;  %2238 = vperm.xlu0 %2533, %v2460_v20   ;;  %v5058_v15 = vld [vmem:[#allocation43_spill] sm:$0xff] }
 0x1f4   : > { %v990_v63 = vmul.f32 %v5053_v52, %v981_v30  ;;  %v991_v22 = vmul.f32 %v5053_v52, %v982_v46  ;;  %v3636_v17 = vrot.slane %v2405_v1, %v3112_v26  ;;  %v959_v32 = vadd.f32 %v957_v41, %v926_v54  ;;  %v1096_v30 = vpop.permute.xlu0 %1095  ;;  %v5057_v41 = vld [vmem:[#allocation19_spill] sm:$0xff] }
 0x1f5   : > { %5054 = vst [vmem:[#allocation15_spill] sm:$0xff] %v3633_v27  ;;  %v960_v47 = vadd.f32 %v958_v49, %v927_v29  ;;  %v1032_v62 = vsel %vm1031_vm13, %v5056_v35, %v1030_v24  ;;  %v1033_v5 = vsel %vm1031_vm13, %v1030_v24, %v5056_v35  ;;  %v1080_v2 = vmul.f32 %v3447_v31, %v1065_v50  ;;  %v5059_v50 = vld [vmem:[#allocation20_spill] sm:$0xff]  ;;  %v1195_v35 = vpop.permute.xlu1 %1194 }
 0x1f6   : > { %5055 = vst [vmem:[#allocation36_spill] sm:$0xff] %v3636_v17  ;;  %v1081_v53 = vmul.f32 %v3450_v60, %v1066_v58  ;;  %v1047_v6 = vmul.f32 %v3557_v4, %v1032_v62  ;;  %v1048_v1 = vmul.f32 %v3560_v3, %v1033_v5  ;;  %vm4819_vm12 = vcmp.lt.s32.totalorder %v3147_v56, 94 }
 0x1f7   : > { %v1023_v49 = vmul.f32 %v5057_v41, %v1014_v59  ;;  %v1024_v46 = vmul.f32 %v5057_v41, %v1015_v48  ;;  %v992_v54 = vadd.f32 %v990_v63, %v959_v32  ;;  %v993_v29 = vadd.f32 %v991_v22, %v960_v47  ;;  %v5060_v59 = vld [vmem:[#allocation29_spill] sm:$0xff] }
 0x1f8   : > { %v1131_v24 = vsel %vm1130_vm14, %v5058_v15, %v1129_v18  ;;  %v1132_v20 = vsel %vm1130_vm14, %v1129_v18, %v5058_v15  ;;  %v1056_v58 = vmul.f32 %v5059_v50, %v1047_v6  ;;  %v1057_v52 = vmul.f32 %v5059_v50, %v1048_v1  ;;  %v5061_v22 = vld [vmem:[#allocation21_spill] sm:$0xff]  ;;  %v1162_v1 = vpop.permute.xlu0 %1161  ;;  %v5063_v15 = vld [vmem:[#allocation22_spill] sm:$0xff] }
 0x1f9   : > { %v1026_v62 = vadd.f32 %v1024_v46, %v993_v29  ;;  %v1025_v5 = vadd.f32 %v1023_v49, %v992_v54  ;;  %v1098_v48 = vsel %vm1097_vm15, %v5060_v59, %v1096_v30  ;;  %v1099_v63 = vsel %vm1097_vm15, %v1096_v30, %v5060_v59  ;;  %v2409_v29 = vld [vmem:[%s4700_s9 + $0x30] sm:$0x3]  ;;  %v5062_v30 = vld [vmem:[#allocation46_spill] sm:$0xff] }
 0x1fa   : > { %v1089_v47 = vmul.f32 %v5061_v22, %v1080_v2  ;;  %v1090_v32 = vmul.f32 %v5061_v22, %v1081_v53  ;;  %v1113_v18 = vmul.f32 %v3581_v39, %v1098_v48  ;;  %v1114_v6 = vmul.f32 %v3584_v61, %v1099_v63 }
 0x1fb   : > { %v1146_v41 = vmul.f32 %v3522_v44, %v1131_v24  ;;  %v1147_v49 = vmul.f32 %v3525_v19, %v1132_v20  ;;  %v1058_v46 = vadd.f32 %v1056_v58, %v1025_v5  ;;  %v1059_v54 = vadd.f32 %v1057_v52, %v1026_v62  ;;  %v5064_v58 = vld [vmem:[#allocation32_spill] sm:$0xff] }
 0x1fc   : > { %v1197_v2 = vsel %vm1196_vm0, %v5062_v30, %v1195_v35  ;;  %v1198_v53 = vsel %vm1196_vm0, %v1195_v35, %v5062_v30  ;;  %v1122_v50 = vmul.f32 %v5063_v15, %v1113_v18  ;;  %v1123_v24 = vmul.f32 %v5063_v15, %v1114_v6  ;;  %v1228_v35 = vpop.permute.xlu1 %1227 }
 0x1fd   : > { %v1092_v59 = vadd.f32 %v1090_v32, %v1059_v54  ;;  %v1091_v20 = vadd.f32 %v1089_v47, %v1058_v46  ;;  %v1164_v52 = vsel %vm1163_vm11, %v5064_v58, %v1162_v1  ;;  %v1165_v62 = vsel %vm1163_vm11, %v1162_v1, %v5064_v58  ;;  %v5067_v47 = vld [vmem:[#allocation23_spill] sm:$0xff] }
 0x1fe   : > { %v3689_v5 = vrot.slane %v2409_v29, %v3110_v25  ;;  %v3692_v48 = vrot.slane %v2409_v29, %v3112_v26  ;;  %v1179_v63 = vmul.f32 %v3633_v27, %v1164_v52  ;;  %v1180_v22 = vmul.f32 %v3636_v17, %v1165_v62  ;;  %v5068_v25 = vld [vmem:[#allocation24_spill] sm:$0xff] }
 0x1ff   : > { %v1155_v32 = vmul.f32 %v5067_v47, %v1146_v41  ;;  %v1156_v18 = vmul.f32 %v5067_v47, %v1147_v49  ;;  %v1124_v6 = vadd.f32 %v1122_v50, %v1091_v20  ;;  %v1125_v46 = vadd.f32 %v1123_v24, %v1092_v59  ;;  %v5069_v59 = vld [vmem:[#allocation25_spill] sm:$0xff] }
 0x200   : > { %5065 = vst [vmem:[#allocation35_spill] sm:$0xff] %v3689_v5  ;;  %5066 = vst [vmem:[#allocation33_spill] sm:$0xff] %v3692_v48  ;;  %v1212_v54 = vmul.f32 %v3563_v33, %v1197_v2  ;;  %v1213_v1 = vmul.f32 %v3566_v0, %v1198_v53  ;;  %v1188_v30 = vmul.f32 %v5068_v25, %v1179_v63  ;;  %v5070_v63 = vld [vmem:[#allocation26_spill] sm:$0xff] }
 0x201   : > { %v1189_v26 = vmul.f32 %v5068_v25, %v1180_v22  ;;  %v1230_v29 = vsel %vm4819_vm12, %v3509_v37, %v1228_v35  ;;  %v1231_v41 = vsel %vm4819_vm12, %v1228_v35, %v3509_v37  ;;  %v1158_v15 = vadd.f32 %v1156_v18, %v1125_v46 }
 0x202   : > { %v1157_v49 = vadd.f32 %v1155_v32, %v1124_v6  ;;  %v1221_v2 = vmul.f32 %v5069_v59, %v1212_v54  ;;  %v1222_v53 = vmul.f32 %v5069_v59, %v1213_v1  ;;  %v1245_v20 = vmul.f32 %v3689_v5, %v1230_v29  ;;  %v5071_v59 = vld [vmem:[#allocation13_spill] sm:$0xff] }
 0x203   : > { %v1191_v24 = vadd.f32 %v1189_v26, %v1158_v15  ;;  %v1246_v58 = vmul.f32 %v3692_v48, %v1231_v41  ;;  %vm1294_vm12 = vcmask 130048  }
 0x204   : > { %v1190_v50 = vadd.f32 %v1188_v30, %v1157_v49  ;;  %v1254_v22 = vmul.f32 %v5070_v63, %v1245_v20 }
 0x205   : > { %v1224_v52 = vadd.f32 %v1222_v53, %v1191_v24  ;;  %v1255_v47 = vmul.f32 %v5070_v63, %v1246_v58  ;;  %v5072_v53 = vld [vmem:[#allocation14_spill] sm:$0xff]  ;;  %v2535_v58 = vld [vmem:[%s4696_s5] sm:$0xff]  }
 0x206   : > { %v1223_v62 = vadd.f32 %v1221_v2, %v1190_v50 }
 0x207   : > { %v1257_v25 = vadd.f32 %v1255_v47, %v1224_v52 }
 0x208   : > { %v1256_v37 = vadd.f32 %v1254_v22, %v1223_v62  ;;  %v1261_v35 = vpop.permute.xlu0 %1260  ;;  %v1282_v52 = vpop.permute.xlu1 %1281 }
 0x209   : > { %v1264_v18 = vadd.f32 %v1261_v35, %v1257_v25 }
 0x20a   : > { %v1263_v32 = vadd.f32 %v1261_v35, %v1256_v37 }
 0x20b   : > { %v1266_v46 = vsub.f32 0.0, %v1264_v18 }
 0x20c   : > { %v1265_v6 = vsub.f32 0.0, %v1263_v32  ;;  %v1287_v62 = vpop.permute.xlu0 %1286  ;;  %v3719_v63 = vpop.permute.xlu1 %1361 }
 0x20d   : > { %v1269_v30 = vmul.f32 1.442695, %v1266_v46 }
 0x20e   : > { %v1267_v54 = vmul.f32 1.442695, %v1265_v6 }
 0x210   : > { %2544 = vpow2.f32 %v1267_v54  ;;  %v3721_v22 = vpop.permute.xlu0 %1366  ;;  %v3723_v47 = vpop.permute.xlu1 %1394 }
 0x211   : > { %2546 = vpow2.f32 %v1269_v30 }
 0x214   : > { %v3725_v25 = vpop.permute.xlu0 %1399  ;;  %v3727_v37 = vpop.permute.xlu1 %1431 }
 0x218   : > { %v3729_v35 = vpop.permute.xlu0 %1436 }
 0x21a   : > { %v2545_v1 = vpop.eup %2544 }
 0x21b   : > { %v2547_v26 = vpop.eup %2546  ;;  %v1271_v29 = vadd.f32 1.0, %v2545_v1 }
 0x21c   : > { %v1272_v41 = vadd.f32 1.0, %v2547_v26 }
 0x21d   : > { %2548 = vrcp.f32 %v1271_v29 }
 0x21e   : > { %2550 = vrcp.f32 %v1272_v41 }
 0x227   : > { %v2549_v15 = vpop.eup %2548 }
 0x228   : > { %v2551_v49 = vpop.eup %2550  ;;  %v1275_v50 = vmul.f32 %v2549_v15, %v1263_v32  ;;  %v3731_v32 = vpop.permute.xlu1 %1468 }
 0x229   : > { %v1276_v24 = vmul.f32 %v2551_v49, %v1264_v18  ;;  %v3733_v18 = vpop.permute.xlu0 %1473 }
 0x22a   : > { %v1277_v2 = vpack.c.bf16 %v1275_v50, %v5071_v59 }
 0x22b   : > { %v1278_v20 = vpack.c.bf16 %v1276_v24, %v5072_v53  ;;  %v2552_v24 = vld [vmem:[%s2765_s18] sm:$0xff]  ;;  %v2553_v53 = vld [vmem:[%s2765_s18 + $0x8] sm:$0xff] }
 0x22c   : > { %v3735_v6 = vpop.permute.xlu1 %1505 }
 0x22d   : > { %1298 = vmatprep.subr.bf16.mxu1 %v1278_v20  ;;  %v3737_v46 = vpop.permute.xlu0 %1510 }
 0x22e   : > { %1299 = vmatpush1.bf16.msra.mxu1 %v1277_v2 }
 0x230   : > { %v3740_v54 = vpop.permute.xlu1 %1542 }
 0x231   : > { %2412 = vmatmul.mubr.msk.bf16.vlgmr.msra.gmra.mrb[0].mxu1 %vm1294_vm12, %v2535_v58  ;;  %v3744_v1 = vpop.permute.xlu0 %1547 }
 0x234   : > { %v3760_v58 = vpop.permute.xlu1 %1579 }
 0x304   : > { %v1332_v30 = vpop.f32.mrb[0].mxu1 }
 0x305   : > { %v3746_v26 = vadd.f32 %v1332_v30, %v1282_v52  ;;  %v1334_v29 = vpop.f32.mrb[1].mxu1 }
 0x306   : > { %v3748_v41 = vadd.f32 %v1334_v29, %v1282_v52  ;;  %v1336_v15 = vpop.f32.mrb[2].mxu1  ;;  %v2554_v52 = vld [vmem:[%s2765_s18 + $0x10] sm:$0xff] }
 0x307   : > { %5073 = vst [vmem:[#allocation17_spill] sm:$0xff] %v3746_v26  ;;  %v3750_v49 = vadd.f32 %v1336_v15, %v1287_v62  ;;  %v1338_v50 = vpop.f32.mrb[3].mxu1  ;;  %1341 = vrot.lane.b32.xlu1 %v3746_v26, %s5076_s0  ;;  %v2263_v59 = vadd.f32 %v2552_v24, %v3746_v26  ;;  %v3772_v15 = vpop.permute.xlu0 %1584 }
 0x308   : > { %5074 = vst [vmem:[#allocation16_spill] sm:$0xff] %v3748_v41  ;;  %v3756_v2 = vadd.f32 %v1338_v50, %v1287_v62  ;;  %v2264_v20 = vadd.f32 %v2553_v53, %v3748_v41  ;;  %v2555_v62 = vld [vmem:[%s2765_s18 + $0x18] sm:$0xff]  ;;  %v3780_v50 = vpop.permute.xlu1 %1616 }
 0x309   : > { %5075 = vst [vmem:[#allocation27_spill] sm:$0xff] %v3750_v49  ;;  %1343 = vrot.lane.b32.xlu0 %v3750_v49, %s5076_s0  ;;  %v2265_v30 = vadd.f32 %v2554_v52, %v3750_v49  ;;  %2271 = vst [vmem:[%s3766_s8] sm:$0xff] %v2263_v59 }
 0x30a   : > { %5077 = vst [vmem:[#allocation34_spill] sm:$0xff] %v3756_v2  ;;  %v2266_v29 = vadd.f32 %v2555_v62, %v3756_v2  ;;  %2272 = vst [vmem:[%s3766_s8 + $0x8] sm:$0xff] %v2264_v20 }
 0x30b   : > { %1373 = vrot.lane.b32.xlu1 %v3746_v26, %s5078_s17  ;;  %2273 = vst [vmem:[%s3766_s8 + $0x10] sm:$0xff] %v2265_v30  ;;  %v3784_v24 = vpop.permute.xlu0 %1621 }
 0x30c   : > { %2274 = vst [vmem:[%s3766_s8 + $0x18] sm:$0xff] %v2266_v29  ;;  %v3790_v59 = vpop.permute.xlu1 %1653 }
 0x30d   : > { %1375 = vrot.lane.b32.xlu0 %v3750_v49, %s5078_s17  ;;  %5080 = vst [vmem:[#allocation18_spill] sm:$0xff] %v3790_v59 }
 0x30f   : > { %1410 = vrot.lane.b32.xlu1 %v3746_v26, %s4966_s26  ;;  %v3794_v53 = vpop.permute.xlu0 %1658 }
 0x310   : > { %5081 = vst [vmem:[#allocation28_spill] sm:$0xff] %v3794_v53  ;;  %v3800_v20 = vpop.permute.xlu1 %1690 }
 0x311   : > { %1412 = vrot.lane.b32.xlu0 %v3750_v49, %s4966_s26  ;;  %5082 = vst [vmem:[#allocation19_spill] sm:$0xff] %v3800_v20 }
 0x313   : > { %1447 = vrot.lane.b32.xlu1 %v3746_v26, %s5079_s22  ;;  %v3804_v52 = vpop.permute.xlu0 %1695 }
 0x314   : > { %5084 = vst [vmem:[#allocation43_spill] sm:$0xff] %v3804_v52  ;;  %v3810_v30 = vpop.permute.xlu1 %1727 }
 0x315   : > { %1449 = vrot.lane.b32.xlu0 %v3750_v49, %s5079_s22  ;;  %5085 = vst [vmem:[#allocation20_spill] sm:$0xff] %v3810_v30 }
 0x317   : > { %1484 = vrot.lane.b32.xlu1 %v3746_v26, %s4968_s28  ;;  %v3814_v62 = vpop.permute.xlu0 %1732 }
 0x318   : > { %5086 = vst [vmem:[#allocation29_spill] sm:$0xff] %v3814_v62  ;;  %v3820_v29 = vpop.permute.xlu1 %1764 }
 0x319   : > { %1486 = vrot.lane.b32.xlu0 %v3750_v49, %s4968_s28  ;;  %5087 = vst [vmem:[#allocation21_spill] sm:$0xff] %v3820_v29 }
 0x31b   : > { %1521 = vrot.lane.b32.xlu1 %v3746_v26, %s5083_s13  ;;  %v3824_v48 = vpop.permute.xlu0 %1769 }
 0x31c   : > { %5088 = vst [vmem:[#allocation46_spill] sm:$0xff] %v3824_v48  ;;  %v3830_v5 = vpop.permute.xlu1 %1789 }
 0x31d   : > { %1523 = vrot.lane.b32.xlu0 %v3750_v49, %s5083_s13  ;;  %5089 = vst [vmem:[#allocation22_spill] sm:$0xff] %v3830_v5 }
 0x31f   : > { %1558 = vrot.lane.b32.xlu1 %v3746_v26, %s4970_s29  ;;  %v3834_v0 = vpop.permute.xlu0 %1794 }
 0x320   : > { %5090 = vst [vmem:[#allocation32_spill] sm:$0xff] %v3834_v0  ;;  %v3840_v33 = vpop.permute.xlu1 %1826 }
 0x321   : > { %1560 = vrot.lane.b32.xlu0 %v3750_v49, %s4970_s29  ;;  %5091 = vst [vmem:[#allocation23_spill] sm:$0xff] %v3840_v33 }
 0x323   : > { %1595 = vrot.lane.b32.xlu1 %v3746_v26, %s4967_s21  ;;  %v3844_v17 = vpop.permute.xlu0 %1831 }
 0x324   : > { %5092 = vst [vmem:[#allocation24_spill] sm:$0xff] %v3844_v17  ;;  %v3850_v27 = vpop.permute.xlu1 %1863 }
 0x325   : > { %1597 = vrot.lane.b32.xlu0 %v3750_v49, %s4967_s21  ;;  %5094 = vst [vmem:[#allocation25_spill] sm:$0xff] %v3850_v27 }
 0x327   : > { %1632 = vrot.lane.b32.xlu1 %v3746_v26, %s4972_s27  ;;  %v3854_v19 = vpop.permute.xlu0 %1868 }
 0x328   : > { %5095 = vst [vmem:[#allocation26_spill] sm:$0xff] %v3854_v19  ;;  %v3860_v44 = vpop.permute.xlu1 %1900 }
 0x329   : > { %1634 = vrot.lane.b32.xlu0 %v3750_v49, %s4972_s27  ;;  %5096 = vst [vmem:[#allocation13_spill] sm:$0xff] %v3860_v44 }
 0x32b   : > { %1669 = vrot.lane.b32.xlu1 %v3746_v26, %s4969_s11  ;;  %v3864_v61 = vpop.permute.xlu0 %1905 }
 0x32c   : > { %5098 = vst [vmem:[#allocation14_spill] sm:$0xff] %v3864_v61  ;;  %v3870_v39 = vpop.permute.xlu1 %1937 }
 0x32d   : > { %1671 = vrot.lane.b32.xlu0 %v3750_v49, %s4969_s11  ;;  %5099 = vst [vmem:[#allocation74_spill] sm:$0xff] %v3870_v39 }
 0x32f   : > { %1706 = vrot.lane.b32.xlu1 %v3746_v26, %s4973_s20  ;;  %v3874_v60 = vpop.permute.xlu0 %1942 }
 0x330   : > { %5100 = vst [vmem:[#allocation75_spill] sm:$0xff] %v3874_v60  ;;  %v3880_v31 = vpop.permute.xlu1 %1974 }
 0x331   : > { %1708 = vrot.lane.b32.xlu0 %v3750_v49, %s4973_s20  ;;  %5101 = vst [vmem:[#allocation76_spill] sm:$0xff] %v3880_v31 }
 0x333   : > { %1743 = vrot.lane.b32.xlu1 %v3746_v26, %s4971_s30  ;;  %v3884_v3 = vpop.permute.xlu0 %1979 }
 0x334   : > { %5102 = vst [vmem:[#allocation77_spill] sm:$0xff] %v3884_v3  ;;  %v3890_v4 = vpop.permute.xlu1 %2011 }
 0x335   : > { %1745 = vrot.lane.b32.xlu0 %v3750_v49, %s4971_s30  ;;  %5103 = vst [vmem:[#allocation78_spill] sm:$0xff] %v3890_v4 }
 0x337   : > { %1805 = vrot.lane.b32.xlu1 %v3746_v26, %s5093_s16  ;;  %v3894_v60 = vpop.permute.xlu0 %2016 }
 0x338   : > { %5104 = vst [vmem:[#allocation79_spill] sm:$0xff] %v3894_v60  ;;  %v3900_v3 = vpop.permute.xlu1 %2048 }
 0x339   : > { %1807 = vrot.lane.b32.xlu0 %v3750_v49, %s5093_s16  ;;  %5105 = vst [vmem:[#allocation80_spill] sm:$0xff] %v3900_v3 }
 0x33b   : > { %1842 = vrot.lane.b32.xlu1 %v3746_v26, %s4975_s12  ;;  %v3904_v31 = vpop.permute.xlu0 %2053 }
 0x33c   : > { %5107 = vst [vmem:[#allocation81_spill] sm:$0xff] %v3904_v31  ;;  %v3910_v60 = vpop.permute.xlu1 %2090 }
 0x33d   : > { %1844 = vrot.lane.b32.xlu0 %v3750_v49, %s4975_s12  ;;  %5108 = vst [vmem:[#allocation82_spill] sm:$0xff] %v3910_v60 }
 0x33f   : > { %1879 = vrot.lane.b32.xlu1 %v3746_v26, %s5097_s4  ;;  %v3914_v4 = vpop.permute.xlu0 %2085 }
 0x340   : > { %5109 = vst [vmem:[#allocation83_spill] sm:$0xff] %v3914_v4  ;;  %v3920_v31 = vpop.permute.xlu1 %2127 }
 0x341   : > { %1881 = vrot.lane.b32.xlu0 %v3750_v49, %s5097_s4  ;;  %5111 = vst [vmem:[#allocation84_spill] sm:$0xff] %v3920_v31 }
 0x343   : > { %1916 = vrot.lane.b32.xlu1 %v3746_v26, %s4979_s25  ;;  %v3924_v3 = vpop.permute.xlu0 %2122 }
 0x344   : > { %5112 = vst [vmem:[#allocation85_spill] sm:$0xff] %v3924_v3  ;;  %v3930_v60 = vpop.permute.xlu1 %2159 }
 0x345   : > { %1918 = vrot.lane.b32.xlu0 %v3750_v49, %s4979_s25  ;;  %5113 = vst [vmem:[#allocation86_spill] sm:$0xff] %v3930_v60 }
 0x347   : > { %1953 = vrot.lane.b32.xlu1 %v3746_v26, %s4974_s1  ;;  %v3934_v4 = vpop.permute.xlu0 %2164 }
 0x348   : > { %5114 = vst [vmem:[#allocation87_spill] sm:$0xff] %v3934_v4  ;;  %v3940_v31 = vpop.permute.xlu1 %2196 }
 0x349   : > { %1955 = vrot.lane.b32.xlu0 %v3750_v49, %s4974_s1  ;;  %5115 = vst [vmem:[#allocation88_spill] sm:$0xff] %v3940_v31 }
 0x34b   : > { %1990 = vrot.lane.b32.xlu1 %v3746_v26, %s4981_s3  ;;  %v3944_v3 = vpop.permute.xlu0 %2201 }
 0x34c   : > { %5116 = vst [vmem:[#allocation89_spill] sm:$0xff] %v3944_v3  ;;  %v3950_v4 = vpop.permute.xlu1 %2233 }
 0x34d   : > { %1992 = vrot.lane.b32.xlu0 %v3750_v49, %s4981_s3  ;;  %5117 = vst [vmem:[#allocation90_spill] sm:$0xff] %v3950_v4 }
 0x34f   : > { %2027 = vrot.lane.b32.xlu1 %v3746_v26, %s4978_s2  ;;  %v3954_v60 = vpop.permute.xlu0 %2238 }
 0x350   : > { %5118 = vst [vmem:[#allocation91_spill] sm:$0xff] %v3954_v60 }
 0x351   : > { %2029 = vrot.lane.b32.xlu0 %v3750_v49, %s4978_s2 }
 0x353   : > { %2064 = vrot.lane.b32.xlu1 %v3746_v26, %s4985_s15 }
 0x355   : > { %2066 = vrot.lane.b32.xlu0 %v3750_v49, %s4985_s15 }
 0x357   : > { %2101 = vrot.lane.b32.xlu1 %v3746_v26, %s5106_s6 }
 0x359   : > { %2103 = vrot.lane.b32.xlu0 %v3750_v49, %s5106_s6 }
 0x35b   : > { %2138 = vrot.lane.b32.xlu1 %v3746_v26, %s4989_s24 }
 0x35d   : > { %2140 = vrot.lane.b32.xlu0 %v3750_v49, %s4989_s24 }
 0x35f   : > { %2175 = vrot.lane.b32.xlu1 %v3746_v26, %s5110_s23 }
 0x361   : > { %2177 = vrot.lane.b32.xlu0 %v3750_v49, %s5110_s23 }
 0x363   : > { %2212 = vrot.lane.b32.xlu1 %v3746_v26, %s4988_s19 }
 0x365   : > { %2214 = vrot.lane.b32.xlu0 %v3750_v49, %s4988_s19 }
 0x367   : > { %1345 = vrot.lane.b32.xlu1 %v3748_v41, %s5076_s0 }
 0x369   : > { %1347 = vrot.lane.b32.xlu0 %v3756_v2, %s5076_s0  ;;  %s2649_s0 = smov [#allocation2]  }
 0x36b   : > { %1377 = vrot.lane.b32.xlu1 %v3748_v41, %s5078_s17 }
 0x36d   : > { %1379 = vrot.lane.b32.xlu0 %v3756_v2, %s5078_s17  ;;  %s2564_s17 = sshll.u32 %s2649_s0, 4  ;;  %s2565_s17 = int_to_ptr.vmem [resolvable:$false] %s2564_s17 }
 0x36f   : > { %1414 = vrot.lane.b32.xlu1 %v3748_v41, %s4966_s26 }
 0x371   : > { %1416 = vrot.lane.b32.xlu0 %v3756_v2, %s4966_s26 }
 0x373   : > { %1451 = vrot.lane.b32.xlu1 %v3748_v41, %s5079_s22 }
 0x375   : > { %1453 = vrot.lane.b32.xlu0 %v3756_v2, %s5079_s22 }
 0x377   : > { %1488 = vrot.lane.b32.xlu1 %v3748_v41, %s4968_s28 }
 0x379   : > { %1490 = vrot.lane.b32.xlu0 %v3756_v2, %s4968_s28  ;;  %v3960_v3 = vpop.permute.xlu1 %1341 }
 0x37b   : > { %v3962_v31 = vpop.permute.xlu0 %1343  ;;  %1525 = vrot.lane.b32.xlu1 %v3748_v41, %s5083_s13 }
 0x37d   : > { %1527 = vrot.lane.b32.xlu0 %v3756_v2, %s5083_s13  ;;  %v3968_v4 = vpop.permute.xlu1 %1373 }
 0x37f   : > { %v3970_v39 = vpop.permute.xlu0 %1375  ;;  %1562 = vrot.lane.b32.xlu1 %v3748_v41, %s4970_s29 }
 0x381   : > { %1564 = vrot.lane.b32.xlu0 %v3756_v2, %s4970_s29  ;;  %v3976_v60 = vpop.permute.xlu1 %1410  ;;  %s5297_s29 = sld [smem:[#allocation129_spill]] }
 0x383   : > { %v3978_v45 = vpop.permute.xlu0 %1412  ;;  %1599 = vrot.lane.b32.xlu1 %v3748_v41, %s4967_s21 }
 0x385   : > { %1601 = vrot.lane.b32.xlu0 %v3756_v2, %s4967_s21  ;;  %v3984_v10 = vpop.permute.xlu1 %1447 }
 0x387   : > { %v3986_v61 = vpop.permute.xlu0 %1449  ;;  %1636 = vrot.lane.b32.xlu1 %v3748_v41, %s4972_s27 }
 0x389   : > { %1638 = vrot.lane.b32.xlu0 %v3756_v2, %s4972_s27  ;;  %v3992_v44 = vpop.permute.xlu1 %1484 }
 0x38b   : > { %v3994_v40 = vpop.permute.xlu0 %1486  ;;  %1673 = vrot.lane.b32.xlu1 %v3748_v41, %s4969_s11 }
 0x38d   : > { %1675 = vrot.lane.b32.xlu0 %v3756_v2, %s4969_s11  ;;  %v4000_v7 = vpop.permute.xlu1 %1521  ;;  %s4649_s11 = scalar_lea.sflag [#allocation3], %s350_s10 }
 0x38f   : > { %v4002_v19 = vpop.permute.xlu0 %1523  ;;  %1710 = vrot.lane.b32.xlu1 %v3748_v41, %s4973_s20 }
 0x391   : > { %1712 = vrot.lane.b32.xlu0 %v3756_v2, %s4973_s20  ;;  %v4008_v27 = vpop.permute.xlu1 %1558 }
 0x393   : > { %v4010_v17 = vpop.permute.xlu0 %1560  ;;  %1747 = vrot.lane.b32.xlu1 %v3748_v41, %s4971_s30 }
 0x395   : > { %1749 = vrot.lane.b32.xlu0 %v3756_v2, %s4971_s30  ;;  %v4016_v8 = vpop.permute.xlu1 %1595 }
 0x397   : > { %v4018_v36 = vpop.permute.xlu0 %1597  ;;  %1809 = vrot.lane.b32.xlu1 %v3748_v41, %s5093_s16 }
 0x399   : > { %1811 = vrot.lane.b32.xlu0 %v3756_v2, %s5093_s16  ;;  %v4024_v0 = vpop.permute.xlu1 %1632 }
 0x39b   : > { %v4026_v33 = vpop.permute.xlu0 %1634  ;;  %1846 = vrot.lane.b32.xlu1 %v3748_v41, %s4975_s12 }
 0x39d   : > { %1848 = vrot.lane.b32.xlu0 %v3756_v2, %s4975_s12  ;;  %v4032_v5 = vpop.permute.xlu1 %1669 }
 0x39e   : > { %5119 = vst [vmem:[#allocation92_spill] sm:$0xff] %v4032_v5 }
 0x39f   : > { %v4034_v49 = vpop.permute.xlu0 %1671  ;;  %1883 = vrot.lane.b32.xlu1 %v3748_v41, %s5097_s4 }
 0x3a0   : > { %5120 = vst [vmem:[#allocation93_spill] sm:$0xff] %v4034_v49 }
 0x3a1   : > { %1885 = vrot.lane.b32.xlu0 %v3756_v2, %s5097_s4  ;;  %v4040_v48 = vpop.permute.xlu1 %1706 }
 0x3a2   : > { %5121 = vst [vmem:[#allocation94_spill] sm:$0xff] %v4040_v48 }
 0x3a3   : > { %v4042_v26 = vpop.permute.xlu0 %1708  ;;  %1920 = vrot.lane.b32.xlu1 %v3748_v41, %s4979_s25 }
 0x3a4   : > { %5122 = vst [vmem:[#allocation95_spill] sm:$0xff] %v4042_v26 }
 0x3a5   : > { %1922 = vrot.lane.b32.xlu0 %v3756_v2, %s4979_s25  ;;  %v4048_v29 = vpop.permute.xlu1 %1743  ;;  %s2293_s25 = sshll.u32 %s3766_s8, 4  ;;  %s4643_s25 = int_to_ptr.vmem [resolvable:$true] %s2293_s25 }
 0x3a6   : > { %5123 = vst [vmem:[#allocation96_spill] sm:$0xff] %v4048_v29  ;;  %s2560_s12 = scalar_lea.vmem %s4643_s25, 1024  ;;  %p2567_p0 = scmp.lt.s32.totalorder %s4643_s25, %s2565_s17 }
 0x3a7   : > { %v4050_v62 = vpop.permute.xlu0 %1745  ;;  %1957 = vrot.lane.b32.xlu1 %v3748_v41, %s4974_s1  ;;  %p2561_p11 = scmp.ne.s32.totalorder %s4643_s25, %s2560_s12 }
 0x3a8   : > { %5124 = vst [vmem:[#allocation97_spill] sm:$0xff] %v4050_v62 }
 0x3a9   : > { %1959 = vrot.lane.b32.xlu0 %v3756_v2, %s4974_s1  ;;  %v4056_v30 = vpop.permute.xlu1 %1805  ;;  %p2562_p12 = pnand %p2561_p11, %p2744_p5 }
 0x3aa   : > { %5125 = vst [vmem:[#allocation98_spill] sm:$0xff] %v4056_v30 }
 0x3ab   : > { %v4058_v52 = vpop.permute.xlu0 %1807  ;;  %1994 = vrot.lane.b32.xlu1 %v3748_v41, %s4981_s3  ;;  %p2563_p13 = pneg %p2562_p12 }
 0x3ac   : > { %5126 = vst [vmem:[#allocation99_spill] sm:$0xff] %v4058_v52 }
 0x3ad   : > { %1996 = vrot.lane.b32.xlu0 %v3756_v2, %s4981_s3  ;;  %v4064_v12 = vpop.permute.xlu1 %1842  ;;  %s5139_s3 = sld [smem:[#allocation128_spill]] }
 0x3ae   : > { %5127 = vst [vmem:[#allocation100_spill] sm:$0xff] %v4064_v12 }
 0x3af   : > { %v4066_v34 = vpop.permute.xlu0 %1844  ;;  %2031 = vrot.lane.b32.xlu1 %v3748_v41, %s4978_s2 }
 0x3b0   : > { %5128 = vst [vmem:[#allocation101_spill] sm:$0xff] %v4066_v34 }
 0x3b1   : > { %2033 = vrot.lane.b32.xlu0 %v3756_v2, %s4978_s2  ;;  %v4072_v62 = vpop.permute.xlu1 %1879 }
 0x3b2   : > { %5129 = vst [vmem:[#allocation102_spill] sm:$0xff] %v4072_v62 }
 0x3b3   : > { %v4074_v30 = vpop.permute.xlu0 %1881  ;;  %2068 = vrot.lane.b32.xlu1 %v3748_v41, %s4985_s15 }
 0x3b4   : > { %5130 = vst [vmem:[#allocation103_spill] sm:$0xff] %v4074_v30 }
 0x3b5   : > { %2070 = vrot.lane.b32.xlu0 %v3756_v2, %s4985_s15  ;;  %v4080_v52 = vpop.permute.xlu1 %1916 }
 0x3b6   : > { %5131 = vst [vmem:[#allocation104_spill] sm:$0xff] %v4080_v52 }
 0x3b7   : > { %v4082_v12 = vpop.permute.xlu0 %1918  ;;  %2105 = vrot.lane.b32.xlu1 %v3748_v41, %s5106_s6 }
 0x3b8   : > { %5132 = vst [vmem:[#allocation105_spill] sm:$0xff] %v4082_v12 }
 0x3b9   : > { %2107 = vrot.lane.b32.xlu0 %v3756_v2, %s5106_s6  ;;  %v4088_v34 = vpop.permute.xlu1 %1953 }
 0x3ba   : > { %5133 = vst [vmem:[#allocation106_spill] sm:$0xff] %v4088_v34 }
 0x3bb   : > { %v4090_v62 = vpop.permute.xlu0 %1955  ;;  %2142 = vrot.lane.b32.xlu1 %v3748_v41, %s4989_s24 }
 0x3bc   : > { %5134 = vst [vmem:[#allocation107_spill] sm:$0xff] %v4090_v62  ;;  %v366_v62 = vld [vmem:[%s5139_s3] sm:$0xff] }
 0x3bd   : > { %2144 = vrot.lane.b32.xlu0 %v3756_v2, %s4989_s24  ;;  %v4096_v30 = vpop.permute.xlu1 %1990 }
 0x3be   : > { %5135 = vst [vmem:[#allocation108_spill] sm:$0xff] %v4096_v30  ;;  %v367_v30 = vld [vmem:[%s5139_s3 + $0x8] sm:$0xff] }
 0x3bf   : > { %v4098_v52 = vpop.permute.xlu0 %1992  ;;  %2179 = vrot.lane.b32.xlu1 %v3748_v41, %s5110_s23 }
 0x3c0   : > { %5136 = vst [vmem:[#allocation109_spill] sm:$0xff] %v4098_v52 }
 0x3c1   : > { %2181 = vrot.lane.b32.xlu0 %v3756_v2, %s5110_s23  ;;  %v4104_v12 = vpop.permute.xlu1 %2027 }
 0x3c2   : > { %5137 = vst [vmem:[#allocation110_spill] sm:$0xff] %v4104_v12 }
 0x3c3   : > { %v4106_v34 = vpop.permute.xlu0 %2029  ;;  %2216 = vrot.lane.b32.xlu1 %v3748_v41, %s4988_s19 }
 0x3c4   : > { %5138 = vst [vmem:[#allocation111_spill] sm:$0xff] %v4106_v34 }
 0x3c5   : > { %2218 = vrot.lane.b32.xlu0 %v3756_v2, %s4988_s19  ;;  %v4115_v52 = vpop.permute.xlu1 %2064  ;;  %s5294_s19 = sld [smem:[#allocation8_spill]] }
 0x3c6   : > { %5140 = vst [vmem:[#allocation112_spill] sm:$0xff] %v4115_v52 }
 0x3c7   : > { %v4120_v42 = vpop.permute.xlu0 %2066  ;;  %2251 = vperm.xlu1 %2534, %v366_v62  }
 0x3c8   : > { %5141 = vst [vmem:[#allocation113_spill] sm:$0xff] %v4120_v42 }
 0x3c9   : > { %2256 = vperm.xlu0 %2533, %v367_v30   ;;  %v4122_v34 = vpop.permute.xlu1 %2101 }
 0x3ca   : > { %5142 = vst [vmem:[#allocation114_spill] sm:$0xff] %v4122_v34  ;;  %v5150_v34 = vld [vmem:[#allocation39_spill] sm:$0xff] }
 0x3cb   : > { %v4124_v12 = vpop.permute.xlu0 %2103  ;;  %s2467_s20 = sshll.u32 %s5294_s19, 10 }
 0x3cc   : > { %5143 = vst [vmem:[#allocation115_spill] sm:$0xff] %v4124_v12  ;;  %s4637_s30 = scalar_lea.hbm %s5297_s29, %s2467_s20 }
 0x3cd   : > { %v4126_v41 = vpop.permute.xlu1 %2138 }
 0x3ce   : > { %5144 = vst [vmem:[#allocation116_spill] sm:$0xff] %v4126_v41 }
 0x3cf   : > { %v4128_v16 = vpop.permute.xlu0 %2140 }
 0x3d0   : > { %5145 = vst [vmem:[#allocation117_spill] sm:$0xff] %v4128_v16 }
 0x3d1   : > { %v4130_v20 = vpop.permute.xlu1 %2175 }
 0x3d2   : > { %5146 = vst [vmem:[#allocation118_spill] sm:$0xff] %v4130_v20 }
 0x3d3   : > { %v4132_v2 = vpop.permute.xlu0 %2177 }
 0x3d4   : > { %5147 = vst [vmem:[#allocation119_spill] sm:$0xff] %v4132_v2 }
 0x3d5   : > { %v4134_v52 = vpop.permute.xlu1 %2212 }
 0x3d6   : > { %5148 = vst [vmem:[#allocation120_spill] sm:$0xff] %v4134_v52 }
 0x3d7   : > { %v4136_v29 = vpop.permute.xlu0 %2214 }
 0x3d8   : > { %5149 = vst [vmem:[#allocation121_spill] sm:$0xff] %v4136_v29 }
 0x3d9   : > { %v1346_v26 = vpop.permute.xlu1 %1345 }
 0x3da   : > { %v1349_v52 = vsel %vm448_vm1, %v3960_v3, %v1346_v26  ;;  %v1351_v20 = vsel %vm448_vm1, %v1346_v26, %v3960_v3 }
 0x3db   : > { %v1348_v42 = vpop.permute.xlu0 %1347 }
 0x3dd   : > { %v1378_v62 = vpop.permute.xlu1 %1377 }
 0x3de   : > { %v1381_v30 = vsel %vm477_vm2, %v3968_v4, %v1378_v62  ;;  %v1383_v41 = vsel %vm477_vm2, %v1378_v62, %v3968_v4  ;;  %v1350_v4 = vsel %vm448_vm1, %v3962_v31, %v1348_v42  ;;  %v1352_v62 = vsel %vm448_vm1, %v1348_v42, %v3962_v31  ;;  %v5153_v31 = vld [vmem:[#allocation38_spill] sm:$0xff] }
 0x3df   : > { %v1380_v16 = vpop.permute.xlu0 %1379  ;;  %v1385_v53 = vmul.f32 %v1383_v41, %v5150_v34  ;;  %v1353_v42 = vmul.f32 %v1351_v20, %v5152_v11  ;;  %v1354_v21 = vmul.f32 %v1349_v52, %v5153_v31  ;;  %v1355_v41 = vmul.f32 %v1352_v62, %v5152_v11 }
 0x3e0   : > { %v1382_v2 = vsel %vm477_vm2, %v3970_v39, %v1380_v16  ;;  %v1384_v29 = vsel %vm477_vm2, %v1380_v16, %v3970_v39  ;;  %v5151_v16 = vld [vmem:[#allocation40_spill] sm:$0xff]  ;;  %vm5165_vm1 = vcmp.lt.s32.totalorder %v3147_v56, 2 }
 0x3e1   : > { %v1415_v12 = vpop.permute.xlu1 %1414  ;;  %v1386_v39 = vmul.f32 %v1381_v30, %v5151_v16  ;;  %v1387_v26 = vmul.f32 %v1384_v29, %v5150_v34  ;;  %v1388_v59 = vmul.f32 %v1382_v2, %v5151_v16  ;;  %v1356_v30 = vmul.f32 %v1350_v4, %v5153_v31  ;;  %vm5166_vm2 = vmmov %vm5165_vm1 }
 0x3e2   : > { %v1418_v48 = vsel %vm510_vm5, %v3976_v60, %v1415_v12  ;;  %v1420_v3 = vsel %vm510_vm5, %v1415_v12, %v3976_v60  ;;  %v1402_v2 = vmul.f32 %v3723_v47, %v1385_v53  ;;  %v1371_v62 = vmul.f32 %v3721_v22, %v1355_v41 }
 0x3e3   : > { %v1417_v49 = vpop.permute.xlu0 %1416  ;;  %v1422_v5 = vmul.f32 %v1420_v3, %v3219_v55  ;;  %v1423_v9 = vmul.f32 %v1418_v48, %v3240_v13  ;;  %v1403_v20 = vmul.f32 %v3723_v47, %v1386_v39  ;;  %v1404_v11 = vmul.f32 %v3725_v25, %v1387_v26  ;;  %v5154_v3 = vld [vmem:[#allocation41_spill] sm:$0xff]  ;;  %v5155_v26 = vld [vmem:[#allocation42_spill] sm:$0xff] }
 0x3e4   : > { %v1419_v12 = vsel %vm510_vm5, %v3978_v45, %v1417_v49  ;;  %v1421_v34 = vsel %vm510_vm5, %v1417_v49, %v3978_v45  ;;  %v1405_v52 = vmul.f32 %v3725_v25, %v1388_v59  ;;  %v1369_v45 = vmul.f32 %v3719_v63, %v1353_v42 }
 0x3e5   : > { %v1452_v60 = vpop.permute.xlu1 %1451  ;;  %v1370_v49 = vmul.f32 %v3719_v63, %v1354_v21  ;;  %v1424_v53 = vmul.f32 %v1421_v34, %v3219_v55  ;;  %v1425_v47 = vmul.f32 %v1419_v12, %v3240_v13  ;;  %v1372_v25 = vmul.f32 %v3721_v22, %v1356_v30 }
 0x3e6   : > { %v1455_v48 = vsel %vm543_vm3, %v3984_v10, %v1452_v60  ;;  %v1457_v29 = vsel %vm543_vm3, %v1452_v60, %v3984_v10  ;;  %v1439_v59 = vmul.f32 %v3727_v37, %v1422_v5  ;;  %v1440_v16 = vmul.f32 %v3727_v37, %v1423_v9 }
 0x3e7   : > { %v1454_v4 = vpop.permute.xlu0 %1453  ;;  %v1459_v10 = vmul.f32 %v1457_v29, %v5154_v3  ;;  %v1460_v31 = vmul.f32 %v1455_v48, %v5155_v26  ;;  %v1406_v55 = vadd.f32 %v1402_v2, %v1369_v45  ;;  %v1407_v63 = vadd.f32 %v1403_v20, %v1370_v49 }
 0x3e8   : > { %v1456_v21 = vsel %vm543_vm3, %v3986_v61, %v1454_v4  ;;  %v1458_v13 = vsel %vm543_vm3, %v1454_v4, %v3986_v61  ;;  %v1408_v22 = vadd.f32 %v1404_v11, %v1371_v62  ;;  %v1409_v42 = vadd.f32 %v1405_v52, %v1372_v25  ;;  %vm5169_vm3 = vmmov %vm5165_vm1 }
 0x3e9   : > { %v1489_v39 = vpop.permute.xlu1 %1488  ;;  %v1441_v9 = vmul.f32 %v3729_v35, %v1424_v53  ;;  %v1442_v37 = vmul.f32 %v3729_v35, %v1425_v47  ;;  %v1443_v12 = vadd.f32 %v1439_v59, %v1406_v55  ;;  %v1444_v34 = vadd.f32 %v1440_v16, %v1407_v63 }
 0x3ea   : > { %v1492_v41 = vsel %vm576_vm6, %v3992_v44, %v1489_v39  ;;  %v1494_v30 = vsel %vm576_vm6, %v1489_v39, %v3992_v44  ;;  %v1461_v61 = vmul.f32 %v1458_v13, %v5154_v3  ;;  %v1462_v60 = vmul.f32 %v1456_v21, %v5155_v26 }
 0x3eb   : > { %v1491_v5 = vpop.permute.xlu0 %1490  ;;  %v1476_v20 = vmul.f32 %v3731_v32, %v1459_v10  ;;  %v1477_v11 = vmul.f32 %v3731_v32, %v1460_v31  ;;  %v1496_v44 = vmul.f32 %v1494_v30, %v3259_v51  ;;  %v1497_v48 = vmul.f32 %v1492_v41, %v3262_v57 }
 0x3ec   : > { %v1493_v35 = vsel %vm576_vm6, %v3994_v40, %v1491_v5  ;;  %v1495_v52 = vsel %vm576_vm6, %v1491_v5, %v3994_v40  ;;  %v1445_v45 = vadd.f32 %v1441_v9, %v1408_v22  ;;  %v1446_v49 = vadd.f32 %v1442_v37, %v1409_v42 }
 0x3ed   : > { %v1526_v2 = vpop.permute.xlu1 %1525  ;;  %v1478_v47 = vmul.f32 %v3733_v18, %v1461_v61  ;;  %v1479_v62 = vmul.f32 %v3733_v18, %v1462_v60  ;;  %v1498_v25 = vmul.f32 %v1495_v52, %v3259_v51  ;;  %v1499_v59 = vmul.f32 %v1493_v35, %v3262_v57 }
 0x3ee   : > { %v1529_v29 = vsel %vm609_vm4, %v4000_v7, %v1526_v2  ;;  %v1531_v32 = vsel %vm609_vm4, %v1526_v2, %v4000_v7  ;;  %v1480_v16 = vadd.f32 %v1476_v20, %v1443_v12  ;;  %v1481_v39 = vadd.f32 %v1477_v11, %v1444_v34  ;;  %v5156_v2 = vld [vmem:[#allocation44_spill] sm:$0xff] }
 0x3ef   : > { %v1528_v4 = vpop.permute.xlu0 %1527  ;;  %v1533_v3 = vmul.f32 %v1531_v32, %v3212_v28  ;;  %v1534_v10 = vmul.f32 %v1529_v29, %v3215_v23  ;;  %v1513_v26 = vmul.f32 %v3735_v6, %v1496_v44  ;;  %v1514_v31 = vmul.f32 %v3735_v6, %v1497_v48 }
 0x3f0   : > { %v1530_v53 = vsel %vm609_vm4, %v4002_v19, %v1528_v4  ;;  %v1532_v40 = vsel %vm609_vm4, %v1528_v4, %v4002_v19  ;;  %v1483_v55 = vadd.f32 %v1479_v62, %v1446_v49  ;;  %v1516_v63 = vmul.f32 %v3737_v46, %v1499_v59  ;;  %vm5170_vm4 = vmmov %vm5165_vm1 }
 0x3f1   : > { %v1563_v7 = vpop.permute.xlu1 %1562  ;;  %v1535_v19 = vmul.f32 %v1532_v40, %v3212_v28  ;;  %v1536_v21 = vmul.f32 %v1530_v53, %v3215_v23  ;;  %v1482_v28 = vadd.f32 %v1478_v47, %v1445_v45  ;;  %v1515_v23 = vmul.f32 %v3737_v46, %v1498_v25 }
 0x3f2   : > { %v1566_v51 = vsel %vm642_vm9, %v4008_v27, %v1563_v7  ;;  %v1568_v57 = vsel %vm642_vm9, %v1563_v7, %v4008_v27  ;;  %v1550_v42 = vmul.f32 %v3740_v54, %v1533_v3  ;;  %v1551_v5 = vmul.f32 %v3740_v54, %v1534_v10 }
 0x3f3   : > { %v1565_v18 = vpop.permute.xlu0 %1564  ;;  %v1571_v37 = vmul.f32 %v1566_v51, %v3296_v43  ;;  %v1552_v12 = vmul.f32 %v3744_v1, %v1535_v19  ;;  %v1553_v54 = vmul.f32 %v3744_v1, %v1536_v21  ;;  %v1517_v61 = vadd.f32 %v1513_v26, %v1480_v16  ;;  %v5158_v19 = vld [vmem:[#allocation51_spill] sm:$0xff] }
 0x3f4   : > { %v1567_v13 = vsel %vm642_vm9, %v4010_v17, %v1565_v18  ;;  %v1569_v6 = vsel %vm642_vm9, %v1565_v18, %v4010_v17  ;;  %v1570_v17 = vmul.f32 %v1568_v57, %v3293_v38  ;;  %v1518_v60 = vadd.f32 %v1514_v31, %v1481_v39  ;;  %v5159_v18 = vld [vmem:[#allocation92_spill] sm:$0xff] }
 0x3f5   : > { %v1600_v22 = vpop.permute.xlu1 %1599  ;;  %v1572_v41 = vmul.f32 %v1569_v6, %v3293_v38  ;;  %v1573_v46 = vmul.f32 %v1567_v13, %v3296_v43  ;;  %v5157_v38 = vld [vmem:[#allocation45_spill] sm:$0xff]  ;;  %v1519_v35 = vadd.f32 %v1515_v23, %v1482_v28  ;;  %v1520_v52 = vadd.f32 %v1516_v63, %v1483_v55  ;;  %v5160_v63 = vld [vmem:[#allocation47_spill] sm:$0xff] }
 0x3f6   : > { %v1603_v27 = vsel %vm675_vm7, %v4016_v8, %v1600_v22  ;;  %v1605_v9 = vsel %vm675_vm7, %v1600_v22, %v4016_v8  ;;  %v1587_v48 = vmul.f32 %v3760_v58, %v1570_v17  ;;  %v1588_v29 = vmul.f32 %v3760_v58, %v1571_v37  ;;  %v5163_v37 = vld [vmem:[#allocation18_spill] sm:$0xff] }
 0x3f7   : > { %v1602_v30 = vpop.permute.xlu0 %1601  ;;  %v1607_v20 = vmul.f32 %v1605_v9, %v5156_v2  ;;  %v1608_v11 = vmul.f32 %v1603_v27, %v5157_v38  ;;  %v1589_v32 = vmul.f32 %v3772_v15, %v1572_v41  ;;  %v1554_v45 = vadd.f32 %v1550_v42, %v1517_v61  ;;  %v5161_v42 = vld [vmem:[#allocation48_spill] sm:$0xff]  ;;  %v5162_v27 = vld [vmem:[#allocation93_spill] sm:$0xff] }
 0x3f8   : > { %v1604_v34 = vsel %vm675_vm7, %v4018_v36, %v1602_v30  ;;  %v1606_v8 = vsel %vm675_vm7, %v1602_v30, %v4018_v36  ;;  %v1590_v36 = vmul.f32 %v3772_v15, %v1573_v46  ;;  %v1555_v49 = vadd.f32 %v1551_v5, %v1518_v60  ;;  %v5164_v30 = vld [vmem:[#allocation94_spill] sm:$0xff]  ;;  %v5168_v60 = vld [vmem:[#allocation95_spill] sm:$0xff] }
 0x3f9   : > { %v1637_v43 = vpop.permute.xlu1 %1636  ;;  %v1609_v44 = vmul.f32 %v1606_v8, %v5156_v2  ;;  %v1610_v1 = vmul.f32 %v1604_v34, %v5157_v38  ;;  %v1556_v53 = vadd.f32 %v1552_v12, %v1519_v35  ;;  %v1557_v40 = vadd.f32 %v1553_v54, %v1520_v52  ;;  %v5167_v34 = vld [vmem:[#allocation28_spill] sm:$0xff] }
 0x3fa   : > { %v1624_v47 = vmul.f32 %v3780_v50, %v1607_v20  ;;  %v1625_v62 = vmul.f32 %v3780_v50, %v1608_v11  ;;  %v1640_v25 = vsel %vm708_vm10, %v4024_v0, %v1637_v43  ;;  %v1642_v58 = vsel %vm708_vm10, %v1637_v43, %v4024_v0  ;;  %v5171_v35 = vld [vmem:[#allocation96_spill] sm:$0xff] }
 0x3fb   : > { %v1639_v4 = vpop.permute.xlu0 %1638  ;;  %v1626_v15 = vmul.f32 %v3784_v24, %v1609_v44  ;;  %v1627_v7 = vmul.f32 %v3784_v24, %v1610_v1  ;;  %v1591_v39 = vadd.f32 %v1587_v48, %v1554_v45  ;;  %v1592_v3 = vadd.f32 %v1588_v29, %v1555_v49  ;;  %v5174_v1 = vld [vmem:[#allocation19_spill] sm:$0xff] }
 0x3fc   : > { %v1641_v16 = vsel %vm708_vm10, %v4026_v33, %v1639_v4  ;;  %v1643_v50 = vsel %vm708_vm10, %v1639_v4, %v4026_v33  ;;  %v1593_v10 = vadd.f32 %v1589_v32, %v1556_v53  ;;  %v1594_v26 = vadd.f32 %v1590_v36, %v1557_v40  ;;  %v5175_v32 = vld [vmem:[#allocation54_spill] sm:$0xff]  ;;  %v5176_v4 = vld [vmem:[#allocation55_spill] sm:$0xff] }
 0x3fd   : > { %v1674_v59 = vpop.permute.xlu1 %1673  ;;  %v1644_v0 = vmul.f32 %v1642_v58, %v3305_v14  ;;  %v1645_v21 = vmul.f32 %v1640_v25, %v5158_v19  ;;  %v1646_v57 = vmul.f32 %v1643_v50, %v3305_v14  ;;  %v1647_v33 = vmul.f32 %v1641_v16, %v5158_v19  ;;  %v5181_v16 = vld [vmem:[#allocation50_spill] sm:$0xff]  ;;  %v5183_v19 = vld [vmem:[#allocation20_spill] sm:$0xff] }
 0x3fe   : > { %v1677_v24 = vsel %vm741_vm8, %v5159_v18, %v1674_v59  ;;  %v1679_v51 = vsel %vm741_vm8, %v1674_v59, %v5159_v18  ;;  %v1628_v6 = vadd.f32 %v1624_v47, %v1591_v39  ;;  %v1629_v28 = vadd.f32 %v1625_v62, %v1592_v3  ;;  %v5177_v47 = vld [vmem:[#allocation97_spill] sm:$0xff] }
 0x3ff   : > { %v1676_v31 = vpop.permute.xlu0 %1675  ;;  %v1630_v55 = vadd.f32 %v1626_v15, %v1593_v10  ;;  %v1631_v23 = vadd.f32 %v1627_v7, %v1594_v26  ;;  %v1681_v22 = vmul.f32 %v1679_v51, %v5160_v63  ;;  %v1682_v5 = vmul.f32 %v1677_v24, %v5161_v42  ;;  %v5180_v15 = vld [vmem:[#allocation49_spill] sm:$0xff]  ;;  %v5182_v26 = vld [vmem:[#allocation43_spill] sm:$0xff] }
 0x400   : > { %v1678_v9 = vsel %vm741_vm8, %v5162_v27, %v1676_v31  ;;  %v1680_v17 = vsel %vm741_vm8, %v1676_v31, %v5162_v27  ;;  %v1661_v41 = vmul.f32 %v5163_v37, %v1644_v0  ;;  %v1662_v46 = vmul.f32 %v5163_v37, %v1645_v21  ;;  %v5189_v37 = vld [vmem:[#allocation31_spill] sm:$0xff] }
 0x401   : > { %v1711_v13 = vpop.permute.xlu1 %1710  ;;  %v1663_v8 = vmul.f32 %v5167_v34, %v1646_v57  ;;  %v1664_v61 = vmul.f32 %v5167_v34, %v1647_v33  ;;  %v1683_v11 = vmul.f32 %v1680_v17, %v5160_v63  ;;  %v1684_v43 = vmul.f32 %v1678_v9, %v5161_v42  ;;  %v5186_v42 = vld [vmem:[#allocation98_spill] sm:$0xff] }
 0x402   : > { %v1714_v12 = vsel %vm5165_vm1, %v5164_v30, %v1711_v13  ;;  %v1716_v54 = vsel %vm5166_vm2, %v1711_v13, %v5164_v30  ;;  %vm5172_vm5 = vcmp.lt.s32.totalorder %v3147_v56, 1  ;;  %v1698_v48 = vmul.f32 %v5174_v1, %v1681_v22  ;;  %v5191_v30 = vld [vmem:[#allocation30_spill] sm:$0xff] }
 0x403   : > { %v1713_v14 = vpop.permute.xlu0 %1712  ;;  %vm5173_vm6 = vmmov %vm5172_vm5  ;;  %v1699_v29 = vmul.f32 %v5174_v1, %v1682_v5  ;;  %v1718_v36 = vmul.f32 %v1716_v54, %v5175_v32  ;;  %v1719_v45 = vmul.f32 %v1714_v12, %v5176_v4  ;;  %v1665_v58 = vadd.f32 %v1661_v41, %v1628_v6  ;;  %v5184_v6 = vld [vmem:[#allocation29_spill] sm:$0xff]  ;;  %v5190_v41 = vld [vmem:[#allocation16_spill] sm:$0xff] }
 0x404   : > { %v1715_v2 = vsel %vm5169_vm3, %v5168_v60, %v1713_v14  ;;  %v1717_v20 = vsel %vm5170_vm4, %v1713_v14, %v5168_v60  ;;  %vm5178_vm7 = vmmov %vm5172_vm5  ;;  %v1666_v59 = vadd.f32 %v1662_v46, %v1629_v28  ;;  %v1667_v3 = vadd.f32 %v1663_v8, %v1630_v55  ;;  %v5192_v12 = vld [vmem:[#allocation17_spill] sm:$0xff]  ;;  %v5197_v1 = vld [vmem:[#allocation27_spill] sm:$0xff] }
 0x405   : > { %v1748_v38 = vpop.permute.xlu1 %1747  ;;  %v1720_v53 = vmul.f32 %v1717_v20, %v5175_v32  ;;  %v1721_v40 = vmul.f32 %v1715_v2, %v5176_v4  ;;  %vm5179_vm8 = vmmov %vm5172_vm5  ;;  %v1668_v10 = vadd.f32 %v1664_v61, %v1631_v23  ;;  %v1700_v31 = vmul.f32 %v5182_v26, %v1683_v11  ;;  %v5185_v23 = vld [vmem:[#allocation21_spill] sm:$0xff]  ;;  %v5193_v61 = vld [vmem:[#allocation46_spill] sm:$0xff] }
 0x406   : > { %v1751_v52 = vsel %vm5172_vm5, %v5171_v35, %v1748_v38  ;;  %v1753_v44 = vsel %vm5173_vm6, %v1748_v38, %v5171_v35  ;;  %v1701_v0 = vmul.f32 %v5182_v26, %v1684_v43  ;;  %v1735_v21 = vmul.f32 %v5183_v19, %v1718_v36  ;;  %v5194_v38 = vld [vmem:[#allocation52_spill] sm:$0xff]  ;;  %v5195_v43 = vld [vmem:[#allocation53_spill] sm:$0xff] }
 0x407   : > { %v1750_v49 = vpop.permute.xlu0 %1749  ;;  %v1755_v7 = vmul.f32 %v1753_v44, %v5180_v15  ;;  %v1756_v50 = vmul.f32 %v1751_v52, %v5181_v16  ;;  %v1736_v18 = vmul.f32 %v5183_v19, %v1719_v45  ;;  %v1702_v33 = vadd.f32 %v1698_v48, %v1665_v58  ;;  %v5196_v52 = vld [vmem:[#allocation34_spill] sm:$0xff] }
 0x408   : > { %v1752_v62 = vsel %vm5178_vm7, %v5177_v47, %v1750_v49  ;;  %v1754_v25 = vsel %vm5179_vm8, %v1750_v49, %v5177_v47  ;;  %v1703_v13 = vadd.f32 %v1699_v29, %v1666_v59  ;;  %v1737_v28 = vmul.f32 %v5184_v6, %v1720_v53  ;;  %v5198_v49 = vld [vmem:[#allocation22_spill] sm:$0xff] }
 0x409   : > { %v1810_v39 = vpop.permute.xlu1 %1809  ;;  %v1757_v24 = vmul.f32 %v1754_v25, %v5180_v15  ;;  %v1758_v51 = vmul.f32 %v1752_v62, %v5181_v16  ;;  %v1738_v55 = vmul.f32 %v5184_v6, %v1721_v40  ;;  %v1772_v63 = vmul.f32 %v5185_v23, %v1755_v7  ;;  %v5199_v25 = vld [vmem:[#allocation99_spill] sm:$0xff] }
 0x40a   : > { %v1773_v22 = vmul.f32 %v5185_v23, %v1756_v50  ;;  %vm5187_vm9 = vcmp.lt.s32.totalorder %v3147_v56, 127  ;;  %v1704_v17 = vadd.f32 %v1700_v31, %v1667_v3  ;;  %v1705_v14 = vadd.f32 %v1701_v0, %v1668_v10  ;;  %v5202_v7 = vld [vmem:[#allocation23_spill] sm:$0xff]  ;;  %v5204_v0 = vld [vmem:[#allocation100_spill] sm:$0xff] }
 0x40b   : > { %v1812_v57 = vpop.permute.xlu0 %1811  ;;  %v1813_v5 = vsel %vm5187_vm9, %v5186_v42, %v1810_v39  ;;  %vm5188_vm10 = vmmov %vm5187_vm9  ;;  %v1781_v46 = vmul.f32 %v5190_v41, %v5189_v37  ;;  %v1780_v54 = vmul.f32 %v5192_v12, %v5191_v30  ;;  %v1739_v34 = vadd.f32 %v1735_v21, %v1702_v33  ;;  %v5210_v23 = vld [vmem:[#allocation60_spill] sm:$0xff] }
 0x40c   : > { %v1815_v27 = vsel %vm5188_vm10, %v1810_v39, %v5186_v42  ;;  %v1740_v8 = vadd.f32 %v1736_v18, %v1703_v13  ;;  %v1774_v60 = vmul.f32 %v5193_v61, %v1757_v24  ;;  %v1775_v2 = vmul.f32 %v5193_v61, %v1758_v51  ;;  %vm5200_vm12 = vmmov %vm5187_vm9  ;;  %v5203_v39 = vld [vmem:[#allocation32_spill] sm:$0xff] }
 0x40d   : > { %v1847_v9 = vpop.permute.xlu1 %1846  ;;  %v1817_v11 = vmul.f32 %v1813_v5, %v5194_v38  ;;  %v1818_v35 = vmul.f32 %v1815_v27, %v5195_v43  ;;  %v1783_v44 = vmul.f32 %v5196_v52, %v5189_v37  ;;  %v1782_v48 = vmul.f32 %v5197_v1, %v5191_v30  ;;  %vm5201_vm1 = vmmov %vm5187_vm9  ;;  %v5212_v5 = vld [vmem:[#allocation102_spill] sm:$0xff]  ;;  %v5215_v37 = vld [vmem:[#allocation103_spill] sm:$0xff] }
 0x40e   : > { %v1741_v29 = vadd.f32 %v1737_v28, %v1704_v17  ;;  %v1742_v32 = vadd.f32 %v1738_v55, %v1705_v14  ;;  %v1776_v36 = vadd.f32 %v1772_v63, %v1739_v34  ;;  %v1777_v4 = vadd.f32 %v1773_v22, %v1740_v8  ;;  %v5211_v22 = vld [vmem:[#allocation61_spill] sm:$0xff]  ;;  %v5218_v34 = vld [vmem:[#allocation24_spill] sm:$0xff] }
 0x40f   : > { %v1849_v20 = vpop.permute.xlu0 %1848  ;;  %v1798_v53 = vmul.f32 %v5198_v49, %v1781_v46  ;;  %v1797_v40 = vmul.f32 %v5198_v49, %v1780_v54  ;;  %v1814_v58 = vsel %vm5200_vm12, %v5199_v25, %v1812_v57  ;;  %v1816_v59 = vsel %vm5201_vm1, %v1812_v57, %v5199_v25  ;;  %v5207_v57 = vld [vmem:[#allocation101_spill] sm:$0xff]  ;;  %v5228_v49 = vld [vmem:[#allocation26_spill] sm:$0xff] }
 0x410   : > { %v1778_v47 = vadd.f32 %v1774_v60, %v1741_v29  ;;  %v1779_v62 = vadd.f32 %v1775_v2, %v1742_v32  ;;  %v1834_v16 = vmul.f32 %v5202_v7, %v1817_v11  ;;  %v1835_v50 = vmul.f32 %v5202_v7, %v1818_v35  ;;  %v5219_v60 = vld [vmem:[#allocation56_spill] sm:$0xff] }
 0x411   : > { %v1884_v45 = vpop.permute.xlu1 %1883  ;;  %v1800_v3 = vmul.f32 %v5203_v39, %v1783_v44  ;;  %v1799_v10 = vmul.f32 %v5203_v39, %v1782_v48  ;;  %v1802_v26 = vadd.f32 %v1798_v53, %v1777_v4  ;;  %v1801_v31 = vadd.f32 %v1797_v40, %v1776_v36  ;;  %v5221_v11 = vld [vmem:[#allocation104_spill] sm:$0xff]  ;;  %v5224_v48 = vld [vmem:[#allocation105_spill] sm:$0xff]  ;;  %v5231_v39 = vld [vmem:[#allocation106_spill] sm:$0xff] }
 0x412   : > { %vm5205_vm2 = vcmp.lt.s32.totalorder %v3147_v56, 126  ;;  %v1819_v24 = vmul.f32 %v1814_v58, %v5194_v38  ;;  %v1820_v51 = vmul.f32 %v1816_v59, %v5195_v43  ;;  %vm5213_vm6 = vcmp.lt.s32.totalorder %v3147_v56, 114  ;;  %v5227_v36 = vld [vmem:[#allocation25_spill] sm:$0xff]  ;;  %v5229_v58 = vld [vmem:[#allocation64_spill] sm:$0xff] }
 0x413   : > { %v1886_v15 = vpop.permute.xlu0 %1885  ;;  %v1850_v19 = vsel %vm5205_vm2, %v5204_v0, %v1847_v9  ;;  %vm5206_vm3 = vmmov %vm5205_vm2  ;;  %v1804_v6 = vadd.f32 %v1800_v3, %v1779_v62  ;;  %v1803_v28 = vadd.f32 %v1799_v10, %v1778_v47  ;;  %v1887_v27 = vsel %vm5213_vm6, %v5212_v5, %v1884_v45 }
 0x414   : > { %v1852_v21 = vsel %vm5206_vm3, %v1847_v9, %v5204_v0  ;;  %vm5208_vm4 = vmmov %vm5205_vm2  ;;  %v1854_v63 = vmul.f32 %v1850_v19, %v5210_v23  ;;  %v1838_v12 = vadd.f32 %v1834_v16, %v1801_v31  ;;  %v1839_v54 = vadd.f32 %v1835_v50, %v1802_v26  ;;  %v5234_v31 = vld [vmem:[#allocation13_spill] sm:$0xff] }
 0x415   : > { %v1921_v18 = vpop.permute.xlu1 %1920  ;;  %v1851_v33 = vsel %vm5208_vm4, %v5207_v57, %v1849_v20  ;;  %vm5209_vm5 = vmmov %vm5205_vm2  ;;  %v1855_v42 = vmul.f32 %v1852_v21, %v5211_v22  ;;  %v1836_v8 = vmul.f32 %v5218_v34, %v1819_v24  ;;  %v1837_v61 = vmul.f32 %v5218_v34, %v1820_v51  ;;  %v5235_v21 = vld [vmem:[#allocation14_spill] sm:$0xff] }
 0x416   : > { %v1853_v13 = vsel %vm5209_vm5, %v1849_v20, %v5207_v57  ;;  %vm5214_vm7 = vmmov %vm5213_vm6  ;;  %v1856_v17 = vmul.f32 %v1851_v33, %v5210_v23  ;;  %v1891_v2 = vmul.f32 %v1887_v27, %v5219_v60  ;;  %v5220_v20 = vld [vmem:[#allocation57_spill] sm:$0xff]  ;;  %vm5222_vm10 = vcmp.lt.s32.totalorder %v3147_v56, 113  ;;  %v5237_v23 = vld [vmem:[#allocation59_spill] sm:$0xff] }
 0x417   : > { %v1923_v55 = vpop.permute.xlu0 %1922  ;;  %v1889_v9 = vsel %vm5214_vm7, %v1884_v45, %v5212_v5  ;;  %v1857_v14 = vmul.f32 %v1853_v13, %v5211_v22  ;;  %vm5216_vm8 = vmmov %vm5213_vm6  ;;  %v1924_v43 = vsel %vm5222_vm10, %v5221_v11, %v1921_v18  ;;  %v1871_v4 = vmul.f32 %v5227_v36, %v1854_v63  ;;  %v5238_v22 = vld [vmem:[#allocation107_spill] sm:$0xff]  ;;  %v5241_v27 = vld [vmem:[#allocation74_spill] sm:$0xff] }
 0x418   : > { %v1888_v41 = vsel %vm5216_vm8, %v5215_v37, %v1886_v15  ;;  %vm5217_vm9 = vmmov %vm5213_vm6  ;;  %v1892_v38 = vmul.f32 %v1889_v9, %v5220_v20  ;;  %v1872_v45 = vmul.f32 %v5227_v36, %v1855_v42  ;;  %v1873_v53 = vmul.f32 %v5228_v49, %v1856_v17 }
 0x419   : > { %v1890_v46 = vsel %vm5217_vm9, %v1886_v15, %v5215_v37  ;;  %v1958_v30 = vpop.permute.xlu1 %1957  ;;  %vm5223_vm12 = vmmov %vm5222_vm10  ;;  %v1893_v44 = vmul.f32 %v1888_v41, %v5219_v60  ;;  %v1874_v40 = vmul.f32 %v5228_v49, %v1857_v14  ;;  %v1840_v62 = vadd.f32 %v1836_v8, %v1803_v28  ;;  %v5230_v15 = vld [vmem:[#allocation65_spill] sm:$0xff]  ;;  %v5236_v28 = vld [vmem:[#allocation58_spill] sm:$0xff] }
 0x41a   : > { %v1926_v35 = vsel %vm5223_vm12, %v1921_v18, %v5221_v11  ;;  %v1894_v1 = vmul.f32 %v1890_v46, %v5220_v20  ;;  %vm5225_vm1 = vmmov %vm5222_vm10  ;;  %v1841_v25 = vadd.f32 %v1837_v61, %v1804_v6  ;;  %v1928_v59 = vmul.f32 %v1924_v43, %v5229_v58  ;;  %v5242_v14 = vld [vmem:[#allocation75_spill] sm:$0xff]  ;;  %v5243_v60 = vld [vmem:[#allocation108_spill] sm:$0xff] }
 0x41b   : > { %v1960_v52 = vpop.permute.xlu0 %1959  ;;  %v1925_v29 = vsel %vm5225_vm1, %v5224_v48, %v1923_v55  ;;  %vm5226_vm2 = vmmov %vm5225_vm1  ;;  %v1929_v7 = vmul.f32 %v1926_v35, %v5230_v15  ;;  %vm5232_vm3 = vcmp.lt.s32.totalorder %v3147_v56, 112  ;;  %v1908_v0 = vmul.f32 %v5234_v31, %v1891_v2  ;;  %v5244_v11 = vld [vmem:[#allocation76_spill] sm:$0xff] }
 0x41c   : > { %v1927_v32 = vsel %vm5226_vm2, %v1923_v55, %v5224_v48  ;;  %v1930_v16 = vmul.f32 %v1925_v29, %v5229_v58  ;;  %v1961_v3 = vsel %vm5232_vm3, %v5231_v39, %v1958_v30  ;;  %vm5233_vm4 = vmmov %vm5232_vm3  ;;  %v1909_v19 = vmul.f32 %v5234_v31, %v1892_v38 }
 0x41d   : > { %v1995_v47 = vpop.permute.xlu1 %1994  ;;  %v1931_v50 = vmul.f32 %v1927_v32, %v5230_v15  ;;  %v1963_v10 = vsel %vm5233_vm4, %v1958_v30, %v5231_v39  ;;  %v1910_v18 = vmul.f32 %v5235_v21, %v1893_v44  ;;  %v1911_v24 = vmul.f32 %v5235_v21, %v1894_v1  ;;  %vm5239_vm5 = vmmov %vm5232_vm3  ;;  %v5251_v15 = vld [vmem:[#allocation111_spill] sm:$0xff] }
 0x41e   : > { %v1875_v51 = vadd.f32 %v1871_v4, %v1838_v12  ;;  %v1876_v57 = vadd.f32 %v1872_v45, %v1839_v54  ;;  %v1877_v33 = vadd.f32 %v1873_v53, %v1840_v62  ;;  %v1878_v13 = vadd.f32 %v1874_v40, %v1841_v25  ;;  %vm5240_vm6 = vmmov %vm5232_vm3  ;;  %v5246_v45 = vld [vmem:[#allocation68_spill] sm:$0xff]  ;;  %v5247_v53 = vld [vmem:[#allocation69_spill] sm:$0xff] }
 0x41f   : > { %v1997_v26 = vpop.permute.xlu0 %1996  ;;  %v1965_v55 = vmul.f32 %v1961_v3, %v5236_v28  ;;  %v1966_v63 = vmul.f32 %v1963_v10, %v5237_v23  ;;  %v1962_v42 = vsel %vm5239_vm5, %v5238_v22, %v1960_v52  ;;  %v1964_v5 = vsel %vm5240_vm6, %v1960_v52, %v5238_v22  ;;  %v5245_v52 = vld [vmem:[#allocation109_spill] sm:$0xff]  ;;  %v5256_v21 = vld [vmem:[#allocation63_spill] sm:$0xff] }
 0x420   : > { %v1945_v9 = vmul.f32 %v5241_v27, %v1928_v59  ;;  %v1946_v17 = vmul.f32 %v5241_v27, %v1929_v7  ;;  %v1947_v37 = vmul.f32 %v5242_v14, %v1930_v16  ;;  %v1948_v41 = vmul.f32 %v5242_v14, %v1931_v50  ;;  %v5254_v10 = vld [vmem:[#allocation77_spill] sm:$0xff] }
 0x421   : > { %v2032_v6 = vpop.permute.xlu1 %2031  ;;  %v1912_v30 = vadd.f32 %v1908_v0, %v1875_v51  ;;  %v1913_v12 = vadd.f32 %v1909_v19, %v1876_v57  ;;  %v1914_v54 = vadd.f32 %v1910_v18, %v1877_v33  ;;  %v1915_v34 = vadd.f32 %v1911_v24, %v1878_v13  ;;  %v5255_v0 = vld [vmem:[#allocation62_spill] sm:$0xff]  ;;  %v5257_v24 = vld [vmem:[#allocation112_spill] sm:$0xff] }
 0x422   : > { %v1967_v8 = vmul.f32 %v1962_v42, %v5236_v28  ;;  %v1968_v61 = vmul.f32 %v1964_v5, %v5237_v23  ;;  %v1998_v2 = vsel %vm1031_vm13, %v5243_v60, %v1995_v47  ;;  %v2000_v20 = vsel %vm1031_vm13, %v1995_v47, %v5243_v60  ;;  %v5248_v47 = vld [vmem:[#allocation110_spill] sm:$0xff]  ;;  %v5258_v28 = vld [vmem:[#allocation113_spill] sm:$0xff]  ;;  %v5260_v5 = vld [vmem:[#allocation79_spill] sm:$0xff] }
 0x423   : > { %v2034_v46 = vpop.permute.xlu0 %2033  ;;  %v1982_v43 = vmul.f32 %v5244_v11, %v1965_v55  ;;  %v1983_v35 = vmul.f32 %v5244_v11, %v1966_v63  ;;  %v1999_v44 = vsel %vm1031_vm13, %v5245_v52, %v1997_v26  ;;  %v2001_v1 = vsel %vm1031_vm13, %v1997_v26, %v5245_v52  ;;  %v5259_v63 = vld [vmem:[#allocation78_spill] sm:$0xff] }
 0x424   : > { %v1949_v48 = vadd.f32 %v1945_v9, %v1912_v30  ;;  %v1950_v29 = vadd.f32 %v1946_v17, %v1913_v12  ;;  %v1951_v32 = vadd.f32 %v1947_v37, %v1914_v54  ;;  %v1952_v36 = vadd.f32 %v1948_v41, %v1915_v34  ;;  %v5261_v41 = vld [vmem:[#allocation72_spill] sm:$0xff]  ;;  %v5262_v30 = vld [vmem:[#allocation73_spill] sm:$0xff] }
 0x425   : > { %v2069_v38 = vpop.permute.xlu1 %2068  ;;  %v2002_v49 = vmul.f32 %v1998_v2, %v5246_v45  ;;  %v2003_v40 = vmul.f32 %v2000_v20, %v5247_v53  ;;  %vm5249_vm7 = vcmp.lt.s32.totalorder %v3147_v56, 110  ;;  %v2004_v58 = vmul.f32 %v1999_v44, %v5246_v45  ;;  %v5263_v54 = vld [vmem:[#allocation80_spill] sm:$0xff]  ;;  %v5264_v20 = vld [vmem:[#allocation81_spill] sm:$0xff] }
 0x426   : > { %v2035_v62 = vsel %vm5249_vm7, %v5248_v47, %v2032_v6  ;;  %vm5250_vm8 = vmmov %vm5249_vm7  ;;  %v2005_v59 = vmul.f32 %v2001_v1, %v5247_v53  ;;  %v1986_v39 = vadd.f32 %v1982_v43, %v1949_v48  ;;  %v1987_v3 = vadd.f32 %v1983_v35, %v1950_v29  ;;  %v5265_v48 = vld [vmem:[#allocation83_spill] sm:$0xff] }
 0x427   : > { %v2071_v4 = vpop.permute.xlu0 %2070  ;;  %v2037_v25 = vsel %vm5250_vm8, %v2032_v6, %v5248_v47  ;;  %vm5252_vm13 = vmmov %vm5249_vm7  ;;  %v1984_v26 = vmul.f32 %v5254_v10, %v1967_v8  ;;  %v1985_v31 = vmul.f32 %v5254_v10, %v1968_v61  ;;  %v2039_v19 = vmul.f32 %v2035_v62, %v5255_v0 }
 0x428   : > { %v2036_v7 = vsel %vm5252_vm13, %v5251_v15, %v2034_v46  ;;  %vm5253_vm9 = vmmov %vm5249_vm7  ;;  %v2040_v18 = vmul.f32 %v2037_v25, %v5256_v21  ;;  %v2072_v51 = vsel %vm1097_vm15, %v5257_v24, %v2069_v38  ;;  %v2074_v57 = vsel %vm1097_vm15, %v2069_v38, %v5257_v24 }
 0x429   : > { %v2038_v16 = vsel %vm5253_vm9, %v2034_v46, %v5251_v15  ;;  %v2106_v50 = vpop.permute.xlu1 %2105  ;;  %v2041_v13 = vmul.f32 %v2036_v7, %v5255_v0  ;;  %v2073_v55 = vsel %vm1097_vm15, %v5258_v28, %v2071_v4  ;;  %v2075_v23 = vsel %vm1097_vm15, %v2071_v4, %v5258_v28  ;;  %v5268_v15 = vld [vmem:[#allocation115_spill] sm:$0xff] }
 0x42a   : > { %v2042_v6 = vmul.f32 %v2038_v16, %v5256_v21  ;;  %v2019_v22 = vmul.f32 %v5259_v63, %v2002_v49  ;;  %v2020_v42 = vmul.f32 %v5259_v63, %v2003_v40  ;;  %v2021_v27 = vmul.f32 %v5260_v5, %v2004_v58  ;;  %v5267_v40 = vld [vmem:[#allocation82_spill] sm:$0xff]  ;;  %v5274_v63 = vld [vmem:[#allocation36_spill] sm:$0xff] }
 0x42b   : > { %v2108_v33 = vpop.permute.xlu0 %2107  ;;  %v2022_v9 = vmul.f32 %v5260_v5, %v2005_v59  ;;  %v1988_v14 = vadd.f32 %v1984_v26, %v1951_v32  ;;  %v1989_v37 = vadd.f32 %v1985_v31, %v1952_v36  ;;  %v2076_v46 = vmul.f32 %v2072_v51, %v5261_v41  ;;  %v5266_v36 = vld [vmem:[#allocation114_spill] sm:$0xff]  ;;  %v5271_v26 = vld [vmem:[#allocation116_spill] sm:$0xff] }
 0x42c   : > { %v2077_v12 = vmul.f32 %v2074_v57, %v5262_v30  ;;  %v2056_v34 = vmul.f32 %v5263_v54, %v2039_v19  ;;  %v2057_v8 = vmul.f32 %v5263_v54, %v2040_v18  ;;  %v2078_v61 = vmul.f32 %v2073_v55, %v5261_v41  ;;  %v5272_v18 = vld [vmem:[#allocation117_spill] sm:$0xff]  ;;  %v5273_v55 = vld [vmem:[#allocation15_spill] sm:$0xff] }
 0x42d   : > { %v2143_v17 = vpop.permute.xlu1 %2142  ;;  %v2079_v60 = vmul.f32 %v2075_v23, %v5262_v30  ;;  %v2058_v38 = vmul.f32 %v5264_v20, %v2041_v13  ;;  %v2059_v11 = vmul.f32 %v5264_v20, %v2042_v6  ;;  %v2023_v43 = vadd.f32 %v2019_v22, %v1986_v39  ;;  %v5269_v39 = vld [vmem:[#allocation66_spill] sm:$0xff]  ;;  %v5277_v30 = vld [vmem:[#allocation119_spill] sm:$0xff] }
 0x42e   : > { %v2024_v35 = vadd.f32 %v2020_v42, %v1987_v3  ;;  %v2025_v52 = vadd.f32 %v2021_v27, %v1988_v14  ;;  %v2026_v44 = vadd.f32 %v2022_v9, %v1989_v37  ;;  %v2093_v29 = vmul.f32 %v5265_v48, %v2076_v46  ;;  %v5275_v42 = vld [vmem:[#allocation118_spill] sm:$0xff]  ;;  %v5276_v9 = vld [vmem:[#allocation85_spill] sm:$0xff] }
 0x42f   : > { %v2145_v2 = vpop.permute.xlu0 %2144  ;;  %v2094_v32 = vmul.f32 %v5265_v48, %v2077_v12  ;;  %v2109_v4 = vsel %vm1130_vm14, %v5266_v36, %v2106_v50  ;;  %v2111_v45 = vsel %vm1130_vm14, %v2106_v50, %v5266_v36  ;;  %v2060_v49 = vadd.f32 %v2056_v34, %v2023_v43  ;;  %v5270_v50 = vld [vmem:[#allocation67_spill] sm:$0xff]  ;;  %v5278_v34 = vld [vmem:[#allocation120_spill] sm:$0xff]  ;;  %v5285_v48 = vld [vmem:[#allocation121_spill] sm:$0xff] }
 0x430   : > { %v2061_v53 = vadd.f32 %v2057_v8, %v2024_v35  ;;  %v2095_v47 = vmul.f32 %v5267_v40, %v2078_v61  ;;  %v2096_v62 = vmul.f32 %v5267_v40, %v2079_v60  ;;  %v2062_v58 = vadd.f32 %v2058_v38, %v2025_v52  ;;  %v5281_v60 = vld [vmem:[#allocation84_spill] sm:$0xff]  ;;  %v5282_v38 = vld [vmem:[#allocation70_spill] sm:$0xff]  ;;  %v5283_v43 = vld [vmem:[#allocation71_spill] sm:$0xff] }
 0x431   : > { %v2180_v1 = vpop.permute.xlu1 %2179  ;;  %v2063_v59 = vadd.f32 %v2059_v11, %v2026_v44  ;;  %v2110_v7 = vsel %vm1130_vm14, %v5268_v15, %v2108_v33  ;;  %v2112_v16 = vsel %vm1130_vm14, %v2108_v33, %v5268_v15  ;;  %v2113_v3 = vmul.f32 %v2109_v4, %v5269_v39  ;;  %v5284_v52 = vld [vmem:[#allocation86_spill] sm:$0xff]  ;;  %v5291_v15 = vld [vmem:[#allocation88_spill] sm:$0xff] }
 0x432   : > { %v2114_v10 = vmul.f32 %v2111_v45, %v5270_v50  ;;  %v2146_v31 = vsel %vm1163_vm11, %v5271_v26, %v2143_v17  ;;  %v2148_v0 = vsel %vm1163_vm11, %v2143_v17, %v5271_v26  ;;  %v2097_v19 = vadd.f32 %v2093_v29, %v2060_v49  ;;  %v5288_v45 = vld [vmem:[#allocation35_spill] sm:$0xff] }
 0x433   : > { %v2182_v25 = vpop.permute.xlu0 %2181  ;;  %v2098_v21 = vadd.f32 %v2094_v32, %v2061_v53  ;;  %v2147_v24 = vsel %vm1163_vm11, %v5272_v18, %v2145_v2  ;;  %v2149_v51 = vsel %vm1163_vm11, %v2145_v2, %v5272_v18  ;;  %v2099_v57 = vadd.f32 %v2095_v47, %v2062_v58  ;;  %v5289_v53 = vld [vmem:[#allocation33_spill] sm:$0xff] }
 0x434   : > { %v2100_v33 = vadd.f32 %v2096_v62, %v2063_v59  ;;  %v2115_v13 = vmul.f32 %v2110_v7, %v5269_v39  ;;  %v2116_v6 = vmul.f32 %v2112_v16, %v5270_v50  ;;  %v2150_v23 = vmul.f32 %v2146_v31, %v5273_v55  ;;  %v5292_v31 = vld [vmem:[#allocation89_spill] sm:$0xff] }
 0x435   : > { %v2217_v28 = vpop.permute.xlu1 %2216  ;;  %v2151_v22 = vmul.f32 %v2148_v0, %v5274_v63  ;;  %v2183_v5 = vsel %vm1196_vm0, %v5275_v42, %v2180_v1  ;;  %v2185_v27 = vsel %vm1196_vm0, %v2180_v1, %v5275_v42  ;;  %v2130_v17 = vmul.f32 %v5276_v9, %v2113_v3 }
 0x436   : > { %v2131_v14 = vmul.f32 %v5276_v9, %v2114_v10  ;;  %v2152_v37 = vmul.f32 %v2147_v24, %v5273_v55  ;;  %v2153_v41 = vmul.f32 %v2149_v51, %v5274_v63  ;;  %v2184_v12 = vsel %vm1196_vm0, %v5277_v30, %v2182_v25  ;;  %v5295_v55 = vld [vmem:[#allocation91_spill] sm:$0xff] }
 0x437   : > { %v2219_v46 = vpop.permute.xlu0 %2218  ;;  %v2186_v54 = vsel %vm1196_vm0, %v2182_v25, %v5277_v30  ;;  %vm5279_vm11 = vcmp.lt.s32.totalorder %v3147_v56, 94  ;;  %v2132_v2 = vmul.f32 %v5281_v60, %v2115_v13  ;;  %v2133_v20 = vmul.f32 %v5281_v60, %v2116_v6  ;;  %v5290_v25 = vld [vmem:[#allocation87_spill] sm:$0xff]  ;;  %v2557_v30 = vld [vmem:[%s2765_s18 + $0x28] sm:$0xff]  ;;  %v2559_v60 = vld [vmem:[%s2765_s18 + $0x38] sm:$0xff] }
 0x438   : > { %v2220_v8 = vsel %vm5279_vm11, %v5278_v34, %v2217_v28  ;;  %vm5280_vm14 = vmmov %vm5279_vm11  ;;  %v2187_v11 = vmul.f32 %v2183_v5, %v5282_v38  ;;  %v2188_v35 = vmul.f32 %v2185_v27, %v5283_v43  ;;  %v2167_v44 = vmul.f32 %v5284_v52, %v2150_v23 }
 0x439   : > { %v2222_v61 = vsel %vm5280_vm14, %v2217_v28, %v5278_v34  ;;  %v2168_v1 = vmul.f32 %v5284_v52, %v2151_v22  ;;  %vm5286_vm15 = vmmov %vm5279_vm11  ;;  %v2189_v36 = vmul.f32 %v2184_v12, %v5282_v38  ;;  %v2190_v4 = vmul.f32 %v2186_v54, %v5283_v43 }
 0x43a   : > { %v2221_v29 = vsel %vm5286_vm15, %v5285_v48, %v2219_v46  ;;  %vm5287_vm0 = vmmov %vm5279_vm11  ;;  %v2224_v49 = vmul.f32 %v2220_v8, %v5288_v45  ;;  %v2225_v40 = vmul.f32 %v2222_v61, %v5289_v53  ;;  %v2134_v47 = vadd.f32 %v2130_v17, %v2097_v19  ;;  %v2558_v8 = vld [vmem:[%s2765_s18 + $0x30] sm:$0xff] }
 0x43b   : > { %v2223_v32 = vsel %vm5287_vm0, %v2219_v46, %v5285_v48  ;;  %v2135_v62 = vadd.f32 %v2131_v14, %v2098_v21  ;;  %v2169_v58 = vmul.f32 %v5290_v25, %v2152_v37  ;;  %v2170_v59 = vmul.f32 %v5290_v25, %v2153_v41  ;;  %v5293_v21 = vld [vmem:[#allocation90_spill] sm:$0xff]  ;;  %v2556_v41 = vld [vmem:[%s2765_s18 + $0x20] sm:$0xff]  ;;  %s2566_s18 = scalar_lea.vmem %s2565_s17, 2048 }
 0x43c   : > { %v2204_v7 = vmul.f32 %v5291_v15, %v2187_v11  ;;  %v2205_v16 = vmul.f32 %v5291_v15, %v2188_v35  ;;  %v2226_v56 = vmul.f32 %v2221_v29, %v5288_v45  ;;  %v2227_v39 = vmul.f32 %v2223_v32, %v5289_v53  ;;  %p2568_p1 = scmp.lt.s32.totalorder %s2566_s18, %s2560_s12 }
 0x43d   : > { %v2136_v3 = vadd.f32 %v2132_v2, %v2099_v57  ;;  %v2137_v50 = vadd.f32 %v2133_v20, %v2100_v33  ;;  %v2172_v10 = vadd.f32 %v2168_v1, %v2135_v62  ;;  %v2171_v26 = vadd.f32 %v2167_v44, %v2134_v47 }
 0x43e   : > { %v2206_v0 = vmul.f32 %v5292_v31, %v2189_v36  ;;  %v2207_v19 = vmul.f32 %v5292_v31, %v2190_v4  ;;  %v2241_v18 = vmul.f32 %v5293_v21, %v2224_v49  ;;  %v2242_v24 = vmul.f32 %v5293_v21, %v2225_v40  ;;  %p2569_p2 = por %p2568_p1, %p2567_p0 }
 0x43f   : > { %v2174_v51 = vadd.f32 %v2170_v59, %v2137_v50  ;;  %v2173_v13 = vadd.f32 %v2169_v58, %v2136_v3  ;;  %v2209_v6 = vadd.f32 %v2205_v16, %v2172_v10  ;;  %v2208_v28 = vadd.f32 %v2204_v7, %v2171_v26 }
 0x440   : > { %v2243_v57 = vmul.f32 %v5295_v55, %v2226_v56  ;;  %v2244_v33 = vmul.f32 %v5295_v55, %v2227_v39  ;;  %p2570_p3 = pnand %p2569_p2, %p2563_p13 }
 0x441   : > { %v2246_v23 = vadd.f32 %v2242_v24, %v2209_v6  ;;  %v2245_v63 = vadd.f32 %v2241_v18, %v2208_v28  ;;  %v2211_v22 = vadd.f32 %v2207_v19, %v2174_v51  ;;  %v2210_v42 = vadd.f32 %v2206_v0, %v2173_v13 }
 0x443   : > { %v2248_v17 = vadd.f32 %v2244_v33, %v2211_v22  ;;  %v2247_v14 = vadd.f32 %v2243_v57, %v2210_v42 }
 0x446   : > { %v2252_v5 = vpop.permute.xlu1 %2251 }
 0x447   : > { %v2259_v27 = vadd.f32 %v2252_v5, %v2245_v63  ;;  %v2260_v9 = vadd.f32 %v2252_v5, %v2246_v23 }
 0x448   : > { %v2257_v37 = vpop.permute.xlu0 %2256 }
 0x449   : > { %v2267_v46 = vadd.f32 %v2556_v41, %v2259_v27  ;;  %v2268_v12 = vadd.f32 %v2557_v30, %v2260_v9  ;;  %v2261_v54 = vadd.f32 %v2257_v37, %v2247_v14  ;;  %v2262_v34 = vadd.f32 %v2257_v37, %v2248_v17 }
 0x44b   : > { %2275 = vst [vmem:[%s3766_s8 + $0x20] sm:$0xff] %v2267_v46  ;;  %2276 = vst [vmem:[%s3766_s8 + $0x28] sm:$0xff] %v2268_v12  ;;  %v2269_v61 = vadd.f32 %v2558_v8, %v2261_v54  ;;  %v2270_v2 = vadd.f32 %v2559_v60, %v2262_v34 }
 0x44d   : > { %2277 = vst [vmem:[%s3766_s8 + $0x30] sm:$0xff] %v2269_v61  ;;  %2278 = vst [vmem:[%s3766_s8 + $0x38] sm:$0xff] %v2270_v2 }
 0x44e   : > { %2573 = shalt.err (!%p2570_p3)
}
 0x44f   : > { %s2574_s10 = scalar_lea.hbm %s4637_s30, 1024  ;;  %s2578_s13 = scalar_lea.hbm %s5297_s29, 2048 }
 0x450   : > { %p2575_p4 = scmp.ne.s32.totalorder %s4637_s30, %s2574_s10  ;;  %p2579_p9 = scmp.lt.u32.totalorder %s4637_s30, %s5297_s29 }
 0x451   : > { %p2580_p10 = scmp.lt.u32.totalorder %s2578_s13, %s2574_s10  ;;  %p2582_p12 = scmp.lt.u32.totalorder %s2574_s10, %s4637_s30 }
 0x452   : > { %p2576_p7 = pnand %p2575_p4, %p2744_p5 }
 0x453   : > { %p2581_p11 = por %p2580_p10, %p2579_p9 }
 0x454   : > { %p2577_p8 = pneg %p2576_p7 }
 0x455   : > { %p2583_p13 = por %p2582_p12, %p2581_p11 }
 0x457   : > { %p2584_p0 = pnand %p2583_p13, %p2577_p8 }
 0x459   : > { %2587 = shalt.err (!%p2584_p0)
}
 0x45a   : > { %s2650_s6 = smov 256  }
 0x45b   : > { %2468 = dma.vmem_to_hbm [thread:$0]  (%p2744_p5), %s4643_s25, 1024, %s4637_s30, %s4649_s11, %s2650_s6, %s2650_s6, %s4967_s21  }
 0x45c PF: > { %s5298_s23 = sld [smem:[#allocation7_spill]]  ;;  %s5299_s1 = sld [smem:[#allocation5_spill]] }
 0x462   : > { %p2474_p1 = scmp.ge.s32.totalorder %s5298_s23, 2  ;;  %s2308_s15 = sand.u32 1, %s5299_s1  }
 0x463   : > { %s2309_s24 = scalar_lea.sflag [#allocation3], %s2308_s15 }
 0x464   : > { %p2471_p2 = pnand %p2474_p1, %p2748_p6 }
 0x466   : > { %2605 = dma.done.wait (!%p2471_p2), %s2309_s24, 1024  }
 0x467   : > { %2607 = vsyncadd (!%p2471_p2), %s2309_s24, 4294966272  ;;  %s5301_s16 = sld [smem:[#allocation9_spill]]  ;;  %s5302_s19 = sld [smem:[#allocation6_spill]] }
 0x468   : > { %s5303_s15 = sld [smem:[#allocation10_spill]]  ;;  %s5304_s13 = smov %s2614_s14 }
 0x46d   : > { %p20_p3 = scmp.ge.s32.totalorder %s5301_s16, 4   ;;  %s5305_s14 = smov %s5302_s19 }
 0x46f   :  { %22 = sbr.rel (!%p20_p3) target bundleno = 12 (0xc), region = 167 }
 0x476   :  { %2314 = vsyncpa [#allocation3], 1 }
 0x477   :  { %2316 = vsyncpa [#allocation3 + $0x1], 1 }

</bundles_post_ra>
